<compile_context>
chip_gen: v5e
topology: v5e:2x2
jax: 0.10.0
libtpu: 0.0.40
codegen_flags: <defaults>
</compile_context>

<pallas_src>
import functools

import jax
import jax.numpy as jnp
import numpy as np
from jax.experimental import pallas as pl
from jax.experimental.pallas import tpu as pltpu

BN_EPS = 1e-5
LANE = 128


def _vmem_limit_bytes():
    """Generation-aware scoped-VMEM limit (v5e/v6e: 128 MiB phys, v7x: 64 MiB)."""
    cap = 64 * 1024 * 1024
    try:
        cap = int(getattr(pltpu.get_tpu_info(), "vmem_capacity_bytes", cap))
    except Exception:
        pass
    return int(min(cap * 3 // 4, 100 * 1024 * 1024))


VMEM_LIMIT = _vmem_limit_bytes()


# --------------------------------------------------------------------------
# small host-side helpers (layout / padding / BN folding glue)
# --------------------------------------------------------------------------
def _rup(x, mult=LANE):
    return ((x + mult - 1) // mult) * mult


def _pick_tile(m):
    """Row tile for the flat (M, C) stages.

    Prefer big tiles so the mem-bound stages approach the HBM roofline; if M
    has no large divisor, zero-pad M up to a multiple of the preferred tile
    instead of degrading to tiny tiles (padded rows are exactly zero / masked,
    so the in-kernel BatchNorm partial sums stay exact).
    Returns (tile_rows, padded_m).
    """
    for t in (2048, 1024, 512, 256):
        if m % t == 0:
            return t, m
    if m < 512:
        t = _rup(max(m, 16), 16)
        return t, t
    return 512, _rup(m, 512)


def _pad_cols(a, to):
    pad = to - a.shape[-1]
    return a if pad == 0 else jnp.pad(a, ((0, 0), (0, pad)))


def _pad_rows(a, to):
    pad = to - a.shape[0]
    return a if pad == 0 else jnp.pad(a, ((0, pad), (0, 0)))


def _pad_mat(w, rows, cols):
    return jnp.pad(w, ((0, rows - w.shape[0]), (0, cols - w.shape[1])))


def _pad_vec(v, to, value=0.0):
    v = v.astype(jnp.float32)
    pad = to - v.shape[0]
    if pad == 0:
        return v
    return jnp.concatenate([v, jnp.full((pad,), value, jnp.float32)])


def _bn_scale_shift(s, ss, count, gamma, beta):
    """Fold training-mode BN (batch stats, biased var) into y*scale + shift.

    NOTE: one-pass E[x^2]-E[x]^2 in f32 is fine at these magnitudes/counts; a
    shifted/Welford combine of the per-tile partials is the robust upgrade for
    very large M (documented per review).
    """
    mean = s / count
    var = jnp.maximum(ss / count - mean * mean, 0.0)
    scale = gamma * jax.lax.rsqrt(var + BN_EPS)
    shift = beta - mean * scale
    return scale, shift  # each (1, C), float32


# --------------------------------------------------------------------------
# kernel 1/3: [optional fused BN+ReLU] -> 1x1-conv matmul -> per-tile BN stats
# --------------------------------------------------------------------------
def _mm_stats_kernel(*refs, pre_norm, block_rows, valid_rows):
    if pre_norm:
        x_ref, scale_ref, shift_ref, w_ref, y_ref, sum_ref, sq_ref = refs
        a = jnp.maximum(
            x_ref[...].astype(jnp.float32) * scale_ref[...] + shift_ref[...], 0.0)
        if valid_rows is not None:
            # zero rows that are pure M-padding so the BN shift can't make them
            # non-zero and pollute the partial statistics
            row = (pl.program_id(0) * block_rows
                   + jax.lax.broadcasted_iota(jnp.int32, a.shape, 0))
            a = jnp.where(row < valid_rows, a, 0.0)
        a = a.astype(w_ref.dtype)
    else:
        x_ref, w_ref, y_ref, sum_ref, sq_ref = refs
        a = x_ref[...].astype(w_ref.dtype)
    y = jnp.dot(a, w_ref[...], preferred_element_type=jnp.float32)
    y_ref[...] = y.astype(y_ref.dtype)
    # per-tile partial statistics (reduced across tiles in JAX glue)
    sum_ref[0] = jnp.sum(y, axis=0, keepdims=True)
    sq_ref[0] = jnp.sum(y * y, axis=0, keepdims=True)


def _matmul_stats(x2d, w2d, *, tm, scale=None, shift=None, valid_rows=None,
                  out_dtype=jnp.float32):
    m, cin = x2d.shape
    cout = w2d.shape[1]
    nt = m // tm
    pre_norm = scale is not None

    in_specs = [pl.BlockSpec((tm, cin), lambda i: (i, 0))]
    args = [x2d]
    if pre_norm:
        in_specs += [pl.BlockSpec((1, cin), lambda i: (0, 0)),
                     pl.BlockSpec((1, cin), lambda i: (0, 0))]
        args += [scale, shift]
    # TODO(synk): on v7x single-buffer this resident weight (constant index map)
    # via pipeline_mode to save VMEM.
    in_specs.append(pl.BlockSpec((cin, cout), lambda i: (0, 0)))
    args.append(w2d)

    bpe_in = int(x2d.dtype.itemsize)
    bpe_w = int(w2d.dtype.itemsize)
    bpe_out = int(jnp.dtype(out_dtype).itemsize)

    y, s, ss = pl.pallas_call(
        functools.partial(_mm_stats_kernel, pre_norm=pre_norm,
                          block_rows=tm, valid_rows=valid_rows),
        grid=(nt,),
        in_specs=in_specs,
        out_specs=(pl.BlockSpec((tm, cout), lambda i: (i, 0)),
                   pl.BlockSpec((1, 1, cout), lambda i: (i, 0, 0)),
                   pl.BlockSpec((1, 1, cout), lambda i: (i, 0, 0))),
        out_shape=(jax.ShapeDtypeStruct((m, cout), out_dtype),
                   jax.ShapeDtypeStruct((nt, 1, cout), jnp.float32),
                   jax.ShapeDtypeStruct((nt, 1, cout), jnp.float32)),
        compiler_params=pltpu.CompilerParams(
            dimension_semantics=("parallel",),
            vmem_limit_bytes=VMEM_LIMIT),
        cost_estimate=pl.CostEstimate(
            flops=2 * m * cin * cout,
            transcendentals=0,
            bytes_accessed=(m * cin * bpe_in + cin * cout * bpe_w
                            + m * cout * bpe_out)),
    )(*args)
    return y, s.sum(axis=0), ss.sum(axis=0)  # stats: (1, cout) float32


# --------------------------------------------------------------------------
# kernel 2: fused BN1+ReLU + 3x3 conv (K-widened, value accumulator) + BN2 stats
# --------------------------------------------------------------------------
def _conv3x3_stats_kernel(xp_ref, scale_ref, shift_ref, w_ref,
                          y_ref, sum_ref, sq_ref, *, H, W):
    cin = xp_ref.shape[-1]
    x = xp_ref[0].astype(jnp.float32)                      # (H+2, W+2, cin)
    # Fused BN + ReLU; the 1-pixel halo is re-zeroed with an in-kernel iota
    # interior mask (no DMA'd lane-padded mask array) because the affine shift
    # would otherwise make the zero padding non-zero.
    row = jax.lax.broadcasted_iota(jnp.int32, x.shape, 0)
    col = jax.lax.broadcasted_iota(jnp.int32, x.shape, 1)
    interior = (row >= 1) & (row <= H) & (col >= 1) & (col <= W)
    a = jnp.where(interior,
                  jnp.maximum(x * scale_ref[...] + shift_ref[...], 0.0),
                  0.0).astype(w_ref.dtype)
    # Hoist the sublane-unaligned dx shifts out of the tap loop (3 shifted
    # views instead of 9) and widen the contraction to K = 3*cin: one matmul
    # per dy row instead of nine K=cin taps -> better systolic-depth use on
    # the 256-deep v6e/v7x MXUs.
    acat = jnp.concatenate(
        [a[:, 0:W, :], a[:, 1:W + 1, :], a[:, 2:W + 2, :]], axis=-1)
    acc = None
    for dy in range(3):                                     # static unroll
        win = acat[dy:dy + H].reshape(H * W, 3 * cin)       # leading-axis slice
        part = jnp.dot(win, w_ref[dy], preferred_element_type=jnp.float32)
        acc = part if dy == 0 else acc + part               # value accumulator
    y_ref[...] = acc.astype(y_ref.dtype)
    sum_ref[0] = jnp.sum(acc, axis=0, keepdims=True)
    sq_ref[0] = jnp.sum(acc * acc, axis=0, keepdims=True)


def _conv3x3_stats(y1p, scale, shift, w2, *, out_dtype=jnp.float32):
    # TODO(synk): spatial halo-tiling (grid (n, h_tiles), 1-row overlap) for
    # large H*W / wide channels so the working set fits v7x's 64 MiB VMEM; one
    # image per grid step is assumed to fit here.
    n, hp2, wp2, cin = y1p.shape
    h, w = hp2 - 2, wp2 - 2
    hw = h * w
    cout = w2.shape[-1]
    bpe_in = int(y1p.dtype.itemsize)
    bpe_w = int(w2.dtype.itemsize)
    bpe_out = int(jnp.dtype(out_dtype).itemsize)

    y2, s, ss = pl.pallas_call(
        functools.partial(_conv3x3_stats_kernel, H=h, W=w),
        grid=(n,),
        in_specs=[pl.BlockSpec((1, hp2, wp2, cin), lambda b: (b, 0, 0, 0)),
                  pl.BlockSpec((1, cin), lambda b: (0, 0)),
                  pl.BlockSpec((1, cin), lambda b: (0, 0)),
                  pl.BlockSpec((3, 3 * cin, cout), lambda b: (0, 0, 0))],
        out_specs=(pl.BlockSpec((hw, cout), lambda b: (b, 0)),
                   pl.BlockSpec((1, 1, cout), lambda b: (b, 0, 0)),
                   pl.BlockSpec((1, 1, cout), lambda b: (b, 0, 0))),
        out_shape=(jax.ShapeDtypeStruct((n * hw, cout), out_dtype),
                   jax.ShapeDtypeStruct((n, 1, cout), jnp.float32),
                   jax.ShapeDtypeStruct((n, 1, cout), jnp.float32)),
        compiler_params=pltpu.CompilerParams(
            dimension_semantics=("parallel",),
            vmem_limit_bytes=VMEM_LIMIT),
        cost_estimate=pl.CostEstimate(
            flops=2 * n * hw * 9 * cin * cout,
            transcendentals=0,
            bytes_accessed=(n * hp2 * wp2 * cin * bpe_in
                            + 3 * 3 * cin * cout * bpe_w
                            + n * hw * cout * bpe_out)),
    )(y1p, scale, shift, w2)
    return y2, s.sum(axis=0), ss.sum(axis=0)


# --------------------------------------------------------------------------
# kernel 3b: BN3 + residual add + ReLU (elementwise epilogue)
# --------------------------------------------------------------------------
def _norm_res_relu_kernel(y_ref, r_ref, scale_ref, shift_ref, o_ref):
    y = y_ref[...].astype(jnp.float32)
    o_ref[...] = jnp.maximum(
        y * scale_ref[...] + shift_ref[...] + r_ref[...].astype(jnp.float32), 0.0)


def _norm_residual_relu(y3, res, scale, shift, *, tm):
    m, c = y3.shape
    nt = m // tm
    return pl.pallas_call(
        _norm_res_relu_kernel,
        grid=(nt,),
        in_specs=[pl.BlockSpec((tm, c), lambda i: (i, 0)),
                  pl.BlockSpec((tm, c), lambda i: (i, 0)),
                  pl.BlockSpec((1, c), lambda i: (0, 0)),
                  pl.BlockSpec((1, c), lambda i: (0, 0))],
        out_specs=pl.BlockSpec((tm, c), lambda i: (i, 0)),
        out_shape=jax.ShapeDtypeStruct((m, c), jnp.float32),
        compiler_params=pltpu.CompilerParams(
            dimension_semantics=("parallel",),
            vmem_limit_bytes=VMEM_LIMIT),
    )(y3, res, scale, shift)


# --------------------------------------------------------------------------
# full identity_block forward (training-mode BatchNorm), NCHW in / NCHW out
# --------------------------------------------------------------------------
def identity_block_forward(x_nchw, params, *, compute_dtype=jnp.bfloat16):
    n, c_in, h, w = x_nchw.shape
    m = n * h * w
    hw = h * w

    f0 = params["conv1_w"].shape[0]
    f1 = params["conv2_w"].shape[0]
    f2 = params["conv3_w"].shape[0]
    assert f2 == c_in, "identity block requires filters[2] == input_dim"
    sub = 8 * (4 // jnp.dtype(compute_dtype).itemsize)     # f32: 8, bf16: 16
    assert hw % sub == 0, f"H*W must be a multiple of {sub} for {compute_dtype}"

    cin_p, f0_p, f1_p, f2_p = _rup(c_in), _rup(f0), _rup(f1), _rup(f2)
    tm, m_p = _pick_tile(m)

    # layout glue: NCHW -> NHWC -> (M, C); channels lane-padded to 128, rows
    # zero-padded up to a multiple of the row tile (exact for BN: zero rows add
    # nothing to the partial sums and the count below uses the true M).
    # TODO(synk): if the surrounding model can feed/consume NHWC directly, drop
    # these transposes (full-tensor HBM round trips outside the kernels).
    x_nhwc = jnp.transpose(x_nchw, (0, 2, 3, 1)).astype(jnp.float32)
    x2d = _pad_rows(_pad_cols(x_nhwc.reshape(m, c_in), cin_p), m_p)

    # weights: torch (Cout, Cin, kh, kw) -> matmul layouts, lane-padded; the 3x3
    # weight is regrouped as (dy, dx*Cin + ci, Cout) for the K = 3*Cin matmuls.
    w1 = _pad_mat(jnp.transpose(params["conv1_w"][:, :, 0, 0], (1, 0)), cin_p, f0_p)
    w3 = _pad_mat(jnp.transpose(params["conv3_w"][:, :, 0, 0], (1, 0)), f1_p, f2_p)
    w2 = jnp.transpose(params["conv2_w"], (2, 3, 1, 0))            # (3,3,f0,f1)
    w2 = jnp.pad(w2, ((0, 0), (0, 0), (0, f0_p - f0), (0, f1_p - f1)))
    w2 = w2.reshape(3, 3 * f0_p, f1_p)

    g1, b1 = _pad_vec(params["bn1_g"], f0_p, 1.0), _pad_vec(params["bn1_b"], f0_p)
    g2, b2 = _pad_vec(params["bn2_g"], f1_p, 1.0), _pad_vec(params["bn2_b"], f1_p)
    g3, b3 = _pad_vec(params["bn3_g"], f2_p, 1.0), _pad_vec(params["bn3_b"], f2_p)

    # NOTE: conv biases are intentionally dropped: with training-mode BatchNorm
    # right after each conv they cancel exactly in (y - mean) and leave the
    # variance unchanged, so they are dead compute / dead HBM traffic.

    cd = compute_dtype

    # stage 1: conv1 (1x1) + partial BN1 stats  (bf16 MXU datapath, f32 accum)
    y1, s1, ss1 = _matmul_stats(x2d.astype(cd), w1.astype(cd), tm=tm,
                                out_dtype=cd)
    scale1, shift1 = _bn_scale_shift(s1, ss1, m, g1, b1)

    # stage 2: fused BN1+ReLU + conv2 (3x3, pad 1) + partial BN2 stats.
    # Only a 1-pixel halo pad (no 9x im2col).
    # TODO(synk): write conv1's output directly into the interior of a halo
    # buffer (per-review) to drop this jnp.pad HBM round trip of y1.
    y1_img = (y1[:m] if m_p != m else y1).reshape(n, h, w, f0_p)
    y1p = jnp.pad(y1_img, ((0, 0), (1, 1), (1, 1), (0, 0)))
    y2, s2, ss2 = _conv3x3_stats(y1p, scale1, shift1, w2.astype(cd),
                                 out_dtype=cd)
    scale2, shift2 = _bn_scale_shift(s2, ss2, m, g2, b2)

    # stage 3: fused BN2+ReLU + conv3 (1x1) + partial BN3 stats
    y2_rows = _pad_rows(y2, m_p)
    y3, s3, ss3 = _matmul_stats(y2_rows, w3.astype(cd), tm=tm,
                                scale=scale2, shift=shift2,
                                valid_rows=(m if m_p != m else None),
                                out_dtype=cd)
    scale3, shift3 = _bn_scale_shift(s3, ss3, m, g3, b3)

    # stage 4: BN3 + residual add + ReLU (f32 residual path)
    out2d = _norm_residual_relu(y3, x2d, scale3, shift3, tm=tm)

    out = out2d[:m, :c_in].reshape(n, h, w, c_in)
    return jnp.transpose(out, (0, 3, 1, 2))


# --------------------------------------------------------------------------
# parameter init (PyTorch layouts) and a pure-XLA reference for validation
# --------------------------------------------------------------------------
def init_params(key, input_dim, filters):
    f0, f1, f2 = filters
    assert f2 == input_dim, "identity block requires filters[2] == input_dim"
    ks = jax.random.split(key, 6)
    scale = 0.1
    return {
        "conv1_w": scale * jax.random.normal(ks[0], (f0, input_dim, 1, 1), jnp.float32),
        "conv1_b": scale * jax.random.normal(ks[1], (f0,), jnp.float32),
        "conv2_w": scale * jax.random.normal(ks[2], (f1, f0, 3, 3), jnp.float32),
        "conv2_b": scale * jax.random.normal(ks[3], (f1,), jnp.float32),
        "conv3_w": scale * jax.random.normal(ks[4], (f2, f1, 1, 1), jnp.float32),
        "conv3_b": scale * jax.random.normal(ks[5], (f2,), jnp.float32),
        # BatchNorm affine params (PyTorch default init: weight=1, bias=0)
        "bn1_g": jnp.ones((f0,), jnp.float32), "bn1_b": jnp.zeros((f0,), jnp.float32),
        "bn2_g": jnp.ones((f1,), jnp.float32), "bn2_b": jnp.zeros((f1,), jnp.float32),
        "bn3_g": jnp.ones((f2,), jnp.float32), "bn3_b": jnp.zeros((f2,), jnp.float32),
    }


def identity_block_reference(x, params):
    """Pure-XLA reference matching the PyTorch module in training mode."""
    def conv(x, w, b, pad):
        y = jax.lax.conv_general_dilated(
            x, w, window_strides=(1, 1), padding=[(pad, pad), (pad, pad)],
            dimension_numbers=("NCHW", "OIHW", "NCHW"))
        return y + b.reshape(1, -1, 1, 1)

    def bn(x, g, b):
        mean = jnp.mean(x, axis=(0, 2, 3), keepdims=True)
        var = jnp.mean((x - mean) ** 2, axis=(0, 2, 3), keepdims=True)
        return ((x - mean) * jax.lax.rsqrt(var + BN_EPS)
                * g.reshape(1, -1, 1, 1) + b.reshape(1, -1, 1, 1))

    y = jax.nn.relu(bn(conv(x, params["conv1_w"], params["conv1_b"], 0),
                       params["bn1_g"], params["bn1_b"]))
    y = jax.nn.relu(bn(conv(y, params["conv2_w"], params["conv2_b"], 1),
                       params["bn2_g"], params["bn2_b"]))
    y = bn(conv(y, params["conv3_w"], params["conv3_b"], 0),
           params["bn3_g"], params["bn3_b"])
    return jax.nn.relu(y + x)


if __name__ == "__main__":
    key = jax.random.PRNGKey(0)
    k_x, k_p, k_x2, k_p2 = jax.random.split(key, 4)

    # --- main config: bf16 MXU datapath (default) --------------------------
    input_dim = 4
    filters = [8, 8, 4]                      # filters[2] must equal input_dim
    x = jax.random.normal(k_x, (2, input_dim, 16, 16), jnp.float32)   # NCHW
    params = init_params(k_p, input_dim, filters)

    fwd = jax.jit(identity_block_forward)
    out = jax.block_until_ready(fwd(x, params))
    assert out.shape == x.shape, (out.shape, x.shape)
    assert bool(jnp.all(out >= 0.0))         # final ReLU

    ref = jax.block_until_ready(jax.jit(identity_block_reference)(x, params))
    np.testing.assert_allclose(np.asarray(out), np.asarray(ref),
                               rtol=5e-2, atol=5e-2)

    # --- second config: f32 datapath, awkward M (exercises the zero-padded
    #     row tiling and in-kernel row masking of the BN partial sums) -------
    input_dim2, filters2 = 4, [16, 8, 4]
    x2 = jax.random.normal(k_x2, (5, input_dim2, 16, 8), jnp.float32)  # M = 640
    params2 = init_params(k_p2, input_dim2, filters2)
    fwd_f32 = jax.jit(functools.partial(identity_block_forward,
                                        compute_dtype=jnp.float32))
    out2 = jax.block_until_ready(fwd_f32(x2, params2))
    ref2 = jax.block_until_ready(jax.jit(identity_block_reference)(x2, params2))
    np.testing.assert_allclose(np.asarray(out2), np.asarray(ref2),
                               rtol=2e-2, atol=2e-2)

    print("KERNEL_OK")
</pallas_src>

<mosaic_0001>
module attributes {stable_mosaic.version = 11 : i64} {
  func.func @_mm_stats_kernel(%arg0: i32, %arg1: memref<512x128xbf16, #tpu.memory_space<vmem>>, %arg2: memref<128x128xbf16, #tpu.memory_space<vmem>>, %arg3: memref<512x128xbf16, #tpu.memory_space<vmem>>, %arg4: memref<1x1x128xf32, #tpu.memory_space<vmem>>, %arg5: memref<1x1x128xf32, #tpu.memory_space<vmem>>) attributes {dimension_semantics = [#tpu.dimension_semantics<parallel>], iteration_bounds = array<i64: 1>, scalar_prefetch = 0 : i64, scratch_operands = 0 : i64, tpu.core_type = #tpu.core_type<tc>, window_params = [{transform_indices = @transform_0, window_bounds = array<i64: 512, 128>}, {pipeline_mode = #tpu.pipeline_mode<synchronous>, transform_indices = @transform_1, window_bounds = array<i64: 128, 128>}, {transform_indices = @transform_2, window_bounds = array<i64: 512, 128>}, {transform_indices = @transform_3, window_bounds = array<i64: 1, 1, 128>}, {transform_indices = @transform_4, window_bounds = array<i64: 1, 1, 128>}]} {
    %c0 = arith.constant 0 : index
    %c0_0 = arith.constant 0 : index
    %0 = vector.load %arg1[%c0, %c0_0] : memref<512x128xbf16, #tpu.memory_space<vmem>>, vector<512x128xbf16>
    %c0_1 = arith.constant 0 : index
    %c0_2 = arith.constant 0 : index
    %1 = vector.load %arg2[%c0_1, %c0_2] : memref<128x128xbf16, #tpu.memory_space<vmem>>, vector<128x128xbf16>
    %cst = arith.constant dense<0.000000e+00> : vector<512x128xf32>
    %2 = tpu.matmul %0, %1, %cst {dimension_numbers = #tpu.dot_dimension_numbers<[1], [0], [0], [1], [0, 0, 1, 1], [], []>} : vector<512x128xbf16>, vector<128x128xbf16>, vector<512x128xf32> -> vector<512x128xf32>
    %3 = arith.truncf %2 : vector<512x128xf32> to vector<512x128xbf16>
    %c0_3 = arith.constant 0 : index
    %c0_4 = arith.constant 0 : index
    %4 = vector.load %arg3[%c0_3, %c0_4] : memref<512x128xbf16, #tpu.memory_space<vmem>>, vector<512x128xbf16>
    tpu.vector_store %arg3[%c0_3, %c0_4], %3 {strides = array<i32>} : memref<512x128xbf16, #tpu.memory_space<vmem>>, vector<512x128xbf16>,
    %cst_5 = arith.constant dense<0.000000e+00> : vector<128xf32>
    %5 = vector.multi_reduction <add>, %2, %cst_5 [0] : vector<512x128xf32> to vector<128xf32>
    %6 = vector.shape_cast %5 : vector<128xf32> to vector<1x128xf32>
    %c0_6 = arith.constant 0 : index
    %c0_7 = arith.constant 0 : index
    %c0_8 = arith.constant 0 : index
    %7 = vector.load %arg4[%c0_6, %c0_7, %c0_8] : memref<1x1x128xf32, #tpu.memory_space<vmem>>, vector<1x1x128xf32>
    %8 = vector.shape_cast %7 : vector<1x1x128xf32> to vector<1x128xf32>
    %9 = vector.shape_cast %6 : vector<1x128xf32> to vector<1x1x128xf32>
    tpu.vector_store %arg4[%c0_6, %c0_7, %c0_8], %9 {strides = array<i32>} : memref<1x1x128xf32, #tpu.memory_space<vmem>>, vector<1x1x128xf32>,
    %10 = arith.mulf %2, %2 : vector<512x128xf32>
    %cst_9 = arith.constant dense<0.000000e+00> : vector<128xf32>
    %11 = vector.multi_reduction <add>, %10, %cst_9 [0] : vector<512x128xf32> to vector<128xf32>
    %12 = vector.shape_cast %11 : vector<128xf32> to vector<1x128xf32>
    %c0_10 = arith.constant 0 : index
    %c0_11 = arith.constant 0 : index
    %c0_12 = arith.constant 0 : index
    %13 = vector.load %arg5[%c0_10, %c0_11, %c0_12] : memref<1x1x128xf32, #tpu.memory_space<vmem>>, vector<1x1x128xf32>
    %14 = vector.shape_cast %13 : vector<1x1x128xf32> to vector<1x128xf32>
    %15 = vector.shape_cast %12 : vector<1x128xf32> to vector<1x1x128xf32>
    tpu.vector_store %arg5[%c0_10, %c0_11, %c0_12], %15 {strides = array<i32>} : memref<1x1x128xf32, #tpu.memory_space<vmem>>, vector<1x1x128xf32>,
    return
  }
  func.func @transform_0(%arg0: i32) -> (i32, i32) {
    %c0_i32 = arith.constant 0 : i32
    %c0_i32_0 = arith.constant 0 : i32
    return %arg0, %c0_i32 : i32, i32
  }
  func.func @transform_1(%arg0: i32) -> (i32, i32) {
    %c0_i32 = arith.constant 0 : i32
    %c0_i32_0 = arith.constant 0 : i32
    %c0_i32_1 = arith.constant 0 : i32
    return %c0_i32, %c0_i32_0 : i32, i32
  }
  func.func @transform_2(%arg0: i32) -> (i32, i32) {
    %c0_i32 = arith.constant 0 : i32
    %c0_i32_0 = arith.constant 0 : i32
    return %arg0, %c0_i32 : i32, i32
  }
  func.func @transform_3(%arg0: i32) -> (i32, i32, i32) {
    %c0_i32 = arith.constant 0 : i32
    %c0_i32_0 = arith.constant 0 : i32
    %c0_i32_1 = arith.constant 0 : i32
    return %arg0, %c0_i32, %c0_i32_0 : i32, i32, i32
  }
  func.func @transform_4(%arg0: i32) -> (i32, i32, i32) {
    %c0_i32 = arith.constant 0 : i32
    %c0_i32_0 = arith.constant 0 : i32
    %c0_i32_1 = arith.constant 0 : i32
    return %arg0, %c0_i32, %c0_i32_0 : i32, i32, i32
  }
}

module attributes {stable_mosaic.version = 11 : i64} {
  func.func @_conv3x3_stats_kernel(%arg0: i32, %arg1: memref<1x18x18x128xbf16, #tpu.memory_space<vmem>>, %arg2: memref<1x128xf32, #tpu.memory_space<vmem>>, %arg3: memref<1x128xf32, #tpu.memory_space<vmem>>, %arg4: memref<3x384x128xbf16, #tpu.memory_space<vmem>>, %arg5: memref<256x128xbf16, #tpu.memory_space<vmem>>, %arg6: memref<1x1x128xf32, #tpu.memory_space<vmem>>, %arg7: memref<1x1x128xf32, #tpu.memory_space<vmem>>) attributes {dimension_semantics = [#tpu.dimension_semantics<parallel>], iteration_bounds = array<i64: 2>, scalar_prefetch = 0 : i64, scratch_operands = 0 : i64, tpu.core_type = #tpu.core_type<tc>, window_params = [{transform_indices = @transform_0, window_bounds = array<i64: 1, 18, 18, 128>}, {pipeline_mode = #tpu.pipeline_mode<synchronous>, transform_indices = @transform_1, window_bounds = array<i64: 1, 128>}, {pipeline_mode = #tpu.pipeline_mode<synchronous>, transform_indices = @transform_2, window_bounds = array<i64: 1, 128>}, {pipeline_mode = #tpu.pipeline_mode<synchronous>, transform_indices = @transform_3, window_bounds = array<i64: 3, 384, 128>}, {transform_indices = @transform_4, window_bounds = array<i64: 256, 128>}, {transform_indices = @transform_5, window_bounds = array<i64: 1, 1, 128>}, {transform_indices = @transform_6, window_bounds = array<i64: 1, 1, 128>}]} {
    %c0 = arith.constant 0 : index
    %c0_0 = arith.constant 0 : index
    %c0_1 = arith.constant 0 : index
    %c0_2 = arith.constant 0 : index
    %0 = vector.load %arg1[%c0, %c0_0, %c0_1, %c0_2] : memref<1x18x18x128xbf16, #tpu.memory_space<vmem>>, vector<1x18x18x128xbf16>
    %1 = vector.shape_cast %0 : vector<1x18x18x128xbf16> to vector<18x18x128xbf16>
    %2 = arith.extf %1 : vector<18x18x128xbf16> to vector<18x18x128xf32>
    %3 = tpu.iota {dimensions = array<i32: 0>} : vector<18x18x128xi32>
    %4 = tpu.iota {dimensions = array<i32: 1>} : vector<18x18x128xi32>
    %c1_i32 = arith.constant 1 : i32
    %5 = vector.broadcast %c1_i32 : i32 to vector<18x18x128xi32>
    %6 = arith.cmpi sge, %3, %5 : vector<18x18x128xi32>
    %c16_i32 = arith.constant 16 : i32
    %7 = vector.broadcast %c16_i32 : i32 to vector<18x18x128xi32>
    %8 = arith.cmpi sle, %3, %7 : vector<18x18x128xi32>
    %9 = arith.andi %6, %8 : vector<18x18x128xi1>
    %c1_i32_3 = arith.constant 1 : i32
    %10 = vector.broadcast %c1_i32_3 : i32 to vector<18x18x128xi32>
    %11 = arith.cmpi sge, %4, %10 : vector<18x18x128xi32>
    %12 = arith.andi %9, %11 : vector<18x18x128xi1>
    %c16_i32_4 = arith.constant 16 : i32
    %13 = vector.broadcast %c16_i32_4 : i32 to vector<18x18x128xi32>
    %14 = arith.cmpi sle, %4, %13 : vector<18x18x128xi32>
    %15 = arith.andi %12, %14 : vector<18x18x128xi1>
    %c0_5 = arith.constant 0 : index
    %c0_6 = arith.constant 0 : index
    %16 = vector.load %arg2[%c0_5, %c0_6] : memref<1x128xf32, #tpu.memory_space<vmem>>, vector<1x128xf32>
    %17 = vector.shape_cast %16 : vector<1x128xf32> to vector<1x1x128xf32>
    %18 = vector.broadcast %17 : vector<1x1x128xf32> to vector<18x18x128xf32>
    %19 = arith.mulf %2, %18 : vector<18x18x128xf32>
    %c0_7 = arith.constant 0 : index
    %c0_8 = arith.constant 0 : index
    %20 = vector.load %arg3[%c0_7, %c0_8] : memref<1x128xf32, #tpu.memory_space<vmem>>, vector<1x128xf32>
    %21 = vector.shape_cast %20 : vector<1x128xf32> to vector<1x1x128xf32>
    %22 = vector.broadcast %21 : vector<1x1x128xf32> to vector<18x18x128xf32>
    %23 = arith.addf %19, %22 : vector<18x18x128xf32>
    %cst = arith.constant 0.000000e+00 : f32
    %24 = vector.broadcast %cst : f32 to vector<18x18x128xf32>
    %25 = arith.maximumf %23, %24 : vector<18x18x128xf32>
    %cst_9 = arith.constant 0.000000e+00 : f32
    %26 = vector.broadcast %cst_9 : f32 to vector<18x18x128xf32>
    %27 = arith.select %15, %25, %26 : vector<18x18x128xi1>, vector<18x18x128xf32>
    %28 = arith.truncf %27 : vector<18x18x128xf32> to vector<18x18x128xbf16>
    %29 = vector.extract_strided_slice %28 {offsets = [0, 0, 0], sizes = [18, 16, 128], strides = [1, 1, 1]} : vector<18x18x128xbf16> to vector<18x16x128xbf16>
    %30 = vector.extract_strided_slice %28 {offsets = [0, 1, 0], sizes = [18, 16, 128], strides = [1, 1, 1]} : vector<18x18x128xbf16> to vector<18x16x128xbf16>
    %31 = vector.extract_strided_slice %28 {offsets = [0, 2, 0], sizes = [18, 16, 128], strides = [1, 1, 1]} : vector<18x18x128xbf16> to vector<18x16x128xbf16>
    %32 = tpu.concatenate %29, %30, %31 in 2 : vector<18x16x128xbf16>, vector<18x16x128xbf16>, vector<18x16x128xbf16> -> vector<18x16x384xbf16>
    %33 = vector.extract_strided_slice %32 {offsets = [0, 0, 0], sizes = [16, 16, 384], strides = [1, 1, 1]} : vector<18x16x384xbf16> to vector<16x16x384xbf16>
    %34 = vector.shape_cast %33 : vector<16x16x384xbf16> to vector<256x384xbf16>
    %c0_10 = arith.constant 0 : index
    %c0_11 = arith.constant 0 : index
    %c0_12 = arith.constant 0 : index
    %35 = vector.load %arg4[%c0_10, %c0_11, %c0_12] : memref<3x384x128xbf16, #tpu.memory_space<vmem>>, vector<1x384x128xbf16>
    %36 = vector.shape_cast %35 : vector<1x384x128xbf16> to vector<384x128xbf16>
    %cst_13 = arith.constant dense<0.000000e+00> : vector<256x128xf32>
    %37 = tpu.matmul %34, %36, %cst_13 {dimension_numbers = #tpu.dot_dimension_numbers<[1], [0], [0], [1], [0, 0, 1, 1], [], []>} : vector<256x384xbf16>, vector<384x128xbf16>, vector<256x128xf32> -> vector<256x128xf32>
    %38 = vector.extract_strided_slice %32 {offsets = [1, 0, 0], sizes = [16, 16, 384], strides = [1, 1, 1]} : vector<18x16x384xbf16> to vector<16x16x384xbf16>
    %39 = vector.shape_cast %38 : vector<16x16x384xbf16> to vector<256x384xbf16>
    %c1 = arith.constant 1 : index
    %c0_14 = arith.constant 0 : index
    %c0_15 = arith.constant 0 : index
    %40 = vector.load %arg4[%c1, %c0_14, %c0_15] : memref<3x384x128xbf16, #tpu.memory_space<vmem>>, vector<1x384x128xbf16>
    %41 = vector.shape_cast %40 : vector<1x384x128xbf16> to vector<384x128xbf16>
    %cst_16 = arith.constant dense<0.000000e+00> : vector<256x128xf32>
    %42 = tpu.matmul %39, %41, %cst_16 {dimension_numbers = #tpu.dot_dimension_numbers<[1], [0], [0], [1], [0, 0, 1, 1], [], []>} : vector<256x384xbf16>, vector<384x128xbf16>, vector<256x128xf32> -> vector<256x128xf32>
    %43 = arith.addf %37, %42 : vector<256x128xf32>
    %44 = vector.extract_strided_slice %32 {offsets = [2, 0, 0], sizes = [16, 16, 384], strides = [1, 1, 1]} : vector<18x16x384xbf16> to vector<16x16x384xbf16>
    %45 = vector.shape_cast %44 : vector<16x16x384xbf16> to vector<256x384xbf16>
    %c2 = arith.constant 2 : index
    %c0_17 = arith.constant 0 : index
    %c0_18 = arith.constant 0 : index
    %46 = vector.load %arg4[%c2, %c0_17, %c0_18] : memref<3x384x128xbf16, #tpu.memory_space<vmem>>, vector<1x384x128xbf16>
    %47 = vector.shape_cast %46 : vector<1x384x128xbf16> to vector<384x128xbf16>
    %cst_19 = arith.constant dense<0.000000e+00> : vector<256x128xf32>
    %48 = tpu.matmul %45, %47, %cst_19 {dimension_numbers = #tpu.dot_dimension_numbers<[1], [0], [0], [1], [0, 0, 1, 1], [], []>} : vector<256x384xbf16>, vector<384x128xbf16>, vector<256x128xf32> -> vector<256x128xf32>
    %49 = arith.addf %43, %48 : vector<256x128xf32>
    %50 = arith.truncf %49 : vector<256x128xf32> to vector<256x128xbf16>
    %c0_20 = arith.constant 0 : index
    %c0_21 = arith.constant 0 : index
    %51 = vector.load %arg5[%c0_20, %c0_21] : memref<256x128xbf16, #tpu.memory_space<vmem>>, vector<256x128xbf16>
    tpu.vector_store %arg5[%c0_20, %c0_21], %50 {strides = array<i32>} : memref<256x128xbf16, #tpu.memory_space<vmem>>, vector<256x128xbf16>,
    %cst_22 = arith.constant dense<0.000000e+00> : vector<128xf32>
    %52 = vector.multi_reduction <add>, %49, %cst_22 [0] : vector<256x128xf32> to vector<128xf32>
    %53 = vector.shape_cast %52 : vector<128xf32> to vector<1x128xf32>
    %c0_23 = arith.constant 0 : index
    %c0_24 = arith.constant 0 : index
    %c0_25 = arith.constant 0 : index
    %54 = vector.load %arg6[%c0_23, %c0_24, %c0_25] : memref<1x1x128xf32, #tpu.memory_space<vmem>>, vector<1x1x128xf32>
    %55 = vector.shape_cast %54 : vector<1x1x128xf32> to vector<1x128xf32>
    %56 = vector.shape_cast %53 : vector<1x128xf32> to vector<1x1x128xf32>
    tpu.vector_store %arg6[%c0_23, %c0_24, %c0_25], %56 {strides = array<i32>} : memref<1x1x128xf32, #tpu.memory_space<vmem>>, vector<1x1x128xf32>,
    %57 = arith.mulf %49, %49 : vector<256x128xf32>
    %cst_26 = arith.constant dense<0.000000e+00> : vector<128xf32>
    %58 = vector.multi_reduction <add>, %57, %cst_26 [0] : vector<256x128xf32> to vector<128xf32>
    %59 = vector.shape_cast %58 : vector<128xf32> to vector<1x128xf32>
    %c0_27 = arith.constant 0 : index
    %c0_28 = arith.constant 0 : index
    %c0_29 = arith.constant 0 : index
    %60 = vector.load %arg7[%c0_27, %c0_28, %c0_29] : memref<1x1x128xf32, #tpu.memory_space<vmem>>, vector<1x1x128xf32>
    %61 = vector.shape_cast %60 : vector<1x1x128xf32> to vector<1x128xf32>
    %62 = vector.shape_cast %59 : vector<1x128xf32> to vector<1x1x128xf32>
    tpu.vector_store %arg7[%c0_27, %c0_28, %c0_29], %62 {strides = array<i32>} : memref<1x1x128xf32, #tpu.memory_space<vmem>>, vector<1x1x128xf32>,
    return
  }
  func.func @transform_0(%arg0: i32) -> (i32, i32, i32, i32) {
    %c0_i32 = arith.constant 0 : i32
    %c0_i32_0 = arith.constant 0 : i32
    %c0_i32_1 = arith.constant 0 : i32
    %c0_i32_2 = arith.constant 0 : i32
    return %arg0, %c0_i32, %c0_i32_0, %c0_i32_1 : i32, i32, i32, i32
  }
  func.func @transform_1(%arg0: i32) -> (i32, i32) {
    %c0_i32 = arith.constant 0 : i32
    %c0_i32_0 = arith.constant 0 : i32
    %c0_i32_1 = arith.constant 0 : i32
    return %c0_i32, %c0_i32_0 : i32, i32
  }
  func.func @transform_2(%arg0: i32) -> (i32, i32) {
    %c0_i32 = arith.constant 0 : i32
    %c0_i32_0 = arith.constant 0 : i32
    %c0_i32_1 = arith.constant 0 : i32
    return %c0_i32, %c0_i32_0 : i32, i32
  }
  func.func @transform_3(%arg0: i32) -> (i32, i32, i32) {
    %c0_i32 = arith.constant 0 : i32
    %c0_i32_0 = arith.constant 0 : i32
    %c0_i32_1 = arith.constant 0 : i32
    %c0_i32_2 = arith.constant 0 : i32
    return %c0_i32, %c0_i32_0, %c0_i32_1 : i32, i32, i32
  }
  func.func @transform_4(%arg0: i32) -> (i32, i32) {
    %c0_i32 = arith.constant 0 : i32
    %c0_i32_0 = arith.constant 0 : i32
    return %arg0, %c0_i32 : i32, i32
  }
  func.func @transform_5(%arg0: i32) -> (i32, i32, i32) {
    %c0_i32 = arith.constant 0 : i32
    %c0_i32_0 = arith.constant 0 : i32
    %c0_i32_1 = arith.constant 0 : i32
    return %arg0, %c0_i32, %c0_i32_0 : i32, i32, i32
  }
  func.func @transform_6(%arg0: i32) -> (i32, i32, i32) {
    %c0_i32 = arith.constant 0 : i32
    %c0_i32_0 = arith.constant 0 : i32
    %c0_i32_1 = arith.constant 0 : i32
    return %arg0, %c0_i32, %c0_i32_0 : i32, i32, i32
  }
}

module attributes {stable_mosaic.version = 11 : i64} {
  func.func @_mm_stats_kernel(%arg0: i32, %arg1: memref<512x128xbf16, #tpu.memory_space<vmem>>, %arg2: memref<1x128xf32, #tpu.memory_space<vmem>>, %arg3: memref<1x128xf32, #tpu.memory_space<vmem>>, %arg4: memref<128x128xbf16, #tpu.memory_space<vmem>>, %arg5: memref<512x128xbf16, #tpu.memory_space<vmem>>, %arg6: memref<1x1x128xf32, #tpu.memory_space<vmem>>, %arg7: memref<1x1x128xf32, #tpu.memory_space<vmem>>) attributes {dimension_semantics = [#tpu.dimension_semantics<parallel>], iteration_bounds = array<i64: 1>, scalar_prefetch = 0 : i64, scratch_operands = 0 : i64, tpu.core_type = #tpu.core_type<tc>, window_params = [{transform_indices = @transform_0, window_bounds = array<i64: 512, 128>}, {pipeline_mode = #tpu.pipeline_mode<synchronous>, transform_indices = @transform_1, window_bounds = array<i64: 1, 128>}, {pipeline_mode = #tpu.pipeline_mode<synchronous>, transform_indices = @transform_2, window_bounds = array<i64: 1, 128>}, {pipeline_mode = #tpu.pipeline_mode<synchronous>, transform_indices = @transform_3, window_bounds = array<i64: 128, 128>}, {transform_indices = @transform_4, window_bounds = array<i64: 512, 128>}, {transform_indices = @transform_5, window_bounds = array<i64: 1, 1, 128>}, {transform_indices = @transform_6, window_bounds = array<i64: 1, 1, 128>}]} {
    %c0 = arith.constant 0 : index
    %c0_0 = arith.constant 0 : index
    %0 = vector.load %arg1[%c0, %c0_0] : memref<512x128xbf16, #tpu.memory_space<vmem>>, vector<512x128xbf16>
    %1 = arith.extf %0 : vector<512x128xbf16> to vector<512x128xf32>
    %c0_1 = arith.constant 0 : index
    %c0_2 = arith.constant 0 : index
    %2 = vector.load %arg2[%c0_1, %c0_2] : memref<1x128xf32, #tpu.memory_space<vmem>>, vector<1x128xf32>
    %3 = vector.broadcast %2 : vector<1x128xf32> to vector<512x128xf32>
    %4 = arith.mulf %1, %3 : vector<512x128xf32>
    %c0_3 = arith.constant 0 : index
    %c0_4 = arith.constant 0 : index
    %5 = vector.load %arg3[%c0_3, %c0_4] : memref<1x128xf32, #tpu.memory_space<vmem>>, vector<1x128xf32>
    %6 = vector.broadcast %5 : vector<1x128xf32> to vector<512x128xf32>
    %7 = arith.addf %4, %6 : vector<512x128xf32>
    %cst = arith.constant 0.000000e+00 : f32
    %8 = vector.broadcast %cst : f32 to vector<512x128xf32>
    %9 = arith.maximumf %7, %8 : vector<512x128xf32>
    %10 = arith.truncf %9 : vector<512x128xf32> to vector<512x128xbf16>
    %c0_5 = arith.constant 0 : index
    %c0_6 = arith.constant 0 : index
    %11 = vector.load %arg4[%c0_5, %c0_6] : memref<128x128xbf16, #tpu.memory_space<vmem>>, vector<128x128xbf16>
    %cst_7 = arith.constant dense<0.000000e+00> : vector<512x128xf32>
    %12 = tpu.matmul %10, %11, %cst_7 {dimension_numbers = #tpu.dot_dimension_numbers<[1], [0], [0], [1], [0, 0, 1, 1], [], []>} : vector<512x128xbf16>, vector<128x128xbf16>, vector<512x128xf32> -> vector<512x128xf32>
    %13 = arith.truncf %12 : vector<512x128xf32> to vector<512x128xbf16>
    %c0_8 = arith.constant 0 : index
    %c0_9 = arith.constant 0 : index
    %14 = vector.load %arg5[%c0_8, %c0_9] : memref<512x128xbf16, #tpu.memory_space<vmem>>, vector<512x128xbf16>
    tpu.vector_store %arg5[%c0_8, %c0_9], %13 {strides = array<i32>} : memref<512x128xbf16, #tpu.memory_space<vmem>>, vector<512x128xbf16>,
    %cst_10 = arith.constant dense<0.000000e+00> : vector<128xf32>
    %15 = vector.multi_reduction <add>, %12, %cst_10 [0] : vector<512x128xf32> to vector<128xf32>
    %16 = vector.shape_cast %15 : vector<128xf32> to vector<1x128xf32>
    %c0_11 = arith.constant 0 : index
    %c0_12 = arith.constant 0 : index
    %c0_13 = arith.constant 0 : index
    %17 = vector.load %arg6[%c0_11, %c0_12, %c0_13] : memref<1x1x128xf32, #tpu.memory_space<vmem>>, vector<1x1x128xf32>
    %18 = vector.shape_cast %17 : vector<1x1x128xf32> to vector<1x128xf32>
    %19 = vector.shape_cast %16 : vector<1x128xf32> to vector<1x1x128xf32>
    tpu.vector_store %arg6[%c0_11, %c0_12, %c0_13], %19 {strides = array<i32>} : memref<1x1x128xf32, #tpu.memory_space<vmem>>, vector<1x1x128xf32>,
    %20 = arith.mulf %12, %12 : vector<512x128xf32>
    %cst_14 = arith.constant dense<0.000000e+00> : vector<128xf32>
    %21 = vector.multi_reduction <add>, %20, %cst_14 [0] : vector<512x128xf32> to vector<128xf32>
    %22 = vector.shape_cast %21 : vector<128xf32> to vector<1x128xf32>
    %c0_15 = arith.constant 0 : index
    %c0_16 = arith.constant 0 : index
    %c0_17 = arith.constant 0 : index
    %23 = vector.load %arg7[%c0_15, %c0_16, %c0_17] : memref<1x1x128xf32, #tpu.memory_space<vmem>>, vector<1x1x128xf32>
    %24 = vector.shape_cast %23 : vector<1x1x128xf32> to vector<1x128xf32>
    %25 = vector.shape_cast %22 : vector<1x128xf32> to vector<1x1x128xf32>
    tpu.vector_store %arg7[%c0_15, %c0_16, %c0_17], %25 {strides = array<i32>} : memref<1x1x128xf32, #tpu.memory_space<vmem>>, vector<1x1x128xf32>,
    return
  }
  func.func @transform_0(%arg0: i32) -> (i32, i32) {
    %c0_i32 = arith.constant 0 : i32
    %c0_i32_0 = arith.constant 0 : i32
    return %arg0, %c0_i32 : i32, i32
  }
  func.func @transform_1(%arg0: i32) -> (i32, i32) {
    %c0_i32 = arith.constant 0 : i32
    %c0_i32_0 = arith.constant 0 : i32
    %c0_i32_1 = arith.constant 0 : i32
    return %c0_i32, %c0_i32_0 : i32, i32
  }
  func.func @transform_2(%arg0: i32) -> (i32, i32) {
    %c0_i32 = arith.constant 0 : i32
    %c0_i32_0 = arith.constant 0 : i32
    %c0_i32_1 = arith.constant 0 : i32
    return %c0_i32, %c0_i32_0 : i32, i32
  }
  func.func @transform_3(%arg0: i32) -> (i32, i32) {
    %c0_i32 = arith.constant 0 : i32
    %c0_i32_0 = arith.constant 0 : i32
    %c0_i32_1 = arith.constant 0 : i32
    return %c0_i32, %c0_i32_0 : i32, i32
  }
  func.func @transform_4(%arg0: i32) -> (i32, i32) {
    %c0_i32 = arith.constant 0 : i32
    %c0_i32_0 = arith.constant 0 : i32
    return %arg0, %c0_i32 : i32, i32
  }
  func.func @transform_5(%arg0: i32) -> (i32, i32, i32) {
    %c0_i32 = arith.constant 0 : i32
    %c0_i32_0 = arith.constant 0 : i32
    %c0_i32_1 = arith.constant 0 : i32
    return %arg0, %c0_i32, %c0_i32_0 : i32, i32, i32
  }
  func.func @transform_6(%arg0: i32) -> (i32, i32, i32) {
    %c0_i32 = arith.constant 0 : i32
    %c0_i32_0 = arith.constant 0 : i32
    %c0_i32_1 = arith.constant 0 : i32
    return %arg0, %c0_i32, %c0_i32_0 : i32, i32, i32
  }
}

module attributes {stable_mosaic.version = 11 : i64} {
  func.func @_norm_res_relu_kernel(%arg0: i32, %arg1: memref<512x128xbf16, #tpu.memory_space<vmem>>, %arg2: memref<512x128xf32, #tpu.memory_space<vmem>>, %arg3: memref<1x128xf32, #tpu.memory_space<vmem>>, %arg4: memref<1x128xf32, #tpu.memory_space<vmem>>, %arg5: memref<512x128xf32, #tpu.memory_space<vmem>>) attributes {dimension_semantics = [#tpu.dimension_semantics<parallel>], iteration_bounds = array<i64: 1>, scalar_prefetch = 0 : i64, scratch_operands = 0 : i64, tpu.core_type = #tpu.core_type<tc>, window_params = [{transform_indices = @transform_0, window_bounds = array<i64: 512, 128>}, {transform_indices = @transform_1, window_bounds = array<i64: 512, 128>}, {pipeline_mode = #tpu.pipeline_mode<synchronous>, transform_indices = @transform_2, window_bounds = array<i64: 1, 128>}, {pipeline_mode = #tpu.pipeline_mode<synchronous>, transform_indices = @transform_3, window_bounds = array<i64: 1, 128>}, {transform_indices = @transform_4, window_bounds = array<i64: 512, 128>}]} {
    %c0 = arith.constant 0 : index
    %c0_0 = arith.constant 0 : index
    %0 = vector.load %arg1[%c0, %c0_0] : memref<512x128xbf16, #tpu.memory_space<vmem>>, vector<512x128xbf16>
    %1 = arith.extf %0 : vector<512x128xbf16> to vector<512x128xf32>
    %c0_1 = arith.constant 0 : index
    %c0_2 = arith.constant 0 : index
    %2 = vector.load %arg3[%c0_1, %c0_2] : memref<1x128xf32, #tpu.memory_space<vmem>>, vector<1x128xf32>
    %3 = vector.broadcast %2 : vector<1x128xf32> to vector<512x128xf32>
    %4 = arith.mulf %1, %3 : vector<512x128xf32>
    %c0_3 = arith.constant 0 : index
    %c0_4 = arith.constant 0 : index
    %5 = vector.load %arg4[%c0_3, %c0_4] : memref<1x128xf32, #tpu.memory_space<vmem>>, vector<1x128xf32>
    %6 = vector.broadcast %5 : vector<1x128xf32> to vector<512x128xf32>
    %7 = arith.addf %4, %6 : vector<512x128xf32>
    %c0_5 = arith.constant 0 : index
    %c0_6 = arith.constant 0 : index
    %8 = vector.load %arg2[%c0_5, %c0_6] : memref<512x128xf32, #tpu.memory_space<vmem>>, vector<512x128xf32>
    %9 = arith.addf %7, %8 : vector<512x128xf32>
    %cst = arith.constant 0.000000e+00 : f32
    %10 = vector.broadcast %cst : f32 to vector<512x128xf32>
    %11 = arith.maximumf %9, %10 : vector<512x128xf32>
    %c0_7 = arith.constant 0 : index
    %c0_8 = arith.constant 0 : index
    %12 = vector.load %arg5[%c0_7, %c0_8] : memref<512x128xf32, #tpu.memory_space<vmem>>, vector<512x128xf32>
    tpu.vector_store %arg5[%c0_7, %c0_8], %11 {strides = array<i32>} : memref<512x128xf32, #tpu.memory_space<vmem>>, vector<512x128xf32>,
    return
  }
  func.func @transform_0(%arg0: i32) -> (i32, i32) {
    %c0_i32 = arith.constant 0 : i32
    %c0_i32_0 = arith.constant 0 : i32
    return %arg0, %c0_i32 : i32, i32
  }
  func.func @transform_1(%arg0: i32) -> (i32, i32) {
    %c0_i32 = arith.constant 0 : i32
    %c0_i32_0 = arith.constant 0 : i32
    return %arg0, %c0_i32 : i32, i32
  }
  func.func @transform_2(%arg0: i32) -> (i32, i32) {
    %c0_i32 = arith.constant 0 : i32
    %c0_i32_0 = arith.constant 0 : i32
    %c0_i32_1 = arith.constant 0 : i32
    return %c0_i32, %c0_i32_0 : i32, i32
  }
  func.func @transform_3(%arg0: i32) -> (i32, i32) {
    %c0_i32 = arith.constant 0 : i32
    %c0_i32_0 = arith.constant 0 : i32
    %c0_i32_1 = arith.constant 0 : i32
    return %c0_i32, %c0_i32_0 : i32, i32
  }
  func.func @transform_4(%arg0: i32) -> (i32, i32) {
    %c0_i32 = arith.constant 0 : i32
    %c0_i32_0 = arith.constant 0 : i32
    return %arg0, %c0_i32 : i32, i32
  }
}

</mosaic_0001>

<bundles_post_ra>
// kernel: identity_block_forward.4
= control target key start
LH: loop header
LB: loop body
LE: loop exit
PB: predicated region body
PF: predicated region fallthrough
CT: control target
= control target key end

     0   :  { %s1797_s1 = inlined_call_operand.vmem [shape: bf16[128,128], index: 1, kind: input, shape index: {}]   ;;  %s1798_s0 = inlined_call_operand.vmem [shape: bf16[512,128], index: 0, kind: input, shape index: {}]   ;;  %s1799_s2 = inlined_call_operand.vmem [shape: bf16[512,128], index: 2, kind: output, shape index: {0}]   ;;  %s1800_s3 = inlined_call_operand.vmem [shape: f32[1,1,128], index: 3, kind: output, shape index: {1}]   ;;  %s1801_s4 = inlined_call_operand.vmem [shape: f32[1,1,128], index: 4, kind: output, shape index: {2}]  }
   0x1   :  { %v1046_v0 = vld [vmem:[%s1797_s1 + $0x38] sm:$0xff]  ;;  %v1045_v1 = vld [vmem:[%s1797_s1 + $0x30] sm:$0xff]  ;;  %v1044_v2 = vld [vmem:[%s1797_s1 + $0x28] sm:$0xff] }
   0x2   :  { %334 = vmatpush.bf16.msra.mxu0 %v1046_v0  ;;  %1238 = vmatpush.bf16.msra.mxu1 %v1046_v0  ;;  %v1043_v3 = vld [vmem:[%s1797_s1 + $0x20] sm:$0xff]  ;;  %v1042_v4 = vld [vmem:[%s1797_s1 + $0x18] sm:$0xff]  ;;  %v1041_v5 = vld [vmem:[%s1797_s1 + $0x10] sm:$0xff] }
   0x3   :  { %1239 = vmatpush.bf16.msra.mxu2 %v1046_v0  ;;  %1240 = vmatpush.bf16.msra.mxu3 %v1046_v0  ;;  %v1040_v6 = vld [vmem:[%s1797_s1 + $0x8] sm:$0xff]  ;;  %v1039_v7 = vld [vmem:[%s1797_s1] sm:$0xff]  ;;  %v1009_v13 = vld [vmem:[%s1798_s0 + $0x10] sm:$0xff] }
   0x4   :  { %v1007_v8 = vld [vmem:[%s1798_s0] sm:$0xff]  ;;  %v1008_v10 = vld [vmem:[%s1798_s0 + $0x8] sm:$0xff]  ;;  %v1017_v14 = vld [vmem:[%s1798_s0 + $0x50] sm:$0xff] }
   0x5   :  { %v1015_v9 = vld [vmem:[%s1798_s0 + $0x40] sm:$0xff]  ;;  %v1016_v11 = vld [vmem:[%s1798_s0 + $0x48] sm:$0xff]  ;;  %v1010_v16 = vld [vmem:[%s1798_s0 + $0x18] sm:$0xff] }
   0x6   :  { %335 = vmatpush.bf16.msra.mxu0 %v1045_v1  ;;  %1241 = vmatpush.bf16.msra.mxu1 %v1045_v1  ;;  %v1023_v12 = vld [vmem:[%s1798_s0 + $0x80] sm:$0xff]  ;;  %v1024_v15 = vld [vmem:[%s1798_s0 + $0x88] sm:$0xff]  ;;  %v1018_v17 = vld [vmem:[%s1798_s0 + $0x58] sm:$0xff] }
   0x7   :  { %1242 = vmatpush.bf16.msra.mxu2 %v1045_v1  ;;  %1243 = vmatpush.bf16.msra.mxu3 %v1045_v1  ;;  %v1025_v18 = vld [vmem:[%s1798_s0 + $0x90] sm:$0xff]  ;;  %v1031_v19 = vld [vmem:[%s1798_s0 + $0xc0] sm:$0xff]  ;;  %v1026_v22 = vld [vmem:[%s1798_s0 + $0x98] sm:$0xff] }
   0x8   :  { %v1011_v20 = vld [vmem:[%s1798_s0 + $0x20] sm:$0xff]  ;;  %v1032_v23 = vld [vmem:[%s1798_s0 + $0xc8] sm:$0xff]  ;;  %v1033_v27 = vld [vmem:[%s1798_s0 + $0xd0] sm:$0xff] }
   0x9   :  { %v1019_v21 = vld [vmem:[%s1798_s0 + $0x60] sm:$0xff]  ;;  %v1012_v24 = vld [vmem:[%s1798_s0 + $0x28] sm:$0xff]  ;;  %v1013_v28 = vld [vmem:[%s1798_s0 + $0x30] sm:$0xff] }
   0xa   :  { %336 = vmatpush.bf16.msra.mxu0 %v1044_v2  ;;  %1244 = vmatpush.bf16.msra.mxu1 %v1044_v2  ;;  %v1020_v25 = vld [vmem:[%s1798_s0 + $0x68] sm:$0xff]  ;;  %v1027_v26 = vld [vmem:[%s1798_s0 + $0xa0] sm:$0xff]  ;;  %v1021_v29 = vld [vmem:[%s1798_s0 + $0x70] sm:$0xff] }
   0xb   :  { %1245 = vmatpush.bf16.msra.mxu2 %v1044_v2  ;;  %1246 = vmatpush.bf16.msra.mxu3 %v1044_v2  ;;  %v1028_v30 = vld [vmem:[%s1798_s0 + $0xa8] sm:$0xff]  ;;  %v1034_v31 = vld [vmem:[%s1798_s0 + $0xd8] sm:$0xff]  ;;  %v1029_v34 = vld [vmem:[%s1798_s0 + $0xb0] sm:$0xff] }
   0xc   :  { %v1014_v32 = vld [vmem:[%s1798_s0 + $0x38] sm:$0xff]  ;;  %v1035_v35 = vld [vmem:[%s1798_s0 + $0xe0] sm:$0xff]  ;;  %v1036_v39 = vld [vmem:[%s1798_s0 + $0xe8] sm:$0xff] }
   0xd   :  { %v1022_v33 = vld [vmem:[%s1798_s0 + $0x78] sm:$0xff]  ;;  %v1037_v53 = vld [vmem:[%s1798_s0 + $0xf0] sm:$0xff] }
   0xe   :  { %337 = vmatpush.bf16.msra.mxu0 %v1043_v3  ;;  %1247 = vmatpush.bf16.msra.mxu1 %v1043_v3  ;;  %v1030_v38 = vld [vmem:[%s1798_s0 + $0xb8] sm:$0xff] }
   0xf   :  { %1248 = vmatpush.bf16.msra.mxu2 %v1043_v3  ;;  %1249 = vmatpush.bf16.msra.mxu3 %v1043_v3 }
  0x12   :  { %338 = vmatpush.bf16.msra.mxu0 %v1042_v4  ;;  %1250 = vmatpush.bf16.msra.mxu1 %v1042_v4 }
  0x13   :  { %1251 = vmatpush.bf16.msra.mxu2 %v1042_v4  ;;  %1252 = vmatpush.bf16.msra.mxu3 %v1042_v4 }
  0x16   :  { %339 = vmatpush.bf16.msra.mxu0 %v1041_v5  ;;  %1253 = vmatpush.bf16.msra.mxu1 %v1041_v5 }
  0x17   :  { %1254 = vmatpush.bf16.msra.mxu2 %v1041_v5  ;;  %1255 = vmatpush.bf16.msra.mxu3 %v1041_v5  ;;  %v1038_v5 = vld [vmem:[%s1798_s0 + $0xf8] sm:$0xff] }
  0x1a   :  { %340 = vmatpush.bf16.msra.mxu0 %v1040_v6  ;;  %1256 = vmatpush.bf16.msra.mxu1 %v1040_v6 }
  0x1b   :  { %1257 = vmatpush.bf16.msra.mxu2 %v1040_v6  ;;  %1258 = vmatpush.bf16.msra.mxu3 %v1040_v6 }
  0x1e   :  { %341 = vmatpush.bf16.msra.mxu0 %v1039_v7  ;;  %1259 = vmatpush.bf16.msra.mxu1 %v1039_v7 }
  0x1f   :  { %1260 = vmatpush.bf16.msra.mxu2 %v1039_v7  ;;  %1261 = vmatpush.bf16.msra.mxu3 %v1039_v7 }
  0x21   :  { %342 = vmatmul.bf16.vlgmr.msra.gmra.mxu0 %v1007_v8  ;;  %382 = vmatmul.bf16.vlgmr.msra.gmra.mxu1 %v1015_v9 }
  0x22   :  { %422 = vmatmul.bf16.vlgmr.msra.gmra.mxu2 %v1023_v12  ;;  %462 = vmatmul.bf16.vlgmr.msra.gmra.mxu3 %v1031_v19 }
  0x31   :  { %347 = vmatmul.bf16.gmra.mxu0 %v1008_v10  ;;  %387 = vmatmul.bf16.gmra.mxu1 %v1016_v11 }
  0x32   :  { %427 = vmatmul.bf16.gmra.mxu2 %v1024_v15  ;;  %467 = vmatmul.bf16.gmra.mxu3 %v1032_v23 }
  0x41   :  { %352 = vmatmul.bf16.gmra.mxu0 %v1009_v13  ;;  %392 = vmatmul.bf16.gmra.mxu1 %v1017_v14 }
  0x42   :  { %432 = vmatmul.bf16.gmra.mxu2 %v1025_v18  ;;  %472 = vmatmul.bf16.gmra.mxu3 %v1033_v27 }
  0x51   :  { %357 = vmatmul.bf16.gmra.mxu0 %v1010_v16  ;;  %397 = vmatmul.bf16.gmra.mxu1 %v1018_v17 }
  0x52   :  { %437 = vmatmul.bf16.gmra.mxu2 %v1026_v22  ;;  %477 = vmatmul.bf16.gmra.mxu3 %v1034_v31 }
  0x61   :  { %362 = vmatmul.bf16.gmra.mxu0 %v1011_v20  ;;  %402 = vmatmul.bf16.gmra.mxu1 %v1019_v21 }
  0x62   :  { %442 = vmatmul.bf16.gmra.mxu2 %v1027_v26  ;;  %482 = vmatmul.bf16.gmra.mxu3 %v1035_v35 }
  0x71   :  { %367 = vmatmul.bf16.gmra.mxu0 %v1012_v24  ;;  %407 = vmatmul.bf16.gmra.mxu1 %v1020_v25 }
  0x72   :  { %447 = vmatmul.bf16.gmra.mxu2 %v1028_v30  ;;  %487 = vmatmul.bf16.gmra.mxu3 %v1036_v39 }
  0x81   :  { %372 = vmatmul.bf16.gmra.mxu0 %v1013_v28  ;;  %412 = vmatmul.bf16.gmra.mxu1 %v1021_v29 }
  0x82   :  { %452 = vmatmul.bf16.gmra.mxu2 %v1029_v34  ;;  %492 = vmatmul.bf16.gmra.mxu3 %v1037_v53 }
  0x91   :  { %377 = vmatmul.bf16.gmra.mxu0 %v1014_v32  ;;  %417 = vmatmul.bf16.gmra.mxu1 %v1022_v33 }
  0x92   :  { %457 = vmatmul.bf16.gmra.mxu2 %v1030_v38  ;;  %497 = vmatmul.bf16.gmra.mxu3 %v1038_v5 }
  0x9e   :  { %v343_v36 = vpop.f32.mrf.mxu0  ;;  %v1395_v37 = vpop.f32.mrf.mxu1 }
  0x9f   :  { %v701_v40 = vmul.f32 %v343_v36, %v343_v36 }
  0xa5   :  { %v1422_v60 = vpop.f32.mrf.mxu2  ;;  %v1473_v20 = vpop.f32.mrf.mxu3 }
  0xa6   :  { %v345_v41 = vpop.f32.mrf.mxu0  ;;  %v1403_v42 = vpop.f32.mrf.mxu1 }
  0xa7   :  { %v1050_v43 = vpack.c.bf16 %v345_v41, %v343_v36  ;;  %v631_v44 = vadd.f32 %v345_v41, %v343_v36  ;;  %v702_v45 = vmul.f32 %v345_v41, %v345_v41  ;;  %v1090_v46 = vpack.c.bf16 %v1403_v42, %v1395_v37 }
  0xa9   :  { %1051 = vst [vmem:[%s1799_s2] sm:$0xff] %v1050_v43   ;;  %v765_v47 = vadd.f32 %v702_v45, %v701_v40 }
  0xaa   :  { %1214 = vst [vmem:[%s1799_s2 + $0x40] sm:$0xff] %v1090_v46  }
  0xad   :  { %v1434_v2 = vpop.f32.mrf.mxu2  ;;  %v1485_v24 = vpop.f32.mrf.mxu3 }
  0xae   :  { %v348_v48 = vpop.f32.mrf.mxu0  ;;  %v1413_v49 = vpop.f32.mrf.mxu1  ;;  %v1130_v3 = vpack.c.bf16 %v1434_v2, %v1422_v60  ;;  %v1170_v26 = vpack.c.bf16 %v1485_v24, %v1473_v20 }
  0xaf   :  { %v632_v50 = vadd.f32 %v631_v44, %v348_v48  ;;  %v703_v51 = vmul.f32 %v348_v48, %v348_v48 }
  0xb0   :  { %1222 = vst [vmem:[%s1799_s2 + $0x80] sm:$0xff] %v1130_v3  }
  0xb1   :  { %v766_v52 = vadd.f32 %v765_v47, %v703_v51  ;;  %1230 = vst [vmem:[%s1799_s2 + $0xc0] sm:$0xff] %v1170_v26  }
  0xb5   :  { %v1450_v10 = vpop.f32.mrf.mxu2  ;;  %v1503_v32 = vpop.f32.mrf.mxu3 }
  0xb6   :  { %v350_v54 = vpop.f32.mrf.mxu0  ;;  %v1418_v55 = vpop.f32.mrf.mxu1 }
  0xb7   :  { %v1055_v56 = vpack.c.bf16 %v350_v54, %v348_v48  ;;  %v633_v57 = vadd.f32 %v632_v50, %v350_v54  ;;  %v704_v58 = vmul.f32 %v350_v54, %v350_v54  ;;  %v1095_v59 = vpack.c.bf16 %v1418_v55, %v1413_v49 }
  0xb9   :  { %1207 = vst [vmem:[%s1799_s2 + $0x8] sm:$0xff] %v1055_v56   ;;  %v767_v61 = vadd.f32 %v766_v52, %v704_v58 }
  0xba   :  { %1215 = vst [vmem:[%s1799_s2 + $0x48] sm:$0xff] %v1095_v59  }
  0xbd   :  { %v1460_v13 = vpop.f32.mrf.mxu2  ;;  %v1515_v36 = vpop.f32.mrf.mxu3 }
  0xbe   :  { %v353_v62 = vpop.f32.mrf.mxu0  ;;  %v1430_v63 = vpop.f32.mrf.mxu1  ;;  %v1135_v14 = vpack.c.bf16 %v1460_v13, %v1450_v10  ;;  %v1175_v39 = vpack.c.bf16 %v1515_v36, %v1503_v32 }
  0xbf   :  { %v1432_v0 = vadd.f32 %v633_v57, %v353_v62  ;;  %v705_v1 = vmul.f32 %v353_v62, %v353_v62 }
  0xc0   :  { %1223 = vst [vmem:[%s1799_s2 + $0x88] sm:$0xff] %v1135_v14  }
  0xc1   :  { %v1438_v4 = vadd.f32 %v767_v61, %v705_v1  ;;  %1231 = vst [vmem:[%s1799_s2 + $0xc8] sm:$0xff] %v1175_v39  }
  0xc5   :  { %v1471_v19 = vpop.f32.mrf.mxu2  ;;  %v1533_v46 = vpop.f32.mrf.mxu3 }
  0xc6   :  { %v355_v6 = vpop.f32.mrf.mxu0  ;;  %v1446_v7 = vpop.f32.mrf.mxu1 }
  0xc7   :  { %v1060_v8 = vpack.c.bf16 %v355_v6, %v353_v62  ;;  %v1100_v9 = vpack.c.bf16 %v1446_v7, %v1430_v63  ;;  %v706_v52 = vmul.f32 %v355_v6, %v355_v6  ;;  %v635_v57 = vadd.f32 %v1432_v0, %v355_v6 }
  0xc9   :  { %1208 = vst [vmem:[%s1799_s2 + $0x10] sm:$0xff] %v1060_v8   ;;  %v769_v58 = vadd.f32 %v1438_v4, %v706_v52 }
  0xca   :  { %1216 = vst [vmem:[%s1799_s2 + $0x50] sm:$0xff] %v1100_v9  }
  0xcd   :  { %v1483_v23 = vpop.f32.mrf.mxu2  ;;  %v1545_v51 = vpop.f32.mrf.mxu3 }
  0xce   :  { %v358_v11 = vpop.f32.mrf.mxu0  ;;  %v1458_v12 = vpop.f32.mrf.mxu1  ;;  %v1140_v25 = vpack.c.bf16 %v1483_v23, %v1471_v19  ;;  %v1180_v54 = vpack.c.bf16 %v1545_v51, %v1533_v46 }
  0xcf   :  { %v707_v56 = vmul.f32 %v358_v11, %v358_v11  ;;  %v636_v61 = vadd.f32 %v635_v57, %v358_v11 }
  0xd0   :  { %1224 = vst [vmem:[%s1799_s2 + $0x90] sm:$0xff] %v1140_v25  }
  0xd1   :  { %1232 = vst [vmem:[%s1799_s2 + $0xd0] sm:$0xff] %v1180_v54   ;;  %v770_v62 = vadd.f32 %v769_v58, %v707_v56 }
  0xd5   :  { %v1501_v31 = vpop.f32.mrf.mxu2  ;;  %v1565_v0 = vpop.f32.mrf.mxu3 }
  0xd6   :  { %v360_v15 = vpop.f32.mrf.mxu0  ;;  %v1467_v16 = vpop.f32.mrf.mxu1 }
  0xd7   :  { %v1065_v17 = vpack.c.bf16 %v360_v15, %v358_v11  ;;  %v1105_v18 = vpack.c.bf16 %v1467_v16, %v1458_v12  ;;  %v708_v59 = vmul.f32 %v360_v15, %v360_v15  ;;  %v637_v8 = vadd.f32 %v636_v61, %v360_v15 }
  0xd9   :  { %1209 = vst [vmem:[%s1799_s2 + $0x18] sm:$0xff] %v1065_v17   ;;  %v771_v6 = vadd.f32 %v770_v62, %v708_v59 }
  0xda   :  { %1217 = vst [vmem:[%s1799_s2 + $0x58] sm:$0xff] %v1105_v18  }
  0xdd   :  { %v1513_v35 = vpop.f32.mrf.mxu2 }
  0xde   :  { %v363_v21 = vpop.f32.mrf.mxu0  ;;  %v1481_v22 = vpop.f32.mrf.mxu1  ;;  %v1145_v38 = vpack.c.bf16 %v1513_v35, %v1501_v31 }
  0xdf   :  { %v709_v1 = vmul.f32 %v363_v21, %v363_v21  ;;  %v638_v25 = vadd.f32 %v637_v8, %v363_v21 }
  0xe0   :  { %1225 = vst [vmem:[%s1799_s2 + $0x98] sm:$0xff] %v1145_v38  }
  0xe1   :  { %v772_v4 = vadd.f32 %v771_v6, %v709_v1 }
  0xe5   :  { %v1531_v45 = vpop.f32.mrf.mxu2 }
  0xe6   :  { %v365_v27 = vpop.f32.mrf.mxu0  ;;  %v1497_v28 = vpop.f32.mrf.mxu1 }
  0xe7   :  { %v1070_v29 = vpack.c.bf16 %v365_v27, %v363_v21  ;;  %v1110_v30 = vpack.c.bf16 %v1497_v28, %v1481_v22  ;;  %v710_v18 = vmul.f32 %v365_v27, %v365_v27  ;;  %v639_v15 = vadd.f32 %v638_v25, %v365_v27 }
  0xe9   :  { %1210 = vst [vmem:[%s1799_s2 + $0x20] sm:$0xff] %v1070_v29   ;;  %v773_v26 = vadd.f32 %v772_v4, %v710_v18 }
  0xea   :  { %1218 = vst [vmem:[%s1799_s2 + $0x60] sm:$0xff] %v1110_v30  }
  0xed   :  { %v1543_v50 = vpop.f32.mrf.mxu2 }
  0xee   :  { %v368_v33 = vpop.f32.mrf.mxu0  ;;  %v1511_v34 = vpop.f32.mrf.mxu1  ;;  %v1150_v53 = vpack.c.bf16 %v1543_v50, %v1531_v45 }
  0xef   :  { %v711_v11 = vmul.f32 %v368_v33, %v368_v33  ;;  %v640_v30 = vadd.f32 %v639_v15, %v368_v33 }
  0xf0   :  { %1226 = vst [vmem:[%s1799_s2 + $0xa0] sm:$0xff] %v1150_v53   ;;  %v1577_v53 = vpop.f32.mrf.mxu3 }
  0xf1   :  { %v774_v38 = vadd.f32 %v773_v26, %v711_v11  ;;  %v1185_v27 = vpack.c.bf16 %v1577_v53, %v1565_v0  ;;  %v718_v26 = vmul.f32 %v1403_v42, %v1403_v42 }
  0xf3   :  { %1233 = vst [vmem:[%s1799_s2 + $0xd8] sm:$0xff] %v1185_v27  }
  0xf5   :  { %v1563_v17 = vpop.f32.mrf.mxu2 }
  0xf6   :  { %v370_v40 = vpop.f32.mrf.mxu0  ;;  %v1527_v41 = vpop.f32.mrf.mxu1 }
  0xf7   :  { %v1075_v43 = vpack.c.bf16 %v370_v40, %v368_v33  ;;  %v1115_v44 = vpack.c.bf16 %v1527_v41, %v1511_v34  ;;  %v712_v29 = vmul.f32 %v370_v40, %v370_v40  ;;  %v641_v21 = vadd.f32 %v640_v30, %v370_v40 }
  0xf8   :  { %v1595_v4 = vpop.f32.mrf.mxu3 }
  0xf9   :  { %1211 = vst [vmem:[%s1799_s2 + $0x28] sm:$0xff] %v1075_v43   ;;  %v775_v54 = vadd.f32 %v774_v38, %v712_v29  ;;  %v719_v38 = vmul.f32 %v1413_v49, %v1413_v49 }
  0xfa   :  { %1219 = vst [vmem:[%s1799_s2 + $0x68] sm:$0xff] %v1115_v44  }
  0xfd   :  { %v1575_v52 = vpop.f32.mrf.mxu2 }
  0xfe   :  { %v373_v47 = vpop.f32.mrf.mxu0  ;;  %v1541_v48 = vpop.f32.mrf.mxu1  ;;  %v1155_v57 = vpack.c.bf16 %v1575_v52, %v1563_v17 }
  0xff   :  { %v713_v39 = vmul.f32 %v373_v47, %v373_v47  ;;  %v642_v58 = vadd.f32 %v641_v21, %v373_v47 }
 0x100   :  { %1227 = vst [vmem:[%s1799_s2 + $0xa8] sm:$0xff] %v1155_v57   ;;  %v1617_v57 = vpop.f32.mrf.mxu3 }
 0x101   :  { %v776_v33 = vadd.f32 %v775_v54, %v713_v39  ;;  %v1190_v27 = vpack.c.bf16 %v1617_v57, %v1595_v4 }
 0x103   :  { %1234 = vst [vmem:[%s1799_s2 + $0xe0] sm:$0xff] %v1190_v27  }
 0x105   :  { %v1593_v25 = vpop.f32.mrf.mxu2 }
 0x106   :  { %v375_v3 = vpop.f32.mrf.mxu0  ;;  %v1559_v5 = vpop.f32.mrf.mxu1 }
 0x107   :  { %v1080_v9 = vpack.c.bf16 %v375_v3, %v373_v47  ;;  %v1120_v14 = vpack.c.bf16 %v1559_v5, %v1541_v48  ;;  %v714_v56 = vmul.f32 %v375_v3, %v375_v3  ;;  %v643_v40 = vadd.f32 %v642_v58, %v375_v3 }
 0x108   :  { %v717_v3 = vmul.f32 %v1395_v37, %v1395_v37  ;;  %v730_v27 = vmul.f32 %v1559_v5, %v1559_v5 }
 0x109   :  { %1212 = vst [vmem:[%s1799_s2 + $0x30] sm:$0xff] %v1080_v9   ;;  %v777_v61 = vadd.f32 %v776_v33, %v714_v56 }
 0x10a   :  { %1220 = vst [vmem:[%s1799_s2 + $0x70] sm:$0xff] %v1120_v14  }
 0x10d   :  { %v1615_v56 = vpop.f32.mrf.mxu2 }
 0x10e   :  { %v378_v43 = vpop.f32.mrf.mxu0  ;;  %v1573_v44 = vpop.f32.mrf.mxu1 }
 0x10f   :  { %v715_v59 = vmul.f32 %v378_v43, %v378_v43  ;;  %v644_v62 = vadd.f32 %v643_v40, %v378_v43 }
 0x111   :  { %v778_v1 = vadd.f32 %v777_v61, %v715_v59  ;;  %v723_v61 = vmul.f32 %v1458_v12, %v1458_v12 }
 0x116   :  { %v380_v8 = vpop.f32.mrf.mxu0  ;;  %v1589_v9 = vpop.f32.mrf.mxu1 }
 0x117   :  { %v1085_v14 = vpack.c.bf16 %v380_v8, %v378_v43  ;;  %v645_v6 = vadd.f32 %v644_v62, %v380_v8  ;;  %v716_v47 = vmul.f32 %v380_v8, %v380_v8  ;;  %v1125_v18 = vpack.c.bf16 %v1589_v9, %v1573_v44 }
 0x119   :  { %1213 = vst [vmem:[%s1799_s2 + $0x38] sm:$0xff] %v1085_v14   ;;  %v646_v11 = vadd.f32 %v645_v6, %v1395_v37  ;;  %v779_v15 = vadd.f32 %v778_v1, %v716_v47  ;;  %v720_v37 = vmul.f32 %v1418_v55, %v1418_v55  ;;  %v724_v1 = vmul.f32 %v1467_v16, %v1467_v16  ;;  %v1641_v6 = vpop.f32.mrf.mxu2 }
 0x11a   :  { %1221 = vst [vmem:[%s1799_s2 + $0x78] sm:$0xff] %v1125_v18   ;;  %v725_v47 = vmul.f32 %v1481_v22, %v1481_v22 }
 0x11b   :  { %v647_v29 = vadd.f32 %v646_v11, %v1403_v42  ;;  %v780_v30 = vadd.f32 %v779_v15, %v717_v3  ;;  %v1160_v42 = vpack.c.bf16 %v1615_v56, %v1593_v25  ;;  %v726_v11 = vmul.f32 %v1497_v28, %v1497_v28 }
 0x11d   :  { %v648_v39 = vadd.f32 %v647_v29, %v1413_v49  ;;  %v781_v43 = vadd.f32 %v780_v30, %v718_v26  ;;  %v721_v49 = vmul.f32 %v1430_v63, %v1430_v63  ;;  %1228 = vst [vmem:[%s1799_s2 + $0xb0] sm:$0xff] %v1160_v42   ;;  %v728_v30 = vmul.f32 %v1527_v41, %v1527_v41 }
 0x11f   :  { %v649_v21 = vadd.f32 %v648_v39, %v1418_v55  ;;  %v782_v54 = vadd.f32 %v781_v43, %v719_v38  ;;  %v722_v55 = vmul.f32 %v1446_v7, %v1446_v7 }
 0x121   :  { %v650_v58 = vadd.f32 %v649_v21, %v1430_v63  ;;  %v783_v33 = vadd.f32 %v782_v54, %v720_v37 }
 0x123   :  { %v651_v59 = vadd.f32 %v650_v58, %v1446_v7  ;;  %v784_v40 = vadd.f32 %v783_v33, %v721_v49  ;;  %v1643_v7 = vpop.f32.mrf.mxu3 }
 0x125   :  { %v785_v62 = vadd.f32 %v784_v40, %v722_v55  ;;  %v652_v63 = vadd.f32 %v651_v59, %v1458_v12  ;;  %v732_v59 = vmul.f32 %v1589_v9, %v1589_v9 }
 0x127   :  { %v653_v8 = vadd.f32 %v652_v63, %v1467_v16  ;;  %v786_v14 = vadd.f32 %v785_v62, %v723_v61  ;;  %v727_v16 = vmul.f32 %v1511_v34, %v1511_v34  ;;  %v734_v63 = vmul.f32 %v1434_v2, %v1434_v2 }
 0x129   :  { %v654_v18 = vadd.f32 %v653_v8, %v1481_v22  ;;  %v787_v3 = vadd.f32 %v786_v14, %v724_v1  ;;  %v1657_v22 = vpop.f32.mrf.mxu2  ;;  %v735_v8 = vmul.f32 %v1450_v10, %v1450_v10 }
 0x12b   :  { %v655_v12 = vadd.f32 %v654_v18, %v1497_v28  ;;  %v788_v15 = vadd.f32 %v787_v3, %v725_v47  ;;  %v1659_v43 = vpop.f32.mrf.mxu3  ;;  %v1165_v28 = vpack.c.bf16 %v1657_v22, %v1641_v6  ;;  %v736_v47 = vmul.f32 %v1460_v13, %v1460_v13 }
 0x12c   :  { %v1195_v37 = vpack.c.bf16 %v1659_v43, %v1643_v7 }
 0x12d   :  { %v656_v26 = vadd.f32 %v655_v12, %v1511_v34  ;;  %v789_v29 = vadd.f32 %v788_v15, %v726_v11  ;;  %v729_v34 = vmul.f32 %v1541_v48, %v1541_v48  ;;  %1229 = vst [vmem:[%s1799_s2 + $0xb8] sm:$0xff] %v1165_v28  }
 0x12e   :  { %1235 = vst [vmem:[%s1799_s2 + $0xe8] sm:$0xff] %v1195_v37   ;;  %v741_v37 = vmul.f32 %v1531_v45, %v1531_v45 }
 0x12f   :  { %v657_v38 = vadd.f32 %v656_v26, %v1527_v41  ;;  %v790_v39 = vadd.f32 %v789_v29, %v727_v16  ;;  %v739_v26 = vmul.f32 %v1501_v31, %v1501_v31 }
 0x131   :  { %v658_v21 = vadd.f32 %v657_v38, %v1541_v48  ;;  %v791_v54 = vadd.f32 %v790_v39, %v728_v30  ;;  %v731_v48 = vmul.f32 %v1573_v44, %v1573_v44 }
 0x133   :  { %v792_v41 = vadd.f32 %v791_v54, %v729_v34  ;;  %v659_v42 = vadd.f32 %v658_v21, %v1559_v5  ;;  %v1683_v40 = vpop.f32.mrf.mxu3  ;;  %v733_v5 = vmul.f32 %v1422_v60, %v1422_v60  ;;  %v742_v34 = vmul.f32 %v1543_v50, %v1543_v50 }
 0x135   :  { %v793_v49 = vadd.f32 %v792_v41, %v730_v27  ;;  %v660_v58 = vadd.f32 %v659_v42, %v1573_v44  ;;  %v743_v41 = vmul.f32 %v1563_v17, %v1563_v17 }
 0x137   :  { %v794_v33 = vadd.f32 %v793_v49, %v731_v48  ;;  %v661_v55 = vadd.f32 %v660_v58, %v1589_v9  ;;  %v744_v49 = vmul.f32 %v1575_v52, %v1575_v52 }
 0x139   :  { %v662_v61 = vadd.f32 %v661_v55, %v1422_v60  ;;  %v795_v62 = vadd.f32 %v794_v33, %v732_v59 }
 0x13b   :  { %v663_v1 = vadd.f32 %v662_v61, %v1434_v2  ;;  %v796_v44 = vadd.f32 %v795_v62, %v733_v5  ;;  %v1697_v60 = vpop.f32.mrf.mxu3  ;;  %v737_v2 = vmul.f32 %v1471_v19, %v1471_v19  ;;  %v747_v62 = vmul.f32 %v1641_v6, %v1641_v6 }
 0x13c   :  { %v1200_v11 = vpack.c.bf16 %v1697_v60, %v1683_v40 }
 0x13d   :  { %v664_v14 = vadd.f32 %v663_v1, %v1450_v10  ;;  %v797_v9 = vadd.f32 %v796_v44, %v734_v63  ;;  %v738_v10 = vmul.f32 %v1483_v23, %v1483_v23  ;;  %v749_v44 = vmul.f32 %v1473_v20, %v1473_v20 }
 0x13e   :  { %1236 = vst [vmem:[%s1799_s2 + $0xf0] sm:$0xff] %v1200_v11  }
 0x13f   :  { %v665_v18 = vadd.f32 %v664_v14, %v1460_v13  ;;  %v798_v3 = vadd.f32 %v797_v9, %v735_v8 }
 0x141   :  { %v666_v12 = vadd.f32 %v665_v18, %v1471_v19  ;;  %v799_v15 = vadd.f32 %v798_v3, %v736_v47  ;;  %v740_v19 = vmul.f32 %v1513_v35, %v1513_v35 }
 0x143   :  { %v667_v13 = vadd.f32 %v666_v12, %v1483_v23  ;;  %v800_v16 = vadd.f32 %v799_v15, %v737_v2  ;;  %v1716_v28 = vpop.f32.mrf.mxu3 }
 0x145   :  { %v801_v29 = vadd.f32 %v800_v16, %v738_v10  ;;  %v668_v30 = vadd.f32 %v667_v13, %v1501_v31 }
 0x147   :  { %v669_v38 = vadd.f32 %v668_v30, %v1513_v35  ;;  %v802_v39 = vadd.f32 %v801_v29, %v739_v26 }
 0x149   :  { %v670_v23 = vadd.f32 %v669_v38, %v1531_v45  ;;  %v803_v21 = vadd.f32 %v802_v39, %v740_v19 }
 0x14b   :  { %v671_v54 = vadd.f32 %v670_v23, %v1543_v50  ;;  %v804_v31 = vadd.f32 %v803_v21, %v741_v37  ;;  %v500_v45 = vpop.f32.mrf.mxu3  ;;  %v745_v50 = vmul.f32 %v1593_v25, %v1593_v25 }
 0x14c   :  { %v1205_v48 = vpack.c.bf16 %v500_v45, %v1716_v28 }
 0x14d   :  { %v672_v35 = vadd.f32 %v671_v54, %v1563_v17  ;;  %v805_v42 = vadd.f32 %v804_v31, %v742_v34  ;;  %v760_v34 = vmul.f32 %v1659_v43, %v1659_v43 }
 0x14e   :  { %1237 = vst [vmem:[%s1799_s2 + $0xf8] sm:$0xff] %v1205_v48   ;;  %v764_v48 = vmul.f32 %v500_v45, %v500_v45 }
 0x14f   :  { %v673_v27 = vadd.f32 %v672_v35, %v1575_v52  ;;  %v806_v58 = vadd.f32 %v805_v42, %v743_v41  ;;  %v746_v52 = vmul.f32 %v1615_v56, %v1615_v56  ;;  %v761_v41 = vmul.f32 %v1683_v40, %v1683_v40 }
 0x150   :  { %v762_v42 = vmul.f32 %v1697_v60, %v1697_v60 }
 0x151   :  { %v807_v33 = vadd.f32 %v806_v58, %v744_v49  ;;  %v674_v55 = vadd.f32 %v673_v27, %v1593_v25  ;;  %v748_v25 = vmul.f32 %v1657_v22, %v1657_v22  ;;  %v763_v49 = vmul.f32 %v1716_v28, %v1716_v28 }
 0x153   :  { %v808_v17 = vadd.f32 %v807_v33, %v745_v50  ;;  %v675_v59 = vadd.f32 %v674_v55, %v1615_v56  ;;  %v750_v56 = vmul.f32 %v1485_v24, %v1485_v24 }
 0x155   :  { %v809_v5 = vadd.f32 %v808_v17, %v746_v52  ;;  %v676_v61 = vadd.f32 %v675_v59, %v1641_v6  ;;  %v751_v6 = vmul.f32 %v1503_v32, %v1503_v32 }
 0x157   :  { %v810_v63 = vadd.f32 %v809_v5, %v747_v62  ;;  %v677_v1 = vadd.f32 %v676_v61, %v1657_v22  ;;  %v752_v22 = vmul.f32 %v1515_v36, %v1515_v36 }
 0x159   :  { %v678_v8 = vadd.f32 %v677_v1, %v1473_v20  ;;  %v811_v14 = vadd.f32 %v810_v63, %v748_v25  ;;  %v753_v20 = vmul.f32 %v1533_v46, %v1533_v46 }
 0x15b   :  { %v679_v9 = vadd.f32 %v678_v8, %v1485_v24  ;;  %v812_v47 = vadd.f32 %v811_v14, %v749_v44  ;;  %v754_v24 = vmul.f32 %v1545_v51, %v1545_v51 }
 0x15d   :  { %v680_v18 = vadd.f32 %v679_v9, %v1503_v32  ;;  %v813_v3 = vadd.f32 %v812_v47, %v750_v56  ;;  %v755_v32 = vmul.f32 %v1565_v0, %v1565_v0 }
 0x15f   :  { %v681_v11 = vadd.f32 %v680_v18, %v1515_v36  ;;  %v814_v2 = vadd.f32 %v813_v3, %v751_v6  ;;  %v756_v36 = vmul.f32 %v1577_v53, %v1577_v53 }
 0x161   :  { %v682_v12 = vadd.f32 %v681_v11, %v1533_v46  ;;  %v815_v15 = vadd.f32 %v814_v2, %v752_v22  ;;  %v757_v46 = vmul.f32 %v1595_v4, %v1595_v4 }
 0x163   :  { %v683_v10 = vadd.f32 %v682_v12, %v1545_v51  ;;  %v816_v13 = vadd.f32 %v815_v15, %v753_v20  ;;  %v758_v51 = vmul.f32 %v1617_v57, %v1617_v57 }
 0x165   :  { %v817_v16 = vadd.f32 %v816_v13, %v754_v24  ;;  %v684_v26 = vadd.f32 %v683_v10, %v1565_v0  ;;  %v759_v0 = vmul.f32 %v1643_v7, %v1643_v7 }
 0x167   :  { %v685_v29 = vadd.f32 %v684_v26, %v1577_v53  ;;  %v818_v30 = vadd.f32 %v817_v16, %v755_v32 }
 0x169   :  { %v686_v19 = vadd.f32 %v685_v29, %v1595_v4  ;;  %v819_v38 = vadd.f32 %v818_v30, %v756_v36 }
 0x16b   :  { %v687_v39 = vadd.f32 %v686_v19, %v1617_v57  ;;  %v820_v37 = vadd.f32 %v819_v38, %v757_v46 }
 0x16d   :  { %v688_v23 = vadd.f32 %v687_v39, %v1643_v7  ;;  %v821_v21 = vadd.f32 %v820_v37, %v758_v51 }
 0x16f   :  { %v689_v53 = vadd.f32 %v688_v23, %v1659_v43  ;;  %v822_v54 = vadd.f32 %v821_v21, %v759_v0 }
 0x171   :  { %v823_v4 = vadd.f32 %v822_v54, %v760_v34  ;;  %v690_v31 = vadd.f32 %v689_v53, %v1683_v40 }
 0x173   :  { %v824_v57 = vadd.f32 %v823_v4, %v761_v41  ;;  %v691_v35 = vadd.f32 %v690_v31, %v1697_v60 }
 0x175   :  { %v825_v7 = vadd.f32 %v824_v57, %v762_v42  ;;  %v692_v27 = vadd.f32 %v691_v35, %v1716_v28 }
 0x177   :  { %v826_v43 = vadd.f32 %v825_v7, %v763_v49  ;;  %v693_v58 = vadd.f32 %v692_v27, %v500_v45 }
 0x179   :  { %v694_v33 = vrot.slane %v693_v58, 4  ;;  %v827_v55 = vadd.f32 %v826_v43, %v764_v48 }
 0x17b   :  { %v695_v50 = vadd.f32 %v694_v33, %v693_v58  ;;  %v828_v17 = vrot.slane %v827_v55, 4 }
 0x17d   :  { %v696_v40 = vrot.slane %v695_v50, 2  ;;  %v829_v59 = vadd.f32 %v828_v17, %v827_v55 }
 0x17f   :  { %v697_v52 = vadd.f32 %v696_v40, %v695_v50  ;;  %v830_v5 = vrot.slane %v829_v59, 2 }
 0x181   :  { %v698_v61 = vrot.slane %v697_v52, 1  ;;  %v831_v62 = vadd.f32 %v830_v5, %v829_v59 }
 0x183   :  { %v699_v60 = vadd.f32 %v698_v61, %v697_v52  ;;  %v832_v63 = vrot.slane %v831_v62, 1 }
 0x185   :  { %700 = vst [vmem:[%s1800_s3] sm:$0x1] %v699_v60  ;;  %v833_v28 = vadd.f32 %v832_v63, %v831_v62 }
 0x187   :  { %834 = vst [vmem:[%s1801_s4] sm:$0x1] %v833_v28 }

// kernel: identity_block_forward.6
= control target key start
LH: loop header
LB: loop body
LE: loop exit
PB: predicated region body
PF: predicated region fallthrough
CT: control target
= control target key end

     0   :  { %s2056_s3 = inlined_call_operand.vmem [shape: bf16[128,128], index: 3, kind: input, shape index: {}]   ;;  %s2057_s1 = inlined_call_operand.vmem [shape: f32[1,128], index: 1, kind: input, shape index: {}]   ;;  %s2058_s2 = inlined_call_operand.vmem [shape: f32[1,128], index: 2, kind: input, shape index: {}]   ;;  %s2059_s0 = inlined_call_operand.vmem [shape: bf16[512,128], index: 0, kind: input, shape index: {}]   ;;  %s2060_s4 = inlined_call_operand.vmem [shape: bf16[512,128], index: 4, kind: output, shape index: {0}]   ;;  %s2061_s5 = inlined_call_operand.vmem [shape: f32[1,1,128], index: 5, kind: output, shape index: {1}]   ;;  %s2062_s6 = inlined_call_operand.vmem [shape: f32[1,1,128], index: 6, kind: output, shape index: {2}]  }
   0x1   :  { %v996_v0 = vld [vmem:[%s2056_s3 + $0x38] sm:$0xff]  ;;  %v995_v1 = vld [vmem:[%s2056_s3 + $0x30] sm:$0xff]  ;;  %v994_v2 = vld [vmem:[%s2056_s3 + $0x28] sm:$0xff] }
   0x2   :  { %444 = vmatpush.bf16.msra.mxu0 %v996_v0  ;;  %1347 = vmatpush.bf16.msra.mxu1 %v996_v0  ;;  %v993_v3 = vld [vmem:[%s2056_s3 + $0x20] sm:$0xff]  ;;  %v992_v8 = vld [vmem:[%s2056_s3 + $0x18] sm:$0xff]  ;;  %v991_v17 = vld [vmem:[%s2056_s3 + $0x10] sm:$0xff] }
   0x3   :  { %1348 = vmatpush.bf16.msra.mxu2 %v996_v0  ;;  %1349 = vmatpush.bf16.msra.mxu3 %v996_v0  ;;  %v998_v4 = vld [vmem:[%s2059_s0] sm:$0xff]   ;;  %v990_v22 = vld [vmem:[%s2056_s3 + $0x8] sm:$0xff]  ;;  %v1286_v47 = vld [vmem:[%s2059_s0 + $0x10] sm:$0xff]  }
   0x4   :  { %v999_v5 = vunpack.c.l.bf16 %v998_v4  ;;  %v1000_v6 = vunpack.c.h.bf16 %v998_v4  ;;  %v1426_v7 = vld [vmem:[%s2057_s1] ss:$0 sm:$0xff]  ;;  %v1285_v25 = vld [vmem:[%s2059_s0 + $0x8] sm:$0xff]   ;;  %v1007_v54 = vunpack.c.l.bf16 %v1286_v47  ;;  %v1008_v55 = vunpack.c.h.bf16 %v1286_v47  ;;  %v1294_v60 = vld [vmem:[%s2059_s0 + $0x50] sm:$0xff]  }
   0x5   :  { %v1292_v9 = vld [vmem:[%s2059_s0 + $0x40] sm:$0xff]   ;;  %v1003_v29 = vunpack.c.l.bf16 %v1285_v25  ;;  %v1004_v30 = vunpack.c.h.bf16 %v1285_v25  ;;  %v1293_v33 = vld [vmem:[%s2059_s0 + $0x48] sm:$0xff]   ;;  %v1039_v63 = vunpack.c.l.bf16 %v1294_v60  ;;  %v1040_v0 = vunpack.c.h.bf16 %v1294_v60 }
   0x6   :  { %445 = vmatpush.bf16.msra.mxu0 %v995_v1  ;;  %1350 = vmatpush.bf16.msra.mxu1 %v995_v1  ;;  %v1031_v10 = vunpack.c.l.bf16 %v1292_v9  ;;  %v1032_v11 = vunpack.c.h.bf16 %v1292_v9  ;;  %v152_v12 = vmul.f32 %v1426_v7, %v999_v5  ;;  %v153_v13 = vmul.f32 %v1426_v7, %v1000_v6  ;;  %v1439_v14 = vld [vmem:[%s2058_s2] ss:$0 sm:$0xff] }
   0x7   :  { %1351 = vmatpush.bf16.msra.mxu2 %v995_v1  ;;  %1352 = vmatpush.bf16.msra.mxu3 %v995_v1  ;;  %v989_v28 = vld [vmem:[%s2056_s3] sm:$0xff]  ;;  %v1035_v34 = vunpack.c.l.bf16 %v1293_v33  ;;  %v1036_v35 = vunpack.c.h.bf16 %v1293_v33  ;;  %v154_v36 = vmul.f32 %v1426_v7, %v1003_v29  ;;  %v155_v37 = vmul.f32 %v1426_v7, %v1004_v30 }
   0x8   :  { %v168_v15 = vmul.f32 %v1426_v7, %v1031_v10  ;;  %v169_v16 = vmul.f32 %v1426_v7, %v1032_v11  ;;  %v220_v18 = vadd.f32 %v1439_v14, %v152_v12  ;;  %v221_v19 = vadd.f32 %v1439_v14, %v153_v13  ;;  %v1300_v46 = vld [vmem:[%s2059_s0 + $0x80] sm:$0xff]   ;;  %v1301_v13 = vld [vmem:[%s2059_s0 + $0x88] sm:$0xff]  }
   0x9   :  { %v170_v38 = vmul.f32 %v1426_v7, %v1035_v34  ;;  %v171_v39 = vmul.f32 %v1426_v7, %v1036_v35  ;;  %v222_v40 = vadd.f32 %v1439_v14, %v154_v36  ;;  %v223_v41 = vadd.f32 %v1439_v14, %v155_v37  ;;  %v1308_v47 = vld [vmem:[%s2059_s0 + $0xc0] sm:$0xff]  }
   0xa   :  { %446 = vmatpush.bf16.msra.mxu0 %v994_v2  ;;  %1353 = vmatpush.bf16.msra.mxu1 %v994_v2  ;;  %v236_v20 = vadd.f32 %v1439_v14, %v168_v15  ;;  %v237_v21 = vadd.f32 %v1439_v14, %v169_v16  ;;  %v284_v23 = vmax.f32 %v220_v18, 0.0  ;;  %v285_v24 = vmax.f32 %v221_v19, 0.0  ;;  %v1287_v15 = vld [vmem:[%s2059_s0 + $0x18] sm:$0xff]  }
   0xb   :  { %1354 = vmatpush.bf16.msra.mxu2 %v994_v2  ;;  %1355 = vmatpush.bf16.msra.mxu3 %v994_v2  ;;  %v238_v42 = vadd.f32 %v1439_v14, %v170_v38  ;;  %v239_v43 = vadd.f32 %v1439_v14, %v171_v39  ;;  %v286_v44 = vmax.f32 %v222_v40, 0.0  ;;  %v287_v45 = vmax.f32 %v223_v41, 0.0 }
   0xc   :  { %v300_v26 = vmax.f32 %v236_v20, 0.0  ;;  %v301_v27 = vmax.f32 %v237_v21, 0.0  ;;  %v348_v31 = vpack.c.bf16 %v285_v24, %v284_v23  ;;  %v1063_v50 = vunpack.c.l.bf16 %v1300_v46 }
   0xd   :  { %v302_v48 = vmax.f32 %v238_v42, 0.0  ;;  %v303_v49 = vmax.f32 %v239_v43, 0.0  ;;  %v1064_v51 = vunpack.c.h.bf16 %v1300_v46  ;;  %v349_v56 = vpack.c.bf16 %v287_v45, %v286_v44  ;;  %v1302_v46 = vld [vmem:[%s2059_s0 + $0x90] sm:$0xff]  }
   0xe   :  { %447 = vmatpush.bf16.msra.mxu0 %v993_v3  ;;  %1356 = vmatpush.bf16.msra.mxu1 %v993_v3  ;;  %v356_v32 = vpack.c.bf16 %v301_v27, %v300_v26  ;;  %v184_v52 = vmul.f32 %v1426_v7, %v1063_v50  ;;  %v156_v1 = vmul.f32 %v1426_v7, %v1007_v54  ;;  %v1067_v18 = vunpack.c.l.bf16 %v1301_v13 }
   0xf   :  { %1357 = vmatpush.bf16.msra.mxu2 %v993_v3  ;;  %1358 = vmatpush.bf16.msra.mxu3 %v993_v3  ;;  %v185_v53 = vmul.f32 %v1426_v7, %v1064_v51  ;;  %v357_v57 = vpack.c.bf16 %v303_v49, %v302_v48  ;;  %v157_v2 = vmul.f32 %v1426_v7, %v1008_v55  ;;  %v1068_v19 = vunpack.c.h.bf16 %v1301_v13  ;;  %v1288_v48 = vld [vmem:[%s2059_s0 + $0x20] sm:$0xff]  }
  0x10   :  { %v252_v58 = vadd.f32 %v1439_v14, %v184_v52  ;;  %v172_v4 = vmul.f32 %v1426_v7, %v1039_v63  ;;  %v173_v5 = vmul.f32 %v1426_v7, %v1040_v0  ;;  %v224_v6 = vadd.f32 %v1439_v14, %v156_v1  ;;  %v1296_v1 = vld [vmem:[%s2059_s0 + $0x60] sm:$0xff]  }
  0x11   :  { %v253_v59 = vadd.f32 %v1439_v14, %v185_v53  ;;  %v186_v20 = vmul.f32 %v1426_v7, %v1067_v18  ;;  %v187_v21 = vmul.f32 %v1426_v7, %v1068_v19  ;;  %v1012_v23 = vunpack.c.h.bf16 %v1287_v15 }
  0x12   :  { %448 = vmatpush.bf16.msra.mxu0 %v992_v8  ;;  %1359 = vmatpush.bf16.msra.mxu1 %v992_v8  ;;  %v316_v61 = vmax.f32 %v252_v58, 0.0  ;;  %v240_v9 = vadd.f32 %v1439_v14, %v172_v4  ;;  %v241_v10 = vadd.f32 %v1439_v14, %v173_v5  ;;  %v288_v11 = vmax.f32 %v224_v6, 0.0 }
  0x13   :  { %1360 = vmatpush.bf16.msra.mxu2 %v992_v8  ;;  %1361 = vmatpush.bf16.msra.mxu3 %v992_v8  ;;  %v317_v62 = vmax.f32 %v253_v59, 0.0  ;;  %v225_v8 = vadd.f32 %v1439_v14, %v157_v2  ;;  %v254_v26 = vadd.f32 %v1439_v14, %v186_v20  ;;  %v255_v27 = vadd.f32 %v1439_v14, %v187_v21 }
  0x14   :  { %v304_v16 = vmax.f32 %v240_v9, 0.0  ;;  %v159_v34 = vmul.f32 %v1426_v7, %v1012_v23  ;;  %v1071_v49 = vunpack.c.l.bf16 %v1302_v46  ;;  %v1072_v50 = vunpack.c.h.bf16 %v1302_v46 }
  0x15   :  { %v364_v3 = vpack.c.bf16 %v317_v62, %v316_v61  ;;  %v289_v12 = vmax.f32 %v225_v8, 0.0  ;;  %v318_v29 = vmax.f32 %v254_v26, 0.0  ;;  %v319_v30 = vmax.f32 %v255_v27, 0.0  ;;  %v1289_v26 = vld [vmem:[%s2059_s0 + $0x28] sm:$0xff]  }
  0x16   :  { %449 = vmatpush.bf16.msra.mxu0 %v991_v17  ;;  %1362 = vmatpush.bf16.msra.mxu1 %v991_v17  ;;  %v227_v39 = vadd.f32 %v1439_v14, %v159_v34  ;;  %v1095_v51 = vunpack.c.l.bf16 %v1308_v47  ;;  %v1096_v52 = vunpack.c.h.bf16 %v1308_v47  ;;  %v188_v53 = vmul.f32 %v1426_v7, %v1071_v49 }
  0x17   :  { %1363 = vmatpush.bf16.msra.mxu2 %v991_v17  ;;  %1364 = vmatpush.bf16.msra.mxu3 %v991_v17  ;;  %v305_v17 = vmax.f32 %v241_v10, 0.0  ;;  %v350_v24 = vpack.c.bf16 %v289_v12, %v288_v11  ;;  %v365_v35 = vpack.c.bf16 %v319_v30, %v318_v29  ;;  %v189_v54 = vmul.f32 %v1426_v7, %v1072_v50 }
  0x18   :  { %v291_v43 = vmax.f32 %v227_v39, 0.0  ;;  %v200_v55 = vmul.f32 %v1426_v7, %v1095_v51  ;;  %v1015_v58 = vunpack.c.l.bf16 %v1288_v48  ;;  %v1016_v59 = vunpack.c.h.bf16 %v1288_v48 }
  0x19   :  { %v358_v25 = vpack.c.bf16 %v305_v17, %v304_v16  ;;  %v256_v61 = vadd.f32 %v1439_v14, %v188_v53  ;;  %v257_v62 = vadd.f32 %v1439_v14, %v189_v54  ;;  %v1047_v9 = vunpack.c.l.bf16 %v1296_v1 }
  0x1a   :  { %450 = vmatpush.bf16.msra.mxu0 %v990_v22  ;;  %1365 = vmatpush.bf16.msra.mxu1 %v990_v22  ;;  %v268_v63 = vadd.f32 %v1439_v14, %v200_v55  ;;  %v160_v6 = vmul.f32 %v1426_v7, %v1015_v58  ;;  %v161_v8 = vmul.f32 %v1426_v7, %v1016_v59  ;;  %v1048_v10 = vunpack.c.h.bf16 %v1296_v1  ;;  %v1310_v1 = vld [vmem:[%s2059_s0 + $0xd0] sm:$0xff]  }
  0x1b   :  { %1366 = vmatpush.bf16.msra.mxu2 %v990_v22  ;;  %1367 = vmatpush.bf16.msra.mxu3 %v990_v22  ;;  %v1011_v22 = vunpack.c.l.bf16 %v1287_v15  ;;  %v320_v2 = vmax.f32 %v256_v61, 0.0  ;;  %v176_v13 = vmul.f32 %v1426_v7, %v1047_v9 }
  0x1c   :  { %v332_v4 = vmax.f32 %v268_v63, 0.0  ;;  %v177_v15 = vmul.f32 %v1426_v7, %v1048_v10  ;;  %v228_v16 = vadd.f32 %v1439_v14, %v160_v6  ;;  %v229_v17 = vadd.f32 %v1439_v14, %v161_v8 }
  0x1d   :  { %v158_v33 = vmul.f32 %v1426_v7, %v1011_v22  ;;  %v244_v18 = vadd.f32 %v1439_v14, %v176_v13  ;;  %v1104_v6 = vunpack.c.h.bf16 %v1310_v1 }
  0x1e   :  { %451 = vmatpush.bf16.msra.mxu0 %v989_v28  ;;  %1368 = vmatpush.bf16.msra.mxu1 %v989_v28  ;;  %v245_v19 = vadd.f32 %v1439_v14, %v177_v15  ;;  %v292_v20 = vmax.f32 %v228_v16, 0.0  ;;  %v293_v21 = vmax.f32 %v229_v17, 0.0 }
  0x1f   :  { %1369 = vmatpush.bf16.msra.mxu2 %v989_v28  ;;  %1370 = vmatpush.bf16.msra.mxu3 %v989_v28  ;;  %v1295_v28 = vld [vmem:[%s2059_s0 + $0x58] sm:$0xff]   ;;  %v226_v38 = vadd.f32 %v1439_v14, %v158_v33  ;;  %v308_v22 = vmax.f32 %v244_v18, 0.0 }
  0x20   :  { %v309_v23 = vmax.f32 %v245_v19, 0.0 }
  0x21   :  { %452 = vmatmul.bf16.vlgmr.msra.gmra.mxu0 %v348_v31  ;;  %492 = vmatmul.bf16.vlgmr.msra.gmra.mxu1 %v356_v32  ;;  %v1043_v31 = vunpack.c.l.bf16 %v1295_v28  ;;  %v1044_v32 = vunpack.c.h.bf16 %v1295_v28  ;;  %v290_v42 = vmax.f32 %v226_v38, 0.0 }
  0x22   :  { %532 = vmatmul.bf16.vlgmr.msra.gmra.mxu2 %v364_v3  ;;  %v321_v3 = vmax.f32 %v257_v62, 0.0  ;;  %v360_v38 = vpack.c.bf16 %v309_v23, %v308_v22 }
  0x23   :  { %v174_v36 = vmul.f32 %v1426_v7, %v1043_v31  ;;  %v175_v37 = vmul.f32 %v1426_v7, %v1044_v32 }
  0x24   :  { %v366_v11 = vpack.c.bf16 %v321_v3, %v320_v2  ;;  %v1290_v2 = vld [vmem:[%s2059_s0 + $0x30] sm:$0xff]  }
  0x25   :  { %v242_v40 = vadd.f32 %v1439_v14, %v174_v36  ;;  %v243_v41 = vadd.f32 %v1439_v14, %v175_v37  ;;  %v1019_v36 = vunpack.c.l.bf16 %v1289_v26  ;;  %v1020_v37 = vunpack.c.h.bf16 %v1289_v26 }
  0x26   :  { %v1023_v13 = vunpack.c.l.bf16 %v1290_v2  ;;  %v1024_v15 = vunpack.c.h.bf16 %v1290_v2 }
  0x27   :  { %v306_v44 = vmax.f32 %v242_v40, 0.0  ;;  %v307_v45 = vmax.f32 %v243_v41, 0.0  ;;  %v162_v48 = vmul.f32 %v1426_v7, %v1019_v36  ;;  %v163_v49 = vmul.f32 %v1426_v7, %v1020_v37 }
  0x28   :  { %v164_v26 = vmul.f32 %v1426_v7, %v1023_v13 }
  0x29   :  { %v359_v60 = vpack.c.bf16 %v307_v45, %v306_v44 }
  0x31   :  { %457 = vmatmul.bf16.gmra.mxu0 %v349_v56  ;;  %497 = vmatmul.bf16.gmra.mxu1 %v357_v57  ;;  %v201_v56 = vmul.f32 %v1426_v7, %v1096_v52  ;;  %v351_v57 = vpack.c.bf16 %v291_v43, %v290_v42  ;;  %v1297_v43 = vld [vmem:[%s2059_s0 + $0x68] sm:$0xff]  }
  0x32   :  { %537 = vmatmul.bf16.gmra.mxu2 %v365_v35  ;;  %v352_v35 = vpack.c.bf16 %v293_v21, %v292_v20  ;;  %v1051_v50 = vunpack.c.l.bf16 %v1297_v43  ;;  %v1052_v51 = vunpack.c.h.bf16 %v1297_v43  ;;  %v1298_v21 = vld [vmem:[%s2059_s0 + $0x70] sm:$0xff]   ;;  %v1311_v43 = vld [vmem:[%s2059_s0 + $0xd8] sm:$0xff]  }
  0x33   :  { %v269_v0 = vadd.f32 %v1439_v14, %v201_v56  ;;  %v230_v56 = vadd.f32 %v1439_v14, %v162_v48  ;;  %v1108_v48 = vunpack.c.h.bf16 %v1311_v43 }
  0x34   :  { %v178_v54 = vmul.f32 %v1426_v7, %v1051_v50  ;;  %v179_v55 = vmul.f32 %v1426_v7, %v1052_v51 }
  0x35   :  { %v333_v5 = vmax.f32 %v269_v0, 0.0  ;;  %v1304_v0 = vld [vmem:[%s2059_s0 + $0xa0] sm:$0xff]  }
  0x36   :  { %v246_v58 = vadd.f32 %v1439_v14, %v178_v54  ;;  %v247_v59 = vadd.f32 %v1439_v14, %v179_v55  ;;  %v1079_v3 = vunpack.c.l.bf16 %v1304_v0 }
  0x37   :  { %v372_v12 = vpack.c.bf16 %v333_v5, %v332_v4  ;;  %v1080_v4 = vunpack.c.h.bf16 %v1304_v0  ;;  %v1103_v5 = vunpack.c.l.bf16 %v1310_v1 }
  0x38   :  { %v310_v62 = vmax.f32 %v246_v58, 0.0  ;;  %v311_v63 = vmax.f32 %v247_v59, 0.0  ;;  %v192_v8 = vmul.f32 %v1426_v7, %v1079_v3 }
  0x39   :  { %572 = vmatmul.bf16.vlgmr.msra.gmra.mxu3 %v372_v12  ;;  %v193_v9 = vmul.f32 %v1426_v7, %v1080_v4  ;;  %v204_v10 = vmul.f32 %v1426_v7, %v1103_v5 }
  0x3a   :  { %v361_v16 = vpack.c.bf16 %v311_v63, %v310_v62  ;;  %v260_v17 = vadd.f32 %v1439_v14, %v192_v8 }
  0x3b   :  { %v261_v18 = vadd.f32 %v1439_v14, %v193_v9  ;;  %v272_v19 = vadd.f32 %v1439_v14, %v204_v10 }
  0x3c   :  { %v324_v22 = vmax.f32 %v260_v17, 0.0 }
  0x3d   :  { %v325_v23 = vmax.f32 %v261_v18, 0.0 }
  0x41   :  { %462 = vmatmul.bf16.gmra.mxu0 %v350_v24  ;;  %502 = vmatmul.bf16.gmra.mxu1 %v358_v25  ;;  %v1303_v24 = vld [vmem:[%s2059_s0 + $0x98] sm:$0xff]   ;;  %v1309_v25 = vld [vmem:[%s2059_s0 + $0xc8] sm:$0xff]  }
  0x42   :  { %542 = vmatmul.bf16.gmra.mxu2 %v366_v11  ;;  %v1075_v27 = vunpack.c.l.bf16 %v1303_v24  ;;  %v1076_v28 = vunpack.c.h.bf16 %v1303_v24  ;;  %v1099_v29 = vunpack.c.l.bf16 %v1309_v25  ;;  %v1100_v30 = vunpack.c.h.bf16 %v1309_v25 }
  0x43   :  { %v205_v11 = vmul.f32 %v1426_v7, %v1104_v6  ;;  %v336_v24 = vmax.f32 %v272_v19, 0.0 }
  0x44   :  { %v190_v31 = vmul.f32 %v1426_v7, %v1075_v27  ;;  %v191_v32 = vmul.f32 %v1426_v7, %v1076_v28  ;;  %v202_v33 = vmul.f32 %v1426_v7, %v1099_v29  ;;  %v203_v34 = vmul.f32 %v1426_v7, %v1100_v30 }
  0x45   :  { %v273_v20 = vadd.f32 %v1439_v14, %v205_v11  ;;  %v165_v27 = vmul.f32 %v1426_v7, %v1024_v15  ;;  %v1055_v28 = vunpack.c.l.bf16 %v1298_v21  ;;  %v1056_v29 = vunpack.c.h.bf16 %v1298_v21  ;;  %v1312_v21 = vld [vmem:[%s2059_s0 + $0xe0] sm:$0xff]  }
  0x46   :  { %v258_v39 = vadd.f32 %v1439_v14, %v190_v31  ;;  %v259_v40 = vadd.f32 %v1439_v14, %v191_v32  ;;  %v270_v41 = vadd.f32 %v1439_v14, %v202_v33  ;;  %v271_v42 = vadd.f32 %v1439_v14, %v203_v34 }
  0x47   :  { %v337_v25 = vmax.f32 %v273_v20, 0.0  ;;  %v368_v30 = vpack.c.bf16 %v325_v23, %v324_v22  ;;  %v180_v32 = vmul.f32 %v1426_v7, %v1055_v28  ;;  %v181_v33 = vmul.f32 %v1426_v7, %v1056_v29  ;;  %v1306_v20 = vld [vmem:[%s2059_s0 + $0xb0] sm:$0xff]  }
  0x48   :  { %v322_v44 = vmax.f32 %v258_v39, 0.0  ;;  %v323_v45 = vmax.f32 %v259_v40, 0.0  ;;  %v334_v46 = vmax.f32 %v270_v41, 0.0  ;;  %v335_v47 = vmax.f32 %v271_v42, 0.0  ;;  %v1305_v42 = vld [vmem:[%s2059_s0 + $0xa8] sm:$0xff]  }
  0x49   :  { %v374_v31 = vpack.c.bf16 %v337_v25, %v336_v24  ;;  %v232_v34 = vadd.f32 %v1439_v14, %v164_v26  ;;  %v248_v36 = vadd.f32 %v1439_v14, %v180_v32  ;;  %v249_v37 = vadd.f32 %v1439_v14, %v181_v33 }
  0x4a   :  { %v367_v52 = vpack.c.bf16 %v323_v45, %v322_v44  ;;  %v373_v53 = vpack.c.bf16 %v335_v47, %v334_v46  ;;  %v1291_v44 = vld [vmem:[%s2059_s0 + $0x38] sm:$0xff]   ;;  %v1083_v45 = vunpack.c.l.bf16 %v1305_v42  ;;  %v1084_v46 = vunpack.c.h.bf16 %v1305_v42 }
  0x4b   :  { %v312_v40 = vmax.f32 %v248_v36, 0.0  ;;  %v313_v41 = vmax.f32 %v249_v37, 0.0  ;;  %v1107_v47 = vunpack.c.l.bf16 %v1311_v43  ;;  %v1027_v54 = vunpack.c.l.bf16 %v1291_v44  ;;  %v1307_v42 = vld [vmem:[%s2059_s0 + $0xb8] sm:$0xff]   ;;  %v1313_v43 = vld [vmem:[%s2059_s0 + $0xe8] sm:$0xff]  }
  0x4c   :  { %577 = vmatmul.bf16.gmra.mxu3 %v373_v53  ;;  %v195_v50 = vmul.f32 %v1426_v7, %v1084_v46  ;;  %v1028_v55 = vunpack.c.h.bf16 %v1291_v44  ;;  %v1087_v22 = vunpack.c.l.bf16 %v1306_v20  ;;  %v1088_v23 = vunpack.c.h.bf16 %v1306_v20 }
  0x4d   :  { %v206_v51 = vmul.f32 %v1426_v7, %v1107_v47  ;;  %v166_v2 = vmul.f32 %v1426_v7, %v1027_v54  ;;  %v1111_v24 = vunpack.c.l.bf16 %v1312_v21  ;;  %v1112_v25 = vunpack.c.h.bf16 %v1312_v21 }
  0x4e   :  { %v263_v58 = vadd.f32 %v1439_v14, %v195_v50  ;;  %v167_v3 = vmul.f32 %v1426_v7, %v1028_v55  ;;  %v196_v26 = vmul.f32 %v1426_v7, %v1087_v22  ;;  %v1091_v44 = vunpack.c.l.bf16 %v1307_v42 }
  0x4f   :  { %v274_v59 = vadd.f32 %v1439_v14, %v206_v51  ;;  %v234_v11 = vadd.f32 %v1439_v14, %v166_v2  ;;  %v208_v28 = vmul.f32 %v1426_v7, %v1111_v24  ;;  %v209_v29 = vmul.f32 %v1426_v7, %v1112_v25 }
  0x50   :  { %v327_v63 = vmax.f32 %v263_v58, 0.0  ;;  %v264_v32 = vadd.f32 %v1439_v14, %v196_v26  ;;  %v1115_v46 = vunpack.c.l.bf16 %v1313_v43  ;;  %v1116_v47 = vunpack.c.h.bf16 %v1313_v43 }
  0x51   :  { %467 = vmatmul.bf16.gmra.mxu0 %v351_v57  ;;  %507 = vmatmul.bf16.gmra.mxu1 %v359_v60  ;;  %v231_v57 = vadd.f32 %v1439_v14, %v163_v49  ;;  %v294_v60 = vmax.f32 %v230_v56, 0.0  ;;  %v194_v49 = vmul.f32 %v1426_v7, %v1083_v45  ;;  %v362_v56 = vpack.c.bf16 %v313_v41, %v312_v40 }
  0x52   :  { %547 = vmatmul.bf16.gmra.mxu2 %v367_v52  ;;  %v207_v52 = vmul.f32 %v1426_v7, %v1108_v48  ;;  %v338_v0 = vmax.f32 %v274_v59, 0.0  ;;  %v328_v36 = vmax.f32 %v264_v32, 0.0  ;;  %v1092_v45 = vunpack.c.h.bf16 %v1307_v42  ;;  %v1315_v32 = vld [vmem:[%s2059_s0 + $0xf8] sm:$0xff]  }
  0x53   :  { %v295_v61 = vmax.f32 %v231_v57, 0.0  ;;  %v262_v57 = vadd.f32 %v1439_v14, %v194_v49  ;;  %v198_v48 = vmul.f32 %v1426_v7, %v1091_v44  ;;  %v210_v50 = vmul.f32 %v1426_v7, %v1115_v46 }
  0x54   :  { %v199_v49 = vmul.f32 %v1426_v7, %v1092_v45  ;;  %v211_v51 = vmul.f32 %v1426_v7, %v1116_v47 }
  0x55   :  { %v353_v12 = vpack.c.bf16 %v295_v61, %v294_v60  ;;  %v275_v60 = vadd.f32 %v1439_v14, %v207_v52  ;;  %v1299_v61 = vld [vmem:[%s2059_s0 + $0x78] sm:$0xff]   ;;  %v326_v62 = vmax.f32 %v262_v57, 0.0  ;;  %v266_v52 = vadd.f32 %v1439_v14, %v198_v48 }
  0x56   :  { %v1059_v4 = vunpack.c.l.bf16 %v1299_v61  ;;  %v1060_v5 = vunpack.c.h.bf16 %v1299_v61  ;;  %v278_v54 = vadd.f32 %v1439_v14, %v210_v50  ;;  %v279_v55 = vadd.f32 %v1439_v14, %v211_v51 }
  0x57   :  { %v339_v1 = vmax.f32 %v275_v60, 0.0  ;;  %v369_v6 = vpack.c.bf16 %v327_v63, %v326_v62  ;;  %v330_v58 = vmax.f32 %v266_v52, 0.0 }
  0x58   :  { %v182_v9 = vmul.f32 %v1426_v7, %v1059_v4  ;;  %v183_v10 = vmul.f32 %v1426_v7, %v1060_v5  ;;  %v342_v60 = vmax.f32 %v278_v54, 0.0  ;;  %v343_v61 = vmax.f32 %v279_v55, 0.0 }
  0x59   :  { %v375_v8 = vpack.c.bf16 %v339_v1, %v338_v0 }
  0x5a   :  { %v250_v13 = vadd.f32 %v1439_v14, %v182_v9  ;;  %v251_v15 = vadd.f32 %v1439_v14, %v183_v10  ;;  %v377_v63 = vpack.c.bf16 %v343_v61, %v342_v60 }
  0x5c   :  { %582 = vmatmul.bf16.gmra.mxu3 %v374_v31  ;;  %v314_v18 = vmax.f32 %v250_v13, 0.0  ;;  %v315_v19 = vmax.f32 %v251_v15, 0.0 }
  0x5e   :  { %v363_v31 = vpack.c.bf16 %v315_v19, %v314_v18 }
  0x61   :  { %472 = vmatmul.bf16.gmra.mxu0 %v352_v35  ;;  %512 = vmatmul.bf16.gmra.mxu1 %v360_v38  ;;  %v233_v35 = vadd.f32 %v1439_v14, %v165_v27  ;;  %v296_v38 = vmax.f32 %v232_v34, 0.0  ;;  %v197_v27 = vmul.f32 %v1426_v7, %v1088_v23  ;;  %v276_v34 = vadd.f32 %v1439_v14, %v208_v28 }
  0x62   :  { %552 = vmatmul.bf16.gmra.mxu2 %v368_v30 }
  0x63   :  { %v297_v39 = vmax.f32 %v233_v35, 0.0  ;;  %v265_v33 = vadd.f32 %v1439_v14, %v197_v27  ;;  %v277_v35 = vadd.f32 %v1439_v14, %v209_v29 }
  0x65   :  { %v354_v53 = vpack.c.bf16 %v297_v39, %v296_v38  ;;  %v329_v37 = vmax.f32 %v265_v33, 0.0  ;;  %v340_v38 = vmax.f32 %v276_v34, 0.0  ;;  %v341_v39 = vmax.f32 %v277_v35, 0.0 }
  0x66   :  { %v1123_v34 = vunpack.c.l.bf16 %v1315_v32  ;;  %v1124_v35 = vunpack.c.h.bf16 %v1315_v32 }
  0x67   :  { %v370_v40 = vpack.c.bf16 %v329_v37, %v328_v36  ;;  %v376_v41 = vpack.c.bf16 %v341_v39, %v340_v38 }
  0x68   :  { %v214_v36 = vmul.f32 %v1426_v7, %v1123_v34  ;;  %v215_v37 = vmul.f32 %v1426_v7, %v1124_v35 }
  0x6a   :  { %v282_v38 = vadd.f32 %v1439_v14, %v214_v36  ;;  %v283_v39 = vadd.f32 %v1439_v14, %v215_v37 }
  0x6c   :  { %587 = vmatmul.bf16.gmra.mxu3 %v375_v8  ;;  %v1314_v8 = vld [vmem:[%s2059_s0 + $0xf0] sm:$0xff]   ;;  %v346_v45 = vmax.f32 %v282_v38, 0.0  ;;  %v347_v47 = vmax.f32 %v283_v39, 0.0 }
  0x6d   :  { %v1119_v10 = vunpack.c.l.bf16 %v1314_v8 }
  0x71   :  { %477 = vmatmul.bf16.gmra.mxu0 %v353_v12  ;;  %517 = vmatmul.bf16.gmra.mxu1 %v361_v16  ;;  %v235_v12 = vadd.f32 %v1439_v14, %v167_v3  ;;  %v298_v16 = vmax.f32 %v234_v11, 0.0  ;;  %v1120_v11 = vunpack.c.h.bf16 %v1314_v8 }
  0x72   :  { %557 = vmatmul.bf16.gmra.mxu2 %v369_v6 }
  0x73   :  { %v299_v17 = vmax.f32 %v235_v12, 0.0  ;;  %v212_v12 = vmul.f32 %v1426_v7, %v1119_v10  ;;  %v213_v13 = vmul.f32 %v1426_v7, %v1120_v11  ;;  %v379_v7 = vpack.c.bf16 %v347_v47, %v346_v45 }
  0x75   :  { %v355_v30 = vpack.c.bf16 %v299_v17, %v298_v16  ;;  %v280_v15 = vadd.f32 %v1439_v14, %v212_v12  ;;  %v281_v16 = vadd.f32 %v1439_v14, %v213_v13 }
  0x77   :  { %v344_v21 = vmax.f32 %v280_v15, 0.0  ;;  %v345_v22 = vmax.f32 %v281_v16, 0.0 }
  0x79   :  { %v378_v24 = vpack.c.bf16 %v345_v22, %v344_v21 }
  0x7c   :  { %592 = vmatmul.bf16.gmra.mxu3 %v376_v41 }
  0x81   :  { %482 = vmatmul.bf16.gmra.mxu0 %v354_v53  ;;  %522 = vmatmul.bf16.gmra.mxu1 %v362_v56  ;;  %v267_v53 = vadd.f32 %v1439_v14, %v199_v49 }
  0x82   :  { %562 = vmatmul.bf16.gmra.mxu2 %v370_v40 }
  0x83   :  { %v331_v59 = vmax.f32 %v267_v53, 0.0 }
  0x85   :  { %v371_v62 = vpack.c.bf16 %v331_v59, %v330_v58 }
  0x8c   :  { %597 = vmatmul.bf16.gmra.mxu3 %v377_v63 }
  0x91   :  { %487 = vmatmul.bf16.gmra.mxu0 %v355_v30  ;;  %527 = vmatmul.bf16.gmra.mxu1 %v363_v31 }
  0x92   :  { %567 = vmatmul.bf16.gmra.mxu2 %v371_v62 }
  0x9c   :  { %602 = vmatmul.bf16.gmra.mxu3 %v378_v24 }
  0x9e   :  { %v453_v56 = vpop.f32.mrf.mxu0  ;;  %v1652_v57 = vpop.f32.mrf.mxu1 }
  0x9f   :  { %v811_v0 = vmul.f32 %v453_v56, %v453_v56 }
  0xa5   :  { %v1677_v31 = vpop.f32.mrf.mxu2 }
  0xa6   :  { %v455_v1 = vpop.f32.mrf.mxu0  ;;  %v1654_v2 = vpop.f32.mrf.mxu1 }
  0xa7   :  { %v1128_v3 = vpack.c.bf16 %v455_v1, %v453_v56  ;;  %v741_v4 = vadd.f32 %v455_v1, %v453_v56  ;;  %v812_v5 = vmul.f32 %v455_v1, %v455_v1  ;;  %v1168_v6 = vpack.c.bf16 %v1654_v2, %v1652_v57 }
  0xa9   :  { %1129 = vst [vmem:[%s2060_s4] sm:$0xff] %v1128_v3   ;;  %v875_v9 = vadd.f32 %v812_v5, %v811_v0 }
  0xaa   :  { %1323 = vst [vmem:[%s2060_s4 + $0x40] sm:$0xff] %v1168_v6  }
  0xac   :  { %607 = vmatmul.bf16.gmra.mxu3 %v379_v7 }
  0xad   :  { %v1696_v44 = vpop.f32.mrf.mxu2 }
  0xae   :  { %v458_v17 = vpop.f32.mrf.mxu0  ;;  %v1671_v18 = vpop.f32.mrf.mxu1  ;;  %v1208_v46 = vpack.c.bf16 %v1696_v44, %v1677_v31 }
  0xaf   :  { %v742_v19 = vadd.f32 %v741_v4, %v458_v17  ;;  %v813_v20 = vmul.f32 %v458_v17, %v458_v17 }
  0xb0   :  { %1331 = vst [vmem:[%s2060_s4 + $0x80] sm:$0xff] %v1208_v46  }
  0xb1   :  { %v876_v23 = vadd.f32 %v875_v9, %v813_v20 }
  0xb5   :  { %v1709_v52 = vpop.f32.mrf.mxu2 }
  0xb6   :  { %v460_v25 = vpop.f32.mrf.mxu0  ;;  %v1673_v26 = vpop.f32.mrf.mxu1 }
  0xb7   :  { %v1133_v27 = vpack.c.bf16 %v460_v25, %v458_v17  ;;  %v743_v28 = vadd.f32 %v742_v19, %v460_v25  ;;  %v814_v29 = vmul.f32 %v460_v25, %v460_v25  ;;  %v1173_v30 = vpack.c.bf16 %v1673_v26, %v1671_v18 }
  0xb9   :  { %1316 = vst [vmem:[%s2060_s4 + $0x8] sm:$0xff] %v1133_v27   ;;  %v877_v33 = vadd.f32 %v876_v23, %v814_v29 }
  0xba   :  { %1324 = vst [vmem:[%s2060_s4 + $0x48] sm:$0xff] %v1173_v30  }
  0xbc   :  { %v1732_v63 = vpop.f32.mrf.mxu3 }
  0xbd   :  { %v1719_v55 = vpop.f32.mrf.mxu2 }
  0xbe   :  { %v463_v40 = vpop.f32.mrf.mxu0  ;;  %v1692_v41 = vpop.f32.mrf.mxu1  ;;  %v1213_v56 = vpack.c.bf16 %v1719_v55, %v1709_v52 }
  0xbf   :  { %v1694_v42 = vadd.f32 %v743_v28, %v463_v40  ;;  %v815_v43 = vmul.f32 %v463_v40, %v463_v40 }
  0xc0   :  { %1332 = vst [vmem:[%s2060_s4 + $0x88] sm:$0xff] %v1213_v56  }
  0xc1   :  { %v1700_v48 = vadd.f32 %v877_v33, %v815_v43 }
  0xc4   :  { %v1744_v4 = vpop.f32.mrf.mxu3 }
  0xc5   :  { %v1730_v62 = vpop.f32.mrf.mxu2  ;;  %v1248_v6 = vpack.c.bf16 %v1744_v4, %v1732_v63 }
  0xc6   :  { %v465_v14 = vpop.f32.mrf.mxu0  ;;  %v1705_v49 = vpop.f32.mrf.mxu1 }
  0xc7   :  { %v1138_v50 = vpack.c.bf16 %v465_v14, %v463_v40  ;;  %v1178_v51 = vpack.c.bf16 %v1705_v49, %v1692_v41  ;;  %1339 = vst [vmem:[%s2060_s4 + $0xc0] sm:$0xff] %v1248_v6   ;;  %v816_v34 = vmul.f32 %v465_v14, %v465_v14  ;;  %v745_v38 = vadd.f32 %v1694_v42, %v465_v14 }
  0xc9   :  { %1317 = vst [vmem:[%s2060_s4 + $0x10] sm:$0xff] %v1138_v50   ;;  %v879_v39 = vadd.f32 %v1700_v48, %v816_v34 }
  0xca   :  { %1325 = vst [vmem:[%s2060_s4 + $0x50] sm:$0xff] %v1178_v51  }
  0xcd   :  { %v1742_v3 = vpop.f32.mrf.mxu2 }
  0xce   :  { %v468_v53 = vpop.f32.mrf.mxu0  ;;  %v1717_v54 = vpop.f32.mrf.mxu1  ;;  %v1218_v5 = vpack.c.bf16 %v1742_v3, %v1730_v62 }
  0xcf   :  { %v1762_v13 = vpop.f32.mrf.mxu3  ;;  %v817_v37 = vmul.f32 %v468_v53, %v468_v53  ;;  %v746_v43 = vadd.f32 %v745_v38, %v468_v53 }
  0xd0   :  { %1333 = vst [vmem:[%s2060_s4 + $0x90] sm:$0xff] %v1218_v5  }
  0xd1   :  { %v880_v45 = vadd.f32 %v879_v39, %v817_v37 }
  0xd5   :  { %v1760_v12 = vpop.f32.mrf.mxu2 }
  0xd6   :  { %v470_v58 = vpop.f32.mrf.mxu0  ;;  %v1726_v59 = vpop.f32.mrf.mxu1 }
  0xd7   :  { %v1143_v60 = vpack.c.bf16 %v470_v58, %v468_v53  ;;  %v1183_v61 = vpack.c.bf16 %v1726_v59, %v1717_v54  ;;  %v1774_v19 = vpop.f32.mrf.mxu3  ;;  %v818_v40 = vmul.f32 %v470_v58, %v470_v58  ;;  %v747_v50 = vadd.f32 %v746_v43, %v470_v58 }
  0xd8   :  { %v1253_v21 = vpack.c.bf16 %v1774_v19, %v1762_v13 }
  0xd9   :  { %1318 = vst [vmem:[%s2060_s4 + $0x18] sm:$0xff] %v1143_v60   ;;  %v881_v14 = vadd.f32 %v880_v45, %v818_v40 }
  0xda   :  { %1326 = vst [vmem:[%s2060_s4 + $0x58] sm:$0xff] %v1183_v61  }
  0xdb   :  { %1340 = vst [vmem:[%s2060_s4 + $0xc8] sm:$0xff] %v1253_v21  }
  0xdd   :  { %v1772_v17 = vpop.f32.mrf.mxu2 }
  0xde   :  { %v473_v0 = vpop.f32.mrf.mxu0  ;;  %v1740_v1 = vpop.f32.mrf.mxu1  ;;  %v1223_v20 = vpack.c.bf16 %v1772_v17, %v1760_v12 }
  0xdf   :  { %v1792_v28 = vpop.f32.mrf.mxu3  ;;  %v819_v46 = vmul.f32 %v473_v0, %v473_v0  ;;  %v748_v5 = vadd.f32 %v747_v50, %v473_v0 }
  0xe0   :  { %1334 = vst [vmem:[%s2060_s4 + $0x98] sm:$0xff] %v1223_v20  }
  0xe1   :  { %v882_v48 = vadd.f32 %v881_v14, %v819_v46 }
  0xe5   :  { %v1790_v27 = vpop.f32.mrf.mxu2 }
  0xe6   :  { %v475_v8 = vpop.f32.mrf.mxu0  ;;  %v1756_v9 = vpop.f32.mrf.mxu1 }
  0xe7   :  { %v1148_v10 = vpack.c.bf16 %v475_v8, %v473_v0  ;;  %v1188_v11 = vpack.c.bf16 %v1756_v9, %v1740_v1  ;;  %v1804_v33 = vpop.f32.mrf.mxu3  ;;  %v820_v61 = vmul.f32 %v475_v8, %v475_v8  ;;  %v749_v58 = vadd.f32 %v748_v5, %v475_v8 }
  0xe8   :  { %v1258_v36 = vpack.c.bf16 %v1804_v33, %v1792_v28 }
  0xe9   :  { %1319 = vst [vmem:[%s2060_s4 + $0x20] sm:$0xff] %v1148_v10   ;;  %v883_v6 = vadd.f32 %v882_v48, %v820_v61 }
  0xea   :  { %1327 = vst [vmem:[%s2060_s4 + $0x60] sm:$0xff] %v1188_v11  }
  0xeb   :  { %1341 = vst [vmem:[%s2060_s4 + $0xd0] sm:$0xff] %v1258_v36  }
  0xed   :  { %v1802_v32 = vpop.f32.mrf.mxu2 }
  0xee   :  { %v478_v15 = vpop.f32.mrf.mxu0  ;;  %v1770_v16 = vpop.f32.mrf.mxu1  ;;  %v1228_v35 = vpack.c.bf16 %v1802_v32, %v1790_v27 }
  0xef   :  { %v1824_v42 = vpop.f32.mrf.mxu3  ;;  %v821_v53 = vmul.f32 %v478_v15, %v478_v15  ;;  %v750_v11 = vadd.f32 %v749_v58, %v478_v15 }
  0xf0   :  { %1335 = vst [vmem:[%s2060_s4 + $0xa0] sm:$0xff] %v1228_v35  }
  0xf1   :  { %v884_v20 = vadd.f32 %v883_v6, %v821_v53  ;;  %v828_v6 = vmul.f32 %v1654_v2, %v1654_v2 }
  0xf5   :  { %v1822_v60 = vpop.f32.mrf.mxu2 }
  0xf6   :  { %v480_v22 = vpop.f32.mrf.mxu0  ;;  %v1786_v23 = vpop.f32.mrf.mxu1 }
  0xf7   :  { %v1153_v24 = vpack.c.bf16 %v480_v22, %v478_v15  ;;  %v1193_v25 = vpack.c.bf16 %v1786_v23, %v1770_v16  ;;  %v822_v10 = vmul.f32 %v480_v22, %v480_v22  ;;  %v751_v0 = vadd.f32 %v750_v11, %v480_v22  ;;  %v1836_v35 = vpop.f32.mrf.mxu3 }
  0xf8   :  { %v1263_v8 = vpack.c.bf16 %v1836_v35, %v1824_v42 }
  0xf9   :  { %1320 = vst [vmem:[%s2060_s4 + $0x28] sm:$0xff] %v1153_v24   ;;  %v885_v36 = vadd.f32 %v884_v20, %v822_v10  ;;  %v829_v20 = vmul.f32 %v1671_v18, %v1671_v18 }
  0xfa   :  { %1328 = vst [vmem:[%s2060_s4 + $0x68] sm:$0xff] %v1193_v25  }
  0xfb   :  { %1342 = vst [vmem:[%s2060_s4 + $0xd8] sm:$0xff] %v1263_v8  }
  0xfd   :  { %v1834_v34 = vpop.f32.mrf.mxu2 }
  0xfe   :  { %v483_v29 = vpop.f32.mrf.mxu0  ;;  %v1800_v30 = vpop.f32.mrf.mxu1  ;;  %v1233_v38 = vpack.c.bf16 %v1834_v34, %v1822_v60 }
  0xff   :  { %v823_v21 = vmul.f32 %v483_v29, %v483_v29  ;;  %v752_v39 = vadd.f32 %v751_v0, %v483_v29  ;;  %v1854_v48 = vpop.f32.mrf.mxu3 }
 0x100   :  { %1336 = vst [vmem:[%s2060_s4 + $0xa8] sm:$0xff] %v1233_v38  }
 0x101   :  { %v886_v15 = vadd.f32 %v885_v36, %v823_v21 }
 0x105   :  { %v1852_v5 = vpop.f32.mrf.mxu2 }
 0x106   :  { %v485_v47 = vpop.f32.mrf.mxu0  ;;  %v1818_v7 = vpop.f32.mrf.mxu1 }
 0x107   :  { %v1158_v51 = vpack.c.bf16 %v485_v47, %v483_v29  ;;  %v1198_v56 = vpack.c.bf16 %v1818_v7, %v1800_v30  ;;  %v824_v37 = vmul.f32 %v485_v47, %v485_v47  ;;  %v753_v22 = vadd.f32 %v752_v39, %v485_v47  ;;  %v1876_v38 = vpop.f32.mrf.mxu3 }
 0x108   :  { %v827_v47 = vmul.f32 %v1652_v57, %v1652_v57  ;;  %v1268_v8 = vpack.c.bf16 %v1876_v38, %v1854_v48 }
 0x109   :  { %1321 = vst [vmem:[%s2060_s4 + $0x30] sm:$0xff] %v1158_v51   ;;  %v887_v43 = vadd.f32 %v886_v15, %v824_v37 }
 0x10a   :  { %1329 = vst [vmem:[%s2060_s4 + $0x70] sm:$0xff] %v1198_v56  }
 0x10b   :  { %1343 = vst [vmem:[%s2060_s4 + $0xe0] sm:$0xff] %v1268_v8   ;;  %v840_v8 = vmul.f32 %v1818_v7, %v1818_v7 }
 0x10d   :  { %v1874_v37 = vpop.f32.mrf.mxu2 }
 0x10e   :  { %v488_v24 = vpop.f32.mrf.mxu0  ;;  %v1832_v25 = vpop.f32.mrf.mxu1 }
 0x10f   :  { %v825_v40 = vmul.f32 %v488_v24, %v488_v24  ;;  %v754_v45 = vadd.f32 %v753_v22, %v488_v24 }
 0x111   :  { %v888_v46 = vadd.f32 %v887_v43, %v825_v40  ;;  %v833_v43 = vmul.f32 %v1717_v54, %v1717_v54 }
 0x116   :  { %v490_v50 = vpop.f32.mrf.mxu0  ;;  %v1848_v51 = vpop.f32.mrf.mxu1 }
 0x117   :  { %v1163_v56 = vpack.c.bf16 %v490_v50, %v488_v24  ;;  %v755_v14 = vadd.f32 %v754_v45, %v490_v50  ;;  %v826_v29 = vmul.f32 %v490_v50, %v490_v50  ;;  %v1203_v61 = vpack.c.bf16 %v1848_v51, %v1832_v25 }
 0x119   :  { %1322 = vst [vmem:[%s2060_s4 + $0x38] sm:$0xff] %v1163_v56   ;;  %v756_v53 = vadd.f32 %v755_v14, %v1652_v57  ;;  %v889_v58 = vadd.f32 %v888_v46, %v826_v29  ;;  %v830_v57 = vmul.f32 %v1673_v26, %v1673_v26  ;;  %v834_v46 = vmul.f32 %v1726_v59, %v1726_v59  ;;  %v1900_v14 = vpop.f32.mrf.mxu2 }
 0x11a   :  { %1330 = vst [vmem:[%s2060_s4 + $0x78] sm:$0xff] %v1203_v61   ;;  %v835_v29 = vmul.f32 %v1740_v1, %v1740_v1 }
 0x11b   :  { %v757_v10 = vadd.f32 %v756_v53, %v1654_v2  ;;  %v890_v11 = vadd.f32 %v889_v58, %v827_v47  ;;  %v1238_v2 = vpack.c.bf16 %v1874_v37, %v1852_v5  ;;  %v836_v53 = vmul.f32 %v1756_v9, %v1756_v9 }
 0x11d   :  { %v758_v21 = vadd.f32 %v757_v10, %v1671_v18  ;;  %v891_v24 = vadd.f32 %v890_v11, %v828_v6  ;;  %v831_v18 = vmul.f32 %v1692_v41, %v1692_v41  ;;  %1337 = vst [vmem:[%s2060_s4 + $0xb0] sm:$0xff] %v1238_v2   ;;  %v838_v11 = vmul.f32 %v1786_v23, %v1786_v23 }
 0x11f   :  { %v759_v0 = vadd.f32 %v758_v21, %v1673_v26  ;;  %v892_v36 = vadd.f32 %v891_v24, %v829_v20  ;;  %v832_v26 = vmul.f32 %v1705_v49, %v1705_v49 }
 0x121   :  { %v760_v39 = vadd.f32 %v759_v0, %v1692_v41  ;;  %v893_v15 = vadd.f32 %v892_v36, %v830_v57 }
 0x123   :  { %v761_v40 = vadd.f32 %v760_v39, %v1705_v49  ;;  %v894_v22 = vadd.f32 %v893_v15, %v831_v18  ;;  %v1902_v49 = vpop.f32.mrf.mxu3 }
 0x125   :  { %v895_v45 = vadd.f32 %v894_v22, %v832_v26  ;;  %v762_v41 = vadd.f32 %v761_v40, %v1717_v54  ;;  %v842_v40 = vmul.f32 %v1848_v51, %v1848_v51 }
 0x127   :  { %v763_v50 = vadd.f32 %v762_v41, %v1726_v59  ;;  %v896_v56 = vadd.f32 %v895_v45, %v833_v43  ;;  %v837_v59 = vmul.f32 %v1770_v16, %v1770_v16  ;;  %v844_v41 = vmul.f32 %v1696_v44, %v1696_v44 }
 0x129   :  { %v764_v61 = vadd.f32 %v763_v50, %v1740_v1  ;;  %v897_v47 = vadd.f32 %v896_v56, %v834_v46  ;;  %v1916_v1 = vpop.f32.mrf.mxu2  ;;  %v845_v50 = vmul.f32 %v1709_v52, %v1709_v52 }
 0x12b   :  { %v765_v54 = vadd.f32 %v764_v61, %v1756_v9  ;;  %v898_v58 = vadd.f32 %v897_v47, %v835_v29  ;;  %v1918_v24 = vpop.f32.mrf.mxu3  ;;  %v1243_v9 = vpack.c.bf16 %v1916_v1, %v1900_v14  ;;  %v846_v29 = vmul.f32 %v1719_v55, %v1719_v55 }
 0x12c   :  { %v1273_v57 = vpack.c.bf16 %v1918_v24, %v1902_v49 }
 0x12d   :  { %v766_v6 = vadd.f32 %v765_v54, %v1770_v16  ;;  %v899_v10 = vadd.f32 %v898_v58, %v836_v53  ;;  %v839_v16 = vmul.f32 %v1800_v30, %v1800_v30  ;;  %1338 = vst [vmem:[%s2060_s4 + $0xb8] sm:$0xff] %v1243_v9  }
 0x12e   :  { %1344 = vst [vmem:[%s2060_s4 + $0xe8] sm:$0xff] %v1273_v57   ;;  %v851_v57 = vmul.f32 %v1790_v27, %v1790_v27 }
 0x12f   :  { %v767_v20 = vadd.f32 %v766_v6, %v1786_v23  ;;  %v900_v21 = vadd.f32 %v899_v10, %v837_v59  ;;  %v849_v6 = vmul.f32 %v1760_v12, %v1760_v12 }
 0x131   :  { %v768_v0 = vadd.f32 %v767_v20, %v1800_v30  ;;  %v901_v36 = vadd.f32 %v900_v21, %v838_v11  ;;  %v841_v30 = vmul.f32 %v1832_v25, %v1832_v25 }
 0x133   :  { %v902_v23 = vadd.f32 %v901_v36, %v839_v16  ;;  %v769_v2 = vadd.f32 %v768_v0, %v1818_v7  ;;  %v1942_v22 = vpop.f32.mrf.mxu3  ;;  %v843_v7 = vmul.f32 %v1677_v31, %v1677_v31  ;;  %v852_v16 = vmul.f32 %v1802_v32, %v1802_v32 }
 0x135   :  { %v903_v18 = vadd.f32 %v902_v23, %v840_v8  ;;  %v770_v39 = vadd.f32 %v769_v2, %v1832_v25  ;;  %v853_v23 = vmul.f32 %v1822_v60, %v1822_v60 }
 0x137   :  { %v904_v15 = vadd.f32 %v903_v18, %v841_v30  ;;  %v771_v26 = vadd.f32 %v770_v39, %v1848_v51  ;;  %v854_v18 = vmul.f32 %v1834_v34, %v1834_v34 }
 0x139   :  { %v772_v43 = vadd.f32 %v771_v26, %v1677_v31  ;;  %v905_v45 = vadd.f32 %v904_v15, %v842_v40 }
 0x13b   :  { %v773_v46 = vadd.f32 %v772_v43, %v1696_v44  ;;  %v906_v25 = vadd.f32 %v905_v45, %v843_v7  ;;  %v1956_v31 = vpop.f32.mrf.mxu3  ;;  %v847_v44 = vmul.f32 %v1730_v62, %v1730_v62  ;;  %v857_v45 = vmul.f32 %v1900_v14, %v1900_v14 }
 0x13c   :  { %v1278_v53 = vpack.c.bf16 %v1956_v31, %v1942_v22 }
 0x13d   :  { %v774_v56 = vadd.f32 %v773_v46, %v1709_v52  ;;  %v907_v51 = vadd.f32 %v906_v25, %v844_v41  ;;  %v848_v52 = vmul.f32 %v1742_v3, %v1742_v3  ;;  %v859_v25 = vmul.f32 %v1732_v63, %v1732_v63 }
 0x13e   :  { %1345 = vst [vmem:[%s2060_s4 + $0xf0] sm:$0xff] %v1278_v53  }
 0x13f   :  { %v775_v61 = vadd.f32 %v774_v56, %v1719_v55  ;;  %v908_v47 = vadd.f32 %v907_v51, %v845_v50 }
 0x141   :  { %v776_v54 = vadd.f32 %v775_v61, %v1730_v62  ;;  %v909_v58 = vadd.f32 %v908_v47, %v846_v29  ;;  %v850_v62 = vmul.f32 %v1772_v17, %v1772_v17 }
 0x143   :  { %v777_v55 = vadd.f32 %v776_v54, %v1742_v3  ;;  %v910_v59 = vadd.f32 %v909_v58, %v847_v44  ;;  %v1975_v9 = vpop.f32.mrf.mxu3 }
 0x145   :  { %v911_v10 = vadd.f32 %v910_v59, %v848_v52  ;;  %v778_v11 = vadd.f32 %v777_v55, %v1760_v12 }
 0x147   :  { %v779_v20 = vadd.f32 %v778_v11, %v1772_v17  ;;  %v912_v21 = vadd.f32 %v911_v10, %v849_v6 }
 0x149   :  { %v780_v3 = vadd.f32 %v779_v20, %v1790_v27  ;;  %v913_v0 = vadd.f32 %v912_v21, %v850_v62 }
 0x14b   :  { %v781_v36 = vadd.f32 %v780_v3, %v1802_v32  ;;  %v914_v12 = vadd.f32 %v913_v0, %v851_v57  ;;  %v610_v27 = vpop.f32.mrf.mxu3  ;;  %v855_v32 = vmul.f32 %v1852_v5, %v1852_v5 }
 0x14c   :  { %v1283_v30 = vpack.c.bf16 %v610_v27, %v1975_v9 }
 0x14d   :  { %v782_v17 = vadd.f32 %v781_v36, %v1822_v60  ;;  %v915_v2 = vadd.f32 %v914_v12, %v852_v16  ;;  %v870_v16 = vmul.f32 %v1918_v24, %v1918_v24 }
 0x14e   :  { %1346 = vst [vmem:[%s2060_s4 + $0xf8] sm:$0xff] %v1283_v30   ;;  %v874_v30 = vmul.f32 %v610_v27, %v610_v27 }
 0x14f   :  { %v783_v8 = vadd.f32 %v782_v17, %v1834_v34  ;;  %v916_v39 = vadd.f32 %v915_v2, %v853_v23  ;;  %v856_v34 = vmul.f32 %v1874_v37, %v1874_v37  ;;  %v871_v23 = vmul.f32 %v1942_v22, %v1942_v22 }
 0x150   :  { %v872_v2 = vmul.f32 %v1956_v31, %v1956_v31 }
 0x151   :  { %v917_v15 = vadd.f32 %v916_v39, %v854_v18  ;;  %v784_v26 = vadd.f32 %v783_v8, %v1852_v5  ;;  %v858_v5 = vmul.f32 %v1916_v1, %v1916_v1  ;;  %v873_v18 = vmul.f32 %v1975_v9, %v1975_v9 }
 0x153   :  { %v918_v60 = vadd.f32 %v917_v15, %v855_v32  ;;  %v785_v40 = vadd.f32 %v784_v26, %v1874_v37  ;;  %v860_v37 = vmul.f32 %v1744_v4, %v1744_v4 }
 0x155   :  { %v919_v7 = vadd.f32 %v918_v60, %v856_v34  ;;  %v786_v43 = vadd.f32 %v785_v40, %v1900_v14  ;;  %v861_v14 = vmul.f32 %v1762_v13, %v1762_v13 }
 0x157   :  { %v920_v41 = vadd.f32 %v919_v7, %v857_v45  ;;  %v787_v46 = vadd.f32 %v786_v43, %v1916_v1  ;;  %v862_v1 = vmul.f32 %v1774_v19, %v1774_v19 }
 0x159   :  { %v788_v50 = vadd.f32 %v787_v46, %v1732_v63  ;;  %v921_v56 = vadd.f32 %v920_v41, %v858_v5  ;;  %v863_v63 = vmul.f32 %v1792_v28, %v1792_v28 }
 0x15b   :  { %v789_v51 = vadd.f32 %v788_v50, %v1744_v4  ;;  %v922_v29 = vadd.f32 %v921_v56, %v859_v25  ;;  %v864_v4 = vmul.f32 %v1804_v33, %v1804_v33 }
 0x15d   :  { %v790_v61 = vadd.f32 %v789_v51, %v1762_v13  ;;  %v923_v47 = vadd.f32 %v922_v29, %v860_v37  ;;  %v865_v13 = vmul.f32 %v1824_v42, %v1824_v42 }
 0x15f   :  { %v791_v53 = vadd.f32 %v790_v61, %v1774_v19  ;;  %v924_v44 = vadd.f32 %v923_v47, %v861_v14  ;;  %v866_v19 = vmul.f32 %v1836_v35, %v1836_v35 }
 0x161   :  { %v792_v54 = vadd.f32 %v791_v53, %v1792_v28  ;;  %v925_v58 = vadd.f32 %v924_v44, %v862_v1  ;;  %v867_v28 = vmul.f32 %v1854_v48, %v1854_v48 }
 0x163   :  { %v793_v52 = vadd.f32 %v792_v54, %v1804_v33  ;;  %v926_v55 = vadd.f32 %v925_v58, %v863_v63  ;;  %v868_v33 = vmul.f32 %v1876_v38, %v1876_v38 }
 0x165   :  { %v927_v59 = vadd.f32 %v926_v55, %v864_v4  ;;  %v794_v6 = vadd.f32 %v793_v52, %v1824_v42  ;;  %v869_v42 = vmul.f32 %v1902_v49, %v1902_v49 }
 0x167   :  { %v795_v10 = vadd.f32 %v794_v6, %v1836_v35  ;;  %v928_v11 = vadd.f32 %v927_v59, %v865_v13 }
 0x169   :  { %v796_v62 = vadd.f32 %v795_v10, %v1854_v48  ;;  %v929_v20 = vadd.f32 %v928_v11, %v866_v19 }
 0x16b   :  { %v797_v21 = vadd.f32 %v796_v62, %v1876_v38  ;;  %v930_v57 = vadd.f32 %v929_v20, %v867_v28 }
 0x16d   :  { %v798_v3 = vadd.f32 %v797_v21, %v1902_v49  ;;  %v931_v0 = vadd.f32 %v930_v57, %v868_v33 }
 0x16f   :  { %v799_v35 = vadd.f32 %v798_v3, %v1918_v24  ;;  %v932_v36 = vadd.f32 %v931_v0, %v869_v42 }
 0x171   :  { %v933_v48 = vadd.f32 %v932_v36, %v870_v16  ;;  %v800_v12 = vadd.f32 %v799_v35, %v1942_v22 }
 0x173   :  { %v934_v38 = vadd.f32 %v933_v48, %v871_v23  ;;  %v801_v17 = vadd.f32 %v800_v12, %v1956_v31 }
 0x175   :  { %v935_v49 = vadd.f32 %v934_v38, %v872_v2  ;;  %v802_v8 = vadd.f32 %v801_v17, %v1975_v9 }
 0x177   :  { %v936_v24 = vadd.f32 %v935_v49, %v873_v18  ;;  %v803_v39 = vadd.f32 %v802_v8, %v610_v27 }
 0x179   :  { %v804_v15 = vrot.slane %v803_v39, 4  ;;  %v937_v26 = vadd.f32 %v936_v24, %v874_v30 }
 0x17b   :  { %v805_v32 = vadd.f32 %v804_v15, %v803_v39  ;;  %v938_v60 = vrot.slane %v937_v26, 4 }
 0x17d   :  { %v806_v22 = vrot.slane %v805_v32, 2  ;;  %v939_v40 = vadd.f32 %v938_v60, %v937_v26 }
 0x17f   :  { %v807_v34 = vadd.f32 %v806_v22, %v805_v32  ;;  %v940_v7 = vrot.slane %v939_v40, 2 }
 0x181   :  { %v808_v43 = vrot.slane %v807_v34, 1  ;;  %v941_v45 = vadd.f32 %v940_v7, %v939_v40 }
 0x183   :  { %v809_v31 = vadd.f32 %v808_v43, %v807_v34  ;;  %v942_v41 = vrot.slane %v941_v45, 1 }
 0x185   :  { %810 = vst [vmem:[%s2061_s5] sm:$0x1] %v809_v31  ;;  %v943_v9 = vadd.f32 %v942_v41, %v941_v45 }
 0x187   :  { %944 = vst [vmem:[%s2062_s6] sm:$0x1] %v943_v9 }

// kernel: identity_block_forward.7
= control target key start
LH: loop header
LB: loop body
LE: loop exit
PB: predicated region body
PF: predicated region fallthrough
CT: control target
= control target key end

     0   :  { %s1345_s0 = inlined_call_operand.vmem [shape: bf16[512,128], index: 0, kind: input, shape index: {}]   ;;  %s1346_s2 = inlined_call_operand.vmem [shape: f32[1,128], index: 2, kind: input, shape index: {}]   ;;  %s1347_s3 = inlined_call_operand.vmem [shape: f32[1,128], index: 3, kind: input, shape index: {}]   ;;  %s1348_s1 = inlined_call_operand.vmem [shape: f32[512,128], index: 1, kind: input, shape index: {}]   ;;  %s1349_s4 = inlined_call_operand.vmem [shape: f32[512,128], index: 4, kind: output, shape index: {}]  }
   0x1   :  { %v542_v0 = vld [vmem:[%s1345_s0] sm:$0xff]   ;;  %v669_v5 = vld [vmem:[%s1345_s0 + $0x8] sm:$0xff]   ;;  %v670_v10 = vld [vmem:[%s1345_s0 + $0x10] sm:$0xff]  }
   0x2   :  { %v733_v1 = vld [vmem:[%s1346_s2] ss:$0 sm:$0xff]  ;;  %v543_v2 = vunpack.c.l.bf16 %v542_v0  ;;  %v544_v4 = vunpack.c.h.bf16 %v542_v0  ;;  %v547_v8 = vunpack.c.l.bf16 %v669_v5  ;;  %v548_v9 = vunpack.c.h.bf16 %v669_v5  ;;  %v282_v12 = vld [vmem:[%s1348_s1 + $0x8] sm:$0xff]  ;;  %v671_v15 = vld [vmem:[%s1345_s0 + $0x18] sm:$0xff]  }
   0x3   :  { %v738_v3 = vld [vmem:[%s1347_s3] ss:$0 sm:$0xff]  ;;  %v551_v13 = vunpack.c.l.bf16 %v670_v10  ;;  %v552_v14 = vunpack.c.h.bf16 %v670_v10  ;;  %v283_v20 = vld [vmem:[%s1348_s1 + $0x10] sm:$0xff]  ;;  %v284_v21 = vld [vmem:[%s1348_s1 + $0x18] sm:$0xff]  ;;  %v555_v24 = vunpack.c.l.bf16 %v671_v15  ;;  %v556_v25 = vunpack.c.h.bf16 %v671_v15 }
   0x4   :  { %v149_v6 = vmul.f32 %v733_v1, %v543_v2  ;;  %v150_v7 = vmul.f32 %v733_v1, %v544_v4  ;;  %v281_v11 = vld [vmem:[%s1348_s1] sm:$0xff]  ;;  %v151_v18 = vmul.f32 %v733_v1, %v547_v8  ;;  %v152_v19 = vmul.f32 %v733_v1, %v548_v9  ;;  %v286_v31 = vld [vmem:[%s1348_s1 + $0x28] sm:$0xff]  ;;  %v287_v41 = vld [vmem:[%s1348_s1 + $0x30] sm:$0xff] }
   0x5   :  { %v153_v22 = vmul.f32 %v733_v1, %v551_v13  ;;  %v154_v23 = vmul.f32 %v733_v1, %v552_v14  ;;  %v285_v30 = vld [vmem:[%s1348_s1 + $0x20] sm:$0xff]  ;;  %v155_v34 = vmul.f32 %v733_v1, %v555_v24  ;;  %v156_v35 = vmul.f32 %v733_v1, %v556_v25  ;;  %v288_v42 = vld [vmem:[%s1348_s1 + $0x38] sm:$0xff]  ;;  %v673_v47 = vld [vmem:[%s1345_s0 + $0x28] sm:$0xff]  }
   0x6   :  { %v217_v16 = vadd.f32 %v738_v3, %v149_v6  ;;  %v218_v17 = vadd.f32 %v738_v3, %v150_v7  ;;  %v219_v28 = vadd.f32 %v738_v3, %v151_v18  ;;  %v220_v29 = vadd.f32 %v738_v3, %v152_v19  ;;  %v672_v36 = vld [vmem:[%s1345_s0 + $0x20] sm:$0xff]   ;;  %v674_v52 = vld [vmem:[%s1345_s0 + $0x30] sm:$0xff]   ;;  %v675_v61 = vld [vmem:[%s1345_s0 + $0x38] sm:$0xff]  }
   0x7   :  { %v221_v32 = vadd.f32 %v738_v3, %v153_v22  ;;  %v222_v33 = vadd.f32 %v738_v3, %v154_v23  ;;  %v223_v45 = vadd.f32 %v738_v3, %v155_v34  ;;  %v224_v46 = vadd.f32 %v738_v3, %v156_v35  ;;  %v289_v0 = vld [vmem:[%s1348_s1 + $0x40] sm:$0xff]  ;;  %v290_v2 = vld [vmem:[%s1348_s1 + $0x48] sm:$0xff]  ;;  %v291_v10 = vld [vmem:[%s1348_s1 + $0x50] sm:$0xff] }
   0x8   :  { %v345_v26 = vadd.f32 %v281_v11, %v217_v16  ;;  %v346_v27 = vadd.f32 %v282_v12, %v218_v17  ;;  %v347_v39 = vadd.f32 %v283_v20, %v219_v28  ;;  %v348_v40 = vadd.f32 %v284_v21, %v220_v29  ;;  %v292_v11 = vld [vmem:[%s1348_s1 + $0x58] sm:$0xff]  ;;  %v293_v20 = vld [vmem:[%s1348_s1 + $0x60] sm:$0xff]  ;;  %v294_v21 = vld [vmem:[%s1348_s1 + $0x68] sm:$0xff] }
   0x9   :  { %v349_v43 = vadd.f32 %v285_v30, %v221_v32  ;;  %v350_v44 = vadd.f32 %v286_v31, %v222_v33  ;;  %v559_v50 = vunpack.c.l.bf16 %v672_v36  ;;  %v560_v51 = vunpack.c.h.bf16 %v672_v36  ;;  %v295_v31 = vld [vmem:[%s1348_s1 + $0x70] sm:$0xff]  ;;  %v296_v32 = vld [vmem:[%s1348_s1 + $0x78] sm:$0xff] }
   0xa   :  { %v409_v37 = vmax.f32 %v345_v26, 0.0  ;;  %v410_v38 = vmax.f32 %v346_v27, 0.0  ;;  %v411_v48 = vmax.f32 %v347_v39, 0.0  ;;  %v412_v49 = vmax.f32 %v348_v40, 0.0  ;;  %v676_v26 = vld [vmem:[%s1345_s0 + $0x40] sm:$0xff]  }
   0xb   :  { %v413_v53 = vmax.f32 %v349_v43, 0.0  ;;  %v414_v54 = vmax.f32 %v350_v44, 0.0  ;;  %v351_v55 = vadd.f32 %v287_v41, %v223_v45  ;;  %v352_v56 = vadd.f32 %v288_v42, %v224_v46  ;;  %v678_v42 = vld [vmem:[%s1345_s0 + $0x50] sm:$0xff]  }
   0xc   :  { %473 = vst [vmem:[%s1349_s4] sm:$0xff] %v409_v37  ;;  %v157_v57 = vmul.f32 %v733_v1, %v559_v50  ;;  %v158_v58 = vmul.f32 %v733_v1, %v560_v51  ;;  %v563_v59 = vunpack.c.l.bf16 %v673_v47  ;;  %v564_v60 = vunpack.c.h.bf16 %v673_v47  ;;  %v677_v37 = vld [vmem:[%s1345_s0 + $0x48] sm:$0xff]   ;;  %v679_v51 = vld [vmem:[%s1345_s0 + $0x58] sm:$0xff]  }
   0xd   :  { %474 = vst [vmem:[%s1349_s4 + $0x8] sm:$0xff] %v410_v38  ;;  %v415_v62 = vmax.f32 %v351_v55, 0.0  ;;  %v416_v63 = vmax.f32 %v352_v56, 0.0  ;;  %v567_v4 = vunpack.c.l.bf16 %v674_v52  ;;  %v568_v5 = vunpack.c.h.bf16 %v674_v52  ;;  %v298_v55 = vld [vmem:[%s1348_s1 + $0x88] sm:$0xff] }
   0xe   :  { %475 = vst [vmem:[%s1349_s4 + $0x10] sm:$0xff] %v411_v48  ;;  %v225_v6 = vadd.f32 %v738_v3, %v157_v57  ;;  %v226_v7 = vadd.f32 %v738_v3, %v158_v58  ;;  %v159_v8 = vmul.f32 %v733_v1, %v563_v59  ;;  %v160_v9 = vmul.f32 %v733_v1, %v564_v60 }
   0xf   :  { %476 = vst [vmem:[%s1349_s4 + $0x18] sm:$0xff] %v412_v49  ;;  %v161_v12 = vmul.f32 %v733_v1, %v567_v4  ;;  %v162_v13 = vmul.f32 %v733_v1, %v568_v5  ;;  %v571_v14 = vunpack.c.l.bf16 %v675_v61  ;;  %v572_v15 = vunpack.c.h.bf16 %v675_v61 }
  0x10   :  { %477 = vst [vmem:[%s1349_s4 + $0x20] sm:$0xff] %v413_v53  ;;  %v353_v16 = vadd.f32 %v289_v0, %v225_v6  ;;  %v354_v17 = vadd.f32 %v290_v2, %v226_v7  ;;  %v227_v18 = vadd.f32 %v738_v3, %v159_v8  ;;  %v228_v19 = vadd.f32 %v738_v3, %v160_v9 }
  0x11   :  { %478 = vst [vmem:[%s1349_s4 + $0x28] sm:$0xff] %v414_v54  ;;  %v229_v22 = vadd.f32 %v738_v3, %v161_v12  ;;  %v230_v23 = vadd.f32 %v738_v3, %v162_v13  ;;  %v163_v24 = vmul.f32 %v733_v1, %v571_v14  ;;  %v164_v25 = vmul.f32 %v733_v1, %v572_v15  ;;  %v297_v54 = vld [vmem:[%s1348_s1 + $0x80] sm:$0xff] }
  0x12   :  { %479 = vst [vmem:[%s1349_s4 + $0x30] sm:$0xff] %v415_v62  ;;  %v417_v27 = vmax.f32 %v353_v16, 0.0  ;;  %v418_v28 = vmax.f32 %v354_v17, 0.0  ;;  %v355_v29 = vadd.f32 %v291_v10, %v227_v18  ;;  %v356_v30 = vadd.f32 %v292_v11, %v228_v19  ;;  %v299_v62 = vld [vmem:[%s1348_s1 + $0x90] sm:$0xff]  ;;  %v301_v10 = vld [vmem:[%s1348_s1 + $0xa0] sm:$0xff]  ;;  %v302_v11 = vld [vmem:[%s1348_s1 + $0xa8] sm:$0xff] }
  0x13   :  { %480 = vst [vmem:[%s1349_s4 + $0x38] sm:$0xff] %v416_v63  ;;  %v357_v33 = vadd.f32 %v293_v20, %v229_v22  ;;  %v358_v34 = vadd.f32 %v294_v21, %v230_v23  ;;  %v231_v35 = vadd.f32 %v738_v3, %v163_v24  ;;  %v232_v36 = vadd.f32 %v738_v3, %v164_v25  ;;  %v300_v63 = vld [vmem:[%s1348_s1 + $0x98] sm:$0xff]  ;;  %v680_v16 = vld [vmem:[%s1345_s0 + $0x60] sm:$0xff]   ;;  %v303_v21 = vld [vmem:[%s1348_s1 + $0xb0] sm:$0xff] }
  0x14   :  { %481 = vst [vmem:[%s1349_s4 + $0x40] sm:$0xff] %v417_v27  ;;  %v419_v38 = vmax.f32 %v355_v29, 0.0  ;;  %v420_v39 = vmax.f32 %v356_v30, 0.0  ;;  %v575_v40 = vunpack.c.l.bf16 %v676_v26  ;;  %v576_v41 = vunpack.c.h.bf16 %v676_v26  ;;  %v304_v22 = vld [vmem:[%s1348_s1 + $0xb8] sm:$0xff]  ;;  %v681_v27 = vld [vmem:[%s1345_s0 + $0x68] sm:$0xff]  }
  0x15   :  { %482 = vst [vmem:[%s1349_s4 + $0x48] sm:$0xff] %v418_v28  ;;  %v421_v43 = vmax.f32 %v357_v33, 0.0  ;;  %v422_v44 = vmax.f32 %v358_v34, 0.0  ;;  %v359_v45 = vadd.f32 %v295_v31, %v231_v35  ;;  %v360_v46 = vadd.f32 %v296_v32, %v232_v36  ;;  %v682_v32 = vld [vmem:[%s1345_s0 + $0x70] sm:$0xff]  }
  0x16   :  { %483 = vst [vmem:[%s1349_s4 + $0x50] sm:$0xff] %v419_v38  ;;  %v165_v47 = vmul.f32 %v733_v1, %v575_v40  ;;  %v166_v48 = vmul.f32 %v733_v1, %v576_v41  ;;  %v579_v49 = vunpack.c.l.bf16 %v677_v37  ;;  %v580_v50 = vunpack.c.h.bf16 %v677_v37  ;;  %v683_v41 = vld [vmem:[%s1345_s0 + $0x78] sm:$0xff]  }
  0x17   :  { %484 = vst [vmem:[%s1349_s4 + $0x58] sm:$0xff] %v420_v39  ;;  %v423_v52 = vmax.f32 %v359_v45, 0.0  ;;  %v424_v53 = vmax.f32 %v360_v46, 0.0  ;;  %v583_v56 = vunpack.c.l.bf16 %v678_v42  ;;  %v584_v57 = vunpack.c.h.bf16 %v678_v42  ;;  %v306_v45 = vld [vmem:[%s1348_s1 + $0xc8] sm:$0xff] }
  0x18   :  { %485 = vst [vmem:[%s1349_s4 + $0x60] sm:$0xff] %v421_v43  ;;  %v233_v58 = vadd.f32 %v738_v3, %v165_v47  ;;  %v234_v59 = vadd.f32 %v738_v3, %v166_v48  ;;  %v167_v60 = vmul.f32 %v733_v1, %v579_v49  ;;  %v168_v61 = vmul.f32 %v733_v1, %v580_v50 }
  0x19   :  { %486 = vst [vmem:[%s1349_s4 + $0x68] sm:$0xff] %v422_v44  ;;  %v169_v0 = vmul.f32 %v733_v1, %v583_v56  ;;  %v170_v2 = vmul.f32 %v733_v1, %v584_v57  ;;  %v587_v4 = vunpack.c.l.bf16 %v679_v51  ;;  %v588_v5 = vunpack.c.h.bf16 %v679_v51  ;;  %v305_v44 = vld [vmem:[%s1348_s1 + $0xc0] sm:$0xff] }
  0x1a   :  { %487 = vst [vmem:[%s1349_s4 + $0x70] sm:$0xff] %v423_v52  ;;  %v361_v6 = vadd.f32 %v297_v54, %v233_v58  ;;  %v362_v7 = vadd.f32 %v298_v55, %v234_v59  ;;  %v235_v8 = vadd.f32 %v738_v3, %v167_v60  ;;  %v236_v9 = vadd.f32 %v738_v3, %v168_v61  ;;  %v307_v52 = vld [vmem:[%s1348_s1 + $0xd0] sm:$0xff] }
  0x1b   :  { %488 = vst [vmem:[%s1349_s4 + $0x78] sm:$0xff] %v424_v53  ;;  %v237_v12 = vadd.f32 %v738_v3, %v169_v0  ;;  %v238_v13 = vadd.f32 %v738_v3, %v170_v2  ;;  %v171_v14 = vmul.f32 %v733_v1, %v587_v4  ;;  %v172_v15 = vmul.f32 %v733_v1, %v588_v5  ;;  %v308_v53 = vld [vmem:[%s1348_s1 + $0xd8] sm:$0xff] }
  0x1c   :  { %v425_v17 = vmax.f32 %v361_v6, 0.0  ;;  %v426_v18 = vmax.f32 %v362_v7, 0.0  ;;  %v363_v19 = vadd.f32 %v299_v62, %v235_v8  ;;  %v364_v20 = vadd.f32 %v300_v63, %v236_v9  ;;  %v309_v62 = vld [vmem:[%s1348_s1 + $0xe0] sm:$0xff]  ;;  %v310_v63 = vld [vmem:[%s1348_s1 + $0xe8] sm:$0xff] }
  0x1d   :  { %v365_v23 = vadd.f32 %v301_v10, %v237_v12  ;;  %v366_v24 = vadd.f32 %v302_v11, %v238_v13  ;;  %v239_v25 = vadd.f32 %v738_v3, %v171_v14  ;;  %v240_v26 = vadd.f32 %v738_v3, %v172_v15  ;;  %v684_v6 = vld [vmem:[%s1345_s0 + $0x80] sm:$0xff]   ;;  %v311_v11 = vld [vmem:[%s1348_s1 + $0xf0] sm:$0xff]  ;;  %v312_v12 = vld [vmem:[%s1348_s1 + $0xf8] sm:$0xff] }
  0x1e   :  { %489 = vst [vmem:[%s1349_s4 + $0x80] sm:$0xff] %v425_v17  ;;  %v427_v28 = vmax.f32 %v363_v19, 0.0  ;;  %v428_v29 = vmax.f32 %v364_v20, 0.0  ;;  %v591_v30 = vunpack.c.l.bf16 %v680_v16  ;;  %v592_v31 = vunpack.c.h.bf16 %v680_v16  ;;  %v685_v17 = vld [vmem:[%s1345_s0 + $0x88] sm:$0xff]  }
  0x1f   :  { %490 = vst [vmem:[%s1349_s4 + $0x88] sm:$0xff] %v426_v18  ;;  %v429_v33 = vmax.f32 %v365_v23, 0.0  ;;  %v430_v34 = vmax.f32 %v366_v24, 0.0  ;;  %v367_v35 = vadd.f32 %v303_v21, %v239_v25  ;;  %v368_v36 = vadd.f32 %v304_v22, %v240_v26  ;;  %v686_v22 = vld [vmem:[%s1345_s0 + $0x90] sm:$0xff]  }
  0x20   :  { %491 = vst [vmem:[%s1349_s4 + $0x90] sm:$0xff] %v427_v28  ;;  %v173_v37 = vmul.f32 %v733_v1, %v591_v30  ;;  %v174_v38 = vmul.f32 %v733_v1, %v592_v31  ;;  %v595_v39 = vunpack.c.l.bf16 %v681_v27  ;;  %v596_v40 = vunpack.c.h.bf16 %v681_v27  ;;  %v687_v31 = vld [vmem:[%s1345_s0 + $0x98] sm:$0xff]  }
  0x21   :  { %492 = vst [vmem:[%s1349_s4 + $0x98] sm:$0xff] %v428_v29  ;;  %v431_v42 = vmax.f32 %v367_v35, 0.0  ;;  %v432_v43 = vmax.f32 %v368_v36, 0.0  ;;  %v599_v46 = vunpack.c.l.bf16 %v682_v32  ;;  %v600_v47 = vunpack.c.h.bf16 %v682_v32  ;;  %v314_v35 = vld [vmem:[%s1348_s1 + $0x108] sm:$0xff] }
  0x22   :  { %493 = vst [vmem:[%s1349_s4 + $0xa0] sm:$0xff] %v429_v33  ;;  %v241_v48 = vadd.f32 %v738_v3, %v173_v37  ;;  %v242_v49 = vadd.f32 %v738_v3, %v174_v38  ;;  %v175_v50 = vmul.f32 %v733_v1, %v595_v39  ;;  %v176_v51 = vmul.f32 %v733_v1, %v596_v40 }
  0x23   :  { %494 = vst [vmem:[%s1349_s4 + $0xa8] sm:$0xff] %v430_v34  ;;  %v177_v54 = vmul.f32 %v733_v1, %v599_v46  ;;  %v178_v55 = vmul.f32 %v733_v1, %v600_v47  ;;  %v603_v56 = vunpack.c.l.bf16 %v683_v41  ;;  %v604_v57 = vunpack.c.h.bf16 %v683_v41  ;;  %v313_v34 = vld [vmem:[%s1348_s1 + $0x100] sm:$0xff] }
  0x24   :  { %495 = vst [vmem:[%s1349_s4 + $0xb0] sm:$0xff] %v431_v42  ;;  %v369_v58 = vadd.f32 %v305_v44, %v241_v48  ;;  %v370_v59 = vadd.f32 %v306_v45, %v242_v49  ;;  %v243_v60 = vadd.f32 %v738_v3, %v175_v50  ;;  %v244_v61 = vadd.f32 %v738_v3, %v176_v51  ;;  %v315_v42 = vld [vmem:[%s1348_s1 + $0x110] sm:$0xff] }
  0x25   :  { %496 = vst [vmem:[%s1349_s4 + $0xb8] sm:$0xff] %v432_v43  ;;  %v245_v0 = vadd.f32 %v738_v3, %v177_v54  ;;  %v246_v2 = vadd.f32 %v738_v3, %v178_v55  ;;  %v179_v4 = vmul.f32 %v733_v1, %v603_v56  ;;  %v180_v5 = vmul.f32 %v733_v1, %v604_v57  ;;  %v316_v43 = vld [vmem:[%s1348_s1 + $0x118] sm:$0xff] }
  0x26   :  { %v433_v7 = vmax.f32 %v369_v58, 0.0  ;;  %v434_v8 = vmax.f32 %v370_v59, 0.0  ;;  %v371_v9 = vadd.f32 %v307_v52, %v243_v60  ;;  %v372_v10 = vadd.f32 %v308_v53, %v244_v61  ;;  %v317_v52 = vld [vmem:[%s1348_s1 + $0x120] sm:$0xff]  ;;  %v318_v53 = vld [vmem:[%s1348_s1 + $0x128] sm:$0xff] }
  0x27   :  { %v373_v13 = vadd.f32 %v309_v62, %v245_v0  ;;  %v374_v14 = vadd.f32 %v310_v63, %v246_v2  ;;  %v247_v15 = vadd.f32 %v738_v3, %v179_v4  ;;  %v248_v16 = vadd.f32 %v738_v3, %v180_v5  ;;  %v688_v58 = vld [vmem:[%s1345_s0 + $0xa0] sm:$0xff]   ;;  %v319_v63 = vld [vmem:[%s1348_s1 + $0x130] sm:$0xff]  ;;  %v320_v0 = vld [vmem:[%s1348_s1 + $0x138] sm:$0xff] }
  0x28   :  { %497 = vst [vmem:[%s1349_s4 + $0xc0] sm:$0xff] %v433_v7  ;;  %v435_v18 = vmax.f32 %v371_v9, 0.0  ;;  %v436_v19 = vmax.f32 %v372_v10, 0.0  ;;  %v607_v20 = vunpack.c.l.bf16 %v684_v6  ;;  %v608_v21 = vunpack.c.h.bf16 %v684_v6  ;;  %v689_v7 = vld [vmem:[%s1345_s0 + $0xa8] sm:$0xff]  }
  0x29   :  { %498 = vst [vmem:[%s1349_s4 + $0xc8] sm:$0xff] %v434_v8  ;;  %v437_v23 = vmax.f32 %v373_v13, 0.0  ;;  %v438_v24 = vmax.f32 %v374_v14, 0.0  ;;  %v375_v25 = vadd.f32 %v311_v11, %v247_v15  ;;  %v376_v26 = vadd.f32 %v312_v12, %v248_v16  ;;  %v690_v12 = vld [vmem:[%s1345_s0 + $0xb0] sm:$0xff]  }
  0x2a   :  { %499 = vst [vmem:[%s1349_s4 + $0xd0] sm:$0xff] %v435_v18  ;;  %v181_v27 = vmul.f32 %v733_v1, %v607_v20  ;;  %v182_v28 = vmul.f32 %v733_v1, %v608_v21  ;;  %v611_v29 = vunpack.c.l.bf16 %v685_v17  ;;  %v612_v30 = vunpack.c.h.bf16 %v685_v17  ;;  %v691_v21 = vld [vmem:[%s1345_s0 + $0xb8] sm:$0xff]  }
  0x2b   :  { %500 = vst [vmem:[%s1349_s4 + $0xd8] sm:$0xff] %v436_v19  ;;  %v439_v32 = vmax.f32 %v375_v25, 0.0  ;;  %v440_v33 = vmax.f32 %v376_v26, 0.0  ;;  %v615_v36 = vunpack.c.l.bf16 %v686_v22  ;;  %v616_v37 = vunpack.c.h.bf16 %v686_v22  ;;  %v322_v25 = vld [vmem:[%s1348_s1 + $0x148] sm:$0xff] }
  0x2c   :  { %501 = vst [vmem:[%s1349_s4 + $0xe0] sm:$0xff] %v437_v23  ;;  %v249_v38 = vadd.f32 %v738_v3, %v181_v27  ;;  %v250_v39 = vadd.f32 %v738_v3, %v182_v28  ;;  %v183_v40 = vmul.f32 %v733_v1, %v611_v29  ;;  %v184_v41 = vmul.f32 %v733_v1, %v612_v30 }
  0x2d   :  { %502 = vst [vmem:[%s1349_s4 + $0xe8] sm:$0xff] %v438_v24  ;;  %v185_v44 = vmul.f32 %v733_v1, %v615_v36  ;;  %v186_v45 = vmul.f32 %v733_v1, %v616_v37  ;;  %v619_v46 = vunpack.c.l.bf16 %v687_v31  ;;  %v620_v47 = vunpack.c.h.bf16 %v687_v31  ;;  %v321_v24 = vld [vmem:[%s1348_s1 + $0x140] sm:$0xff] }
  0x2e   :  { %503 = vst [vmem:[%s1349_s4 + $0xf0] sm:$0xff] %v439_v32  ;;  %v377_v48 = vadd.f32 %v313_v34, %v249_v38  ;;  %v378_v49 = vadd.f32 %v314_v35, %v250_v39  ;;  %v251_v50 = vadd.f32 %v738_v3, %v183_v40  ;;  %v252_v51 = vadd.f32 %v738_v3, %v184_v41  ;;  %v323_v32 = vld [vmem:[%s1348_s1 + $0x150] sm:$0xff] }
  0x2f   :  { %504 = vst [vmem:[%s1349_s4 + $0xf8] sm:$0xff] %v440_v33  ;;  %v253_v54 = vadd.f32 %v738_v3, %v185_v44  ;;  %v254_v55 = vadd.f32 %v738_v3, %v186_v45  ;;  %v187_v56 = vmul.f32 %v733_v1, %v619_v46  ;;  %v188_v57 = vmul.f32 %v733_v1, %v620_v47  ;;  %v324_v33 = vld [vmem:[%s1348_s1 + $0x158] sm:$0xff] }
  0x30   :  { %v441_v59 = vmax.f32 %v377_v48, 0.0  ;;  %v442_v60 = vmax.f32 %v378_v49, 0.0  ;;  %v379_v61 = vadd.f32 %v315_v42, %v251_v50  ;;  %v380_v62 = vadd.f32 %v316_v43, %v252_v51  ;;  %v325_v42 = vld [vmem:[%s1348_s1 + $0x160] sm:$0xff]  ;;  %v326_v43 = vld [vmem:[%s1348_s1 + $0x168] sm:$0xff] }
  0x31   :  { %v381_v2 = vadd.f32 %v317_v52, %v253_v54  ;;  %v382_v4 = vadd.f32 %v318_v53, %v254_v55  ;;  %v255_v5 = vadd.f32 %v738_v3, %v187_v56  ;;  %v256_v6 = vadd.f32 %v738_v3, %v188_v57  ;;  %v692_v48 = vld [vmem:[%s1345_s0 + $0xc0] sm:$0xff]   ;;  %v327_v53 = vld [vmem:[%s1348_s1 + $0x170] sm:$0xff]  ;;  %v328_v54 = vld [vmem:[%s1348_s1 + $0x178] sm:$0xff] }
  0x32   :  { %505 = vst [vmem:[%s1349_s4 + $0x100] sm:$0xff] %v441_v59  ;;  %v443_v8 = vmax.f32 %v379_v61, 0.0  ;;  %v444_v9 = vmax.f32 %v380_v62, 0.0  ;;  %v623_v10 = vunpack.c.l.bf16 %v688_v58  ;;  %v624_v11 = vunpack.c.h.bf16 %v688_v58  ;;  %v693_v59 = vld [vmem:[%s1345_s0 + $0xc8] sm:$0xff]  }
  0x33   :  { %506 = vst [vmem:[%s1349_s4 + $0x108] sm:$0xff] %v442_v60  ;;  %v445_v13 = vmax.f32 %v381_v2, 0.0  ;;  %v446_v14 = vmax.f32 %v382_v4, 0.0  ;;  %v383_v15 = vadd.f32 %v319_v63, %v255_v5  ;;  %v384_v16 = vadd.f32 %v320_v0, %v256_v6  ;;  %v694_v0 = vld [vmem:[%s1345_s0 + $0xd0] sm:$0xff]  }
  0x34   :  { %507 = vst [vmem:[%s1349_s4 + $0x110] sm:$0xff] %v443_v8  ;;  %v189_v17 = vmul.f32 %v733_v1, %v623_v10  ;;  %v190_v18 = vmul.f32 %v733_v1, %v624_v11  ;;  %v627_v19 = vunpack.c.l.bf16 %v689_v7  ;;  %v628_v20 = vunpack.c.h.bf16 %v689_v7  ;;  %v695_v11 = vld [vmem:[%s1345_s0 + $0xd8] sm:$0xff]  }
  0x35   :  { %508 = vst [vmem:[%s1349_s4 + $0x118] sm:$0xff] %v444_v9  ;;  %v447_v22 = vmax.f32 %v383_v15, 0.0  ;;  %v448_v23 = vmax.f32 %v384_v16, 0.0  ;;  %v631_v26 = vunpack.c.l.bf16 %v690_v12  ;;  %v632_v27 = vunpack.c.h.bf16 %v690_v12  ;;  %v330_v15 = vld [vmem:[%s1348_s1 + $0x188] sm:$0xff] }
  0x36   :  { %509 = vst [vmem:[%s1349_s4 + $0x120] sm:$0xff] %v445_v13  ;;  %v257_v28 = vadd.f32 %v738_v3, %v189_v17  ;;  %v258_v29 = vadd.f32 %v738_v3, %v190_v18  ;;  %v191_v30 = vmul.f32 %v733_v1, %v627_v19  ;;  %v192_v31 = vmul.f32 %v733_v1, %v628_v20 }
  0x37   :  { %510 = vst [vmem:[%s1349_s4 + $0x128] sm:$0xff] %v446_v14  ;;  %v193_v34 = vmul.f32 %v733_v1, %v631_v26  ;;  %v194_v35 = vmul.f32 %v733_v1, %v632_v27  ;;  %v635_v36 = vunpack.c.l.bf16 %v691_v21  ;;  %v636_v37 = vunpack.c.h.bf16 %v691_v21  ;;  %v329_v14 = vld [vmem:[%s1348_s1 + $0x180] sm:$0xff] }
  0x38   :  { %511 = vst [vmem:[%s1349_s4 + $0x130] sm:$0xff] %v447_v22  ;;  %v385_v38 = vadd.f32 %v321_v24, %v257_v28  ;;  %v386_v39 = vadd.f32 %v322_v25, %v258_v29  ;;  %v259_v40 = vadd.f32 %v738_v3, %v191_v30  ;;  %v260_v41 = vadd.f32 %v738_v3, %v192_v31  ;;  %v331_v22 = vld [vmem:[%s1348_s1 + $0x190] sm:$0xff] }
  0x39   :  { %512 = vst [vmem:[%s1349_s4 + $0x138] sm:$0xff] %v448_v23  ;;  %v261_v44 = vadd.f32 %v738_v3, %v193_v34  ;;  %v262_v45 = vadd.f32 %v738_v3, %v194_v35  ;;  %v195_v46 = vmul.f32 %v733_v1, %v635_v36  ;;  %v196_v47 = vmul.f32 %v733_v1, %v636_v37  ;;  %v332_v23 = vld [vmem:[%s1348_s1 + $0x198] sm:$0xff] }
  0x3a   :  { %v449_v49 = vmax.f32 %v385_v38, 0.0  ;;  %v450_v50 = vmax.f32 %v386_v39, 0.0  ;;  %v387_v51 = vadd.f32 %v323_v32, %v259_v40  ;;  %v388_v52 = vadd.f32 %v324_v33, %v260_v41  ;;  %v333_v32 = vld [vmem:[%s1348_s1 + $0x1a0] sm:$0xff]  ;;  %v334_v33 = vld [vmem:[%s1348_s1 + $0x1a8] sm:$0xff] }
  0x3b   :  { %v389_v55 = vadd.f32 %v325_v42, %v261_v44  ;;  %v390_v56 = vadd.f32 %v326_v43, %v262_v45  ;;  %v263_v57 = vadd.f32 %v738_v3, %v195_v46  ;;  %v264_v58 = vadd.f32 %v738_v3, %v196_v47  ;;  %v696_v38 = vld [vmem:[%s1345_s0 + $0xe0] sm:$0xff]   ;;  %v335_v43 = vld [vmem:[%s1348_s1 + $0x1b0] sm:$0xff]  ;;  %v336_v44 = vld [vmem:[%s1348_s1 + $0x1b8] sm:$0xff] }
  0x3c   :  { %513 = vst [vmem:[%s1349_s4 + $0x140] sm:$0xff] %v449_v49  ;;  %v451_v60 = vmax.f32 %v387_v51, 0.0  ;;  %v452_v61 = vmax.f32 %v388_v52, 0.0  ;;  %v639_v62 = vunpack.c.l.bf16 %v692_v48  ;;  %v640_v63 = vunpack.c.h.bf16 %v692_v48  ;;  %v697_v49 = vld [vmem:[%s1345_s0 + $0xe8] sm:$0xff]  }
  0x3d   :  { %514 = vst [vmem:[%s1349_s4 + $0x148] sm:$0xff] %v450_v50  ;;  %v453_v2 = vmax.f32 %v389_v55, 0.0  ;;  %v454_v4 = vmax.f32 %v390_v56, 0.0  ;;  %v391_v5 = vadd.f32 %v327_v53, %v263_v57  ;;  %v392_v6 = vadd.f32 %v328_v54, %v264_v58  ;;  %v698_v54 = vld [vmem:[%s1345_s0 + $0xf0] sm:$0xff]  }
  0x3e   :  { %515 = vst [vmem:[%s1349_s4 + $0x150] sm:$0xff] %v451_v60  ;;  %v197_v7 = vmul.f32 %v733_v1, %v639_v62  ;;  %v198_v8 = vmul.f32 %v733_v1, %v640_v63  ;;  %v643_v9 = vunpack.c.l.bf16 %v693_v59  ;;  %v644_v10 = vunpack.c.h.bf16 %v693_v59  ;;  %v699_v63 = vld [vmem:[%s1345_s0 + $0xf8] sm:$0xff]  }
  0x3f   :  { %516 = vst [vmem:[%s1349_s4 + $0x158] sm:$0xff] %v452_v61  ;;  %v455_v12 = vmax.f32 %v391_v5, 0.0  ;;  %v456_v13 = vmax.f32 %v392_v6, 0.0  ;;  %v647_v16 = vunpack.c.l.bf16 %v694_v0  ;;  %v648_v17 = vunpack.c.h.bf16 %v694_v0  ;;  %v338_v5 = vld [vmem:[%s1348_s1 + $0x1c8] sm:$0xff] }
  0x40   :  { %517 = vst [vmem:[%s1349_s4 + $0x160] sm:$0xff] %v453_v2  ;;  %v265_v18 = vadd.f32 %v738_v3, %v197_v7  ;;  %v266_v19 = vadd.f32 %v738_v3, %v198_v8  ;;  %v199_v20 = vmul.f32 %v733_v1, %v643_v9  ;;  %v200_v21 = vmul.f32 %v733_v1, %v644_v10 }
  0x41   :  { %518 = vst [vmem:[%s1349_s4 + $0x168] sm:$0xff] %v454_v4  ;;  %v201_v24 = vmul.f32 %v733_v1, %v647_v16  ;;  %v202_v25 = vmul.f32 %v733_v1, %v648_v17  ;;  %v651_v26 = vunpack.c.l.bf16 %v695_v11  ;;  %v652_v27 = vunpack.c.h.bf16 %v695_v11  ;;  %v337_v4 = vld [vmem:[%s1348_s1 + $0x1c0] sm:$0xff] }
  0x42   :  { %519 = vst [vmem:[%s1349_s4 + $0x170] sm:$0xff] %v455_v12  ;;  %v393_v28 = vadd.f32 %v329_v14, %v265_v18  ;;  %v394_v29 = vadd.f32 %v330_v15, %v266_v19  ;;  %v267_v30 = vadd.f32 %v738_v3, %v199_v20  ;;  %v268_v31 = vadd.f32 %v738_v3, %v200_v21  ;;  %v339_v12 = vld [vmem:[%s1348_s1 + $0x1d0] sm:$0xff] }
  0x43   :  { %520 = vst [vmem:[%s1349_s4 + $0x178] sm:$0xff] %v456_v13  ;;  %v269_v34 = vadd.f32 %v738_v3, %v201_v24  ;;  %v270_v35 = vadd.f32 %v738_v3, %v202_v25  ;;  %v203_v36 = vmul.f32 %v733_v1, %v651_v26  ;;  %v204_v37 = vmul.f32 %v733_v1, %v652_v27  ;;  %v340_v13 = vld [vmem:[%s1348_s1 + $0x1d8] sm:$0xff] }
  0x44   :  { %v457_v39 = vmax.f32 %v393_v28, 0.0  ;;  %v458_v40 = vmax.f32 %v394_v29, 0.0  ;;  %v395_v41 = vadd.f32 %v331_v22, %v267_v30  ;;  %v396_v42 = vadd.f32 %v332_v23, %v268_v31  ;;  %v341_v22 = vld [vmem:[%s1348_s1 + $0x1e0] sm:$0xff]  ;;  %v342_v23 = vld [vmem:[%s1348_s1 + $0x1e8] sm:$0xff] }
  0x45   :  { %v397_v45 = vadd.f32 %v333_v32, %v269_v34  ;;  %v398_v46 = vadd.f32 %v334_v33, %v270_v35  ;;  %v271_v47 = vadd.f32 %v738_v3, %v203_v36  ;;  %v272_v48 = vadd.f32 %v738_v3, %v204_v37  ;;  %v343_v32 = vld [vmem:[%s1348_s1 + $0x1f0] sm:$0xff]  ;;  %v344_v33 = vld [vmem:[%s1348_s1 + $0x1f8] sm:$0xff] }
  0x46   :  { %521 = vst [vmem:[%s1349_s4 + $0x180] sm:$0xff] %v457_v39  ;;  %v459_v50 = vmax.f32 %v395_v41, 0.0  ;;  %v460_v51 = vmax.f32 %v396_v42, 0.0  ;;  %v655_v52 = vunpack.c.l.bf16 %v696_v38  ;;  %v656_v53 = vunpack.c.h.bf16 %v696_v38 }
  0x47   :  { %522 = vst [vmem:[%s1349_s4 + $0x188] sm:$0xff] %v458_v40  ;;  %v461_v55 = vmax.f32 %v397_v45, 0.0  ;;  %v462_v56 = vmax.f32 %v398_v46, 0.0  ;;  %v399_v57 = vadd.f32 %v335_v43, %v271_v47  ;;  %v400_v58 = vadd.f32 %v336_v44, %v272_v48 }
  0x48   :  { %523 = vst [vmem:[%s1349_s4 + $0x190] sm:$0xff] %v459_v50  ;;  %v205_v59 = vmul.f32 %v733_v1, %v655_v52  ;;  %v206_v60 = vmul.f32 %v733_v1, %v656_v53  ;;  %v659_v61 = vunpack.c.l.bf16 %v697_v49  ;;  %v660_v62 = vunpack.c.h.bf16 %v697_v49 }
  0x49   :  { %524 = vst [vmem:[%s1349_s4 + $0x198] sm:$0xff] %v460_v51  ;;  %v463_v0 = vmax.f32 %v399_v57, 0.0  ;;  %v464_v2 = vmax.f32 %v400_v58, 0.0  ;;  %v663_v6 = vunpack.c.l.bf16 %v698_v54  ;;  %v664_v7 = vunpack.c.h.bf16 %v698_v54 }
  0x4a   :  { %525 = vst [vmem:[%s1349_s4 + $0x1a0] sm:$0xff] %v461_v55  ;;  %v273_v8 = vadd.f32 %v738_v3, %v205_v59  ;;  %v274_v9 = vadd.f32 %v738_v3, %v206_v60  ;;  %v207_v10 = vmul.f32 %v733_v1, %v659_v61  ;;  %v208_v11 = vmul.f32 %v733_v1, %v660_v62 }
  0x4b   :  { %526 = vst [vmem:[%s1349_s4 + $0x1a8] sm:$0xff] %v462_v56  ;;  %v209_v14 = vmul.f32 %v733_v1, %v663_v6  ;;  %v210_v15 = vmul.f32 %v733_v1, %v664_v7  ;;  %v667_v16 = vunpack.c.l.bf16 %v699_v63  ;;  %v668_v17 = vunpack.c.h.bf16 %v699_v63 }
  0x4c   :  { %527 = vst [vmem:[%s1349_s4 + $0x1b0] sm:$0xff] %v463_v0  ;;  %v401_v18 = vadd.f32 %v337_v4, %v273_v8  ;;  %v402_v19 = vadd.f32 %v338_v5, %v274_v9  ;;  %v275_v20 = vadd.f32 %v738_v3, %v207_v10  ;;  %v276_v21 = vadd.f32 %v738_v3, %v208_v11 }
  0x4d   :  { %528 = vst [vmem:[%s1349_s4 + $0x1b8] sm:$0xff] %v464_v2  ;;  %v277_v24 = vadd.f32 %v738_v3, %v209_v14  ;;  %v278_v25 = vadd.f32 %v738_v3, %v210_v15  ;;  %v211_v26 = vmul.f32 %v733_v1, %v667_v16  ;;  %v212_v27 = vmul.f32 %v733_v1, %v668_v17 }
  0x4e   :  { %v465_v28 = vmax.f32 %v401_v18, 0.0  ;;  %v466_v29 = vmax.f32 %v402_v19, 0.0  ;;  %v403_v30 = vadd.f32 %v339_v12, %v275_v20  ;;  %v404_v31 = vadd.f32 %v340_v13, %v276_v21 }
  0x4f   :  { %v405_v34 = vadd.f32 %v341_v22, %v277_v24  ;;  %v406_v35 = vadd.f32 %v342_v23, %v278_v25  ;;  %v279_v36 = vadd.f32 %v738_v3, %v211_v26  ;;  %v280_v37 = vadd.f32 %v738_v3, %v212_v27 }
  0x50   :  { %529 = vst [vmem:[%s1349_s4 + $0x1c0] sm:$0xff] %v465_v28  ;;  %v467_v1 = vmax.f32 %v403_v30, 0.0  ;;  %v468_v38 = vmax.f32 %v404_v31, 0.0 }
  0x51   :  { %530 = vst [vmem:[%s1349_s4 + $0x1c8] sm:$0xff] %v466_v29  ;;  %v469_v39 = vmax.f32 %v405_v34, 0.0  ;;  %v470_v40 = vmax.f32 %v406_v35, 0.0  ;;  %v407_v41 = vadd.f32 %v343_v32, %v279_v36  ;;  %v408_v42 = vadd.f32 %v344_v33, %v280_v37 }
  0x52   :  { %531 = vst [vmem:[%s1349_s4 + $0x1d0] sm:$0xff] %v467_v1 }
  0x53   :  { %532 = vst [vmem:[%s1349_s4 + $0x1d8] sm:$0xff] %v468_v38  ;;  %v471_v3 = vmax.f32 %v407_v41, 0.0  ;;  %v472_v43 = vmax.f32 %v408_v42, 0.0 }
  0x54   :  { %533 = vst [vmem:[%s1349_s4 + $0x1e0] sm:$0xff] %v469_v39 }
  0x55   :  { %534 = vst [vmem:[%s1349_s4 + $0x1e8] sm:$0xff] %v470_v40 }
  0x56   :  { %535 = vst [vmem:[%s1349_s4 + $0x1f0] sm:$0xff] %v471_v3 }
  0x57   :  { %536 = vst [vmem:[%s1349_s4 + $0x1f8] sm:$0xff] %v472_v43 }

// kernel: identity_block_forward.5
= control target key start
LH: loop header
LB: loop body
LE: loop exit
PB: predicated region body
PF: predicated region fallthrough
CT: control target
= control target key end

     0   :  { %s3520_s21 = smov 0   ;;  %s4537_s0 = inlined_call_operand.vmem [shape: bf16[2,18,18,128], index: 0, kind: input, shape index: {}]   ;;  %s4538_s1 = inlined_call_operand.vmem [shape: f32[1,128], index: 1, kind: input, shape index: {}]   ;;  %s4539_s2 = inlined_call_operand.vmem [shape: f32[1,128], index: 2, kind: input, shape index: {}]   ;;  %s4540_s3 = inlined_call_operand.vmem [shape: bf16[3,384,128], index: 3, kind: input, shape index: {}]   ;;  %s4541_s4 = inlined_call_operand.vmem [shape: bf16[512,128], index: 4, kind: output, shape index: {0}]   ;;  %s4542_s5 = inlined_call_operand.vmem [shape: f32[2,1,128], index: 5, kind: output, shape index: {1}]   ;;  %s4543_s6 = inlined_call_operand.vmem [shape: f32[2,1,128], index: 6, kind: output, shape index: {2}]  }
   0x1 LB: > { %s3526_s22 = sadd.s32 4294967295, %s3482_s21   ;;  %p2841_p0 = scmp.ge.s32.totalorder %s3482_s21, 1  ;;  %s3482_s21 = sphi %s3520_s21, %s17_s21  }
   0x2   : > { %p217_p1 = scmp.lt.s32.totalorder %s3482_s21, 3 }
   0x4   : > { %p218_p2 = pnand %p2841_p0, %p217_p1 }
   0x6   : > { %221 = sbr.rel (%p218_p2) target bundleno = 767 (0x2ff), region = 36 }
   0xb   : > { %v3262_v0 = vld [vmem:[%s4540_s3 + $0xf8] sm:$0xff]  ;;  %p253_p3 = scmp.lt.s32.totalorder %s3526_s22, 1  ;;  %v3261_v1 = vld [vmem:[%s4540_s3 + $0xf0] sm:$0xff]  ;;  %v378_v2 = vlaneseq  ;;  %v3260_v3 = vld [vmem:[%s4540_s3 + $0xe8] sm:$0xff]  ;;  %vm840_vm2 = vsmask.f32 7424 }
   0xc   : > { %1389 = vmatpush.bf16.msra.mxu0 %v3262_v0  ;;  %3438 = vmatpush.bf16.msra.mxu1 %v3262_v0  ;;  %v3552_v4 = vld [vmem:[%s4538_s1] ss:$0 sm:$0xff]  ;;  %v3258_v34 = vld [vmem:[%s4540_s3 + $0xd8] sm:$0xff]  ;;  %v3257_v52 = vld [vmem:[%s4540_s3 + $0xd0] sm:$0xff]  ;;  %vm1075_vm3 = vcmask 1046528   ;;  %s2843_s15 = sshll.u32 %s3526_s22, 5 }
   0xd   : > { %s3538_s27 = scalar_select %p253_p3, %s3526_s22, 1  ;;  %3439 = vmatpush.bf16.msra.mxu2 %v3262_v0  ;;  %3440 = vmatpush.bf16.msra.mxu3 %v3262_v0  ;;  %v3555_v6 = vshrl.u32 %v378_v2, 7  ;;  %v3562_v11 = vld [vmem:[%s4539_s2] ss:$0 sm:$0xff] }
   0xe   : > { %v3259_v19 = vld [vmem:[%s4540_s3 + $0xe0] sm:$0xff]  ;;  %p259_p4 = scmp.lt.s32.totalorder %s2843_s15, 63 }
   0xf   : > { %s3462_s28 = smul.u32 216, %s3538_s27  ;;  %vm382_vm0 = vcmp.ge.s32.totalorder %v3555_v6, 1  ;;  %s266_s23 = scalar_lea.vmem %s4542_s5, %s3538_s27 }
  0x10   : > { %1390 = vmatpush.bf16.msra.mxu0 %v3261_v1  ;;  %3441 = vmatpush.bf16.msra.mxu1 %v3261_v1  ;;  %s4655_s15 = smov (!%p259_p4, %s2843_s15), 63  ;;  %s269_s26 = scalar_lea.vmem %s4543_s6, %s3538_s27 }
  0x11   : > { %s3547_s9 = scalar_lea.vmem %s4537_s0, %s3462_s28  ;;  %3442 = vmatpush.bf16.msra.mxu2 %v3261_v1  ;;  %3443 = vmatpush.bf16.msra.mxu3 %v3261_v1  ;;  %s2844_s16 = sshll.u32 %s4655_s15, 2 }
  0x12   : > { %v273_v5 = vld [vmem:[%s3547_s9 + $0xc] sm:$0xff]   ;;  %v285_v7 = vld [vmem:[%s3547_s9 + $0x3c] sm:$0xff]   ;;  %s4453_s18 = scalar_lea.vmem %s4541_s4, %s2844_s16 }
  0x13   : > { %v297_v8 = vld [vmem:[%s3547_s9 + $0x6c] sm:$0xff]   ;;  %v327_v9 = vunpack.c.l.bf16 %v273_v5  ;;  %v328_v10 = vunpack.c.h.bf16 %v273_v5  ;;  %v339_v12 = vunpack.c.l.bf16 %v285_v7  ;;  %v340_v13 = vunpack.c.h.bf16 %v285_v7  ;;  %v309_v14 = vld [vmem:[%s3547_s9 + $0x9c] sm:$0xff]  }
  0x14   : > { %v351_v15 = vunpack.c.l.bf16 %v297_v8  ;;  %v352_v16 = vunpack.c.h.bf16 %v297_v8  ;;  %v363_v17 = vunpack.c.l.bf16 %v309_v14  ;;  %v364_v18 = vunpack.c.h.bf16 %v309_v14  ;;  %1391 = vmatpush.bf16.msra.mxu0 %v3260_v3  ;;  %3444 = vmatpush.bf16.msra.mxu1 %v3260_v3  ;;  %v3415_v39 = vld [vmem:[%s3547_s9 + $0x18] sm:$0xff]   ;;  %v3417_v58 = vld [vmem:[%s3547_s9 + $0x48] sm:$0xff]  }
  0x15   : > { %v407_v20 = vmul.f32 %v3552_v4, %v327_v9  ;;  %v408_v21 = vmul.f32 %v3552_v4, %v328_v10  ;;  %v419_v22 = vmul.f32 %v3552_v4, %v339_v12  ;;  %3445 = vmatpush.bf16.msra.mxu2 %v3260_v3  ;;  %3446 = vmatpush.bf16.msra.mxu3 %v3260_v3  ;;  %v3305_v50 = vunpack.c.l.bf16 %v3415_v39  ;;  %v3419_v62 = vld [vmem:[%s3547_s9 + $0x78] sm:$0xff]   ;;  %v3421_v3 = vld [vmem:[%s3547_s9 + $0xa8] sm:$0xff]  }
  0x16   : > { %v420_v23 = vmul.f32 %v3552_v4, %v340_v13  ;;  %v431_v24 = vmul.f32 %v3552_v4, %v351_v15  ;;  %v432_v25 = vmul.f32 %v3552_v4, %v352_v16  ;;  %v443_v29 = vmul.f32 %v3552_v4, %v363_v17  ;;  %v3256_v5 = vld [vmem:[%s4540_s3 + $0xc8] sm:$0xff] }
  0x17   : > { %v465_v26 = vadd.f32 %v3562_v11, %v407_v20  ;;  %v466_v27 = vadd.f32 %v3562_v11, %v408_v21  ;;  %v477_v28 = vadd.f32 %v3562_v11, %v419_v22  ;;  %v444_v33 = vmul.f32 %v3552_v4, %v364_v18 }
  0x18   : > { %v478_v30 = vadd.f32 %v3562_v11, %v420_v23  ;;  %v489_v31 = vadd.f32 %v3562_v11, %v431_v24  ;;  %v490_v32 = vadd.f32 %v3562_v11, %v432_v25  ;;  %1392 = vmatpush.bf16.msra.mxu0 %v3259_v19  ;;  %3447 = vmatpush.bf16.msra.mxu1 %v3259_v19  ;;  %v3306_v51 = vunpack.c.h.bf16 %v3415_v39  ;;  %v3255_v24 = vld [vmem:[%s4540_s3 + $0xc0] sm:$0xff] }
  0x19   : > { %v519_v35 = vmax.f32 %v465_v26, 0.0  ;;  %v520_v36 = vmax.f32 %v466_v27, 0.0  ;;  %v531_v37 = vmax.f32 %v477_v28, 0.0  ;;  %v501_v38 = vadd.f32 %v3562_v11, %v443_v29  ;;  %3448 = vmatpush.bf16.msra.mxu2 %v3259_v19  ;;  %3449 = vmatpush.bf16.msra.mxu3 %v3259_v19 }
  0x1a   : > { %v532_v40 = vmax.f32 %v478_v30, 0.0  ;;  %v543_v41 = vmax.f32 %v489_v31, 0.0  ;;  %v544_v42 = vmax.f32 %v490_v32, 0.0  ;;  %v502_v43 = vadd.f32 %v3562_v11, %v444_v33 }
  0x1b   : > { %v573_v44 = vsel %vm382_vm0, %v519_v35, 0.0  ;;  %v628_v45 = vpack.c.bf16 %v520_v36, %v520_v36  ;;  %v585_v46 = vsel %vm382_vm0, %v531_v37, 0.0  ;;  %v555_v47 = vmax.f32 %v501_v38, 0.0  ;;  %v3238_v35 = vld [vmem:[%s4540_s3 + $0x38] sm:$0xff] }
  0x1c   : > { %v627_v48 = vpack.c.bf16 %v573_v44, %v573_v44  ;;  %v597_v49 = vsel %vm382_vm0, %v543_v41, 0.0  ;;  %1393 = vmatpush.bf16.msra.mxu0 %v3258_v34  ;;  %3450 = vmatpush.bf16.msra.mxu1 %v3258_v34  ;;  %v639_v53 = vpack.c.bf16 %v585_v46, %v585_v46  ;;  %v640_v54 = vpack.c.bf16 %v532_v40, %v532_v40  ;;  %v3270_v46 = vld [vmem:[%s4540_s3 + $0x138] sm:$0xff] }
  0x1d   : > { %v651_v55 = vpack.c.bf16 %v597_v49, %v597_v49  ;;  %v556_v56 = vmax.f32 %v502_v43, 0.0  ;;  %3451 = vmatpush.bf16.msra.mxu2 %v3258_v34  ;;  %3452 = vmatpush.bf16.msra.mxu3 %v3258_v34  ;;  %v609_v57 = vsel %vm382_vm0, %v555_v47, 0.0  ;;  %v717_v60 = vunpack.c.l.b16 %v628_v45  ;;  %v3278_v34 = vld [vmem:[%s4540_s3 + $0x178] sm:$0xff]  ;;  %v279_v45 = vld [vmem:[%s3547_s9 + $0x24] sm:$0xff]  }
  0x1e   : > { %v716_v59 = vunpack.c.l.b16 %v627_v48  ;;  %v652_v61 = vpack.c.bf16 %v544_v42, %v544_v42  ;;  %v663_v63 = vpack.c.bf16 %v609_v57, %v609_v57  ;;  %v410_v1 = vmul.f32 %v3552_v4, %v3305_v50  ;;  %v3246_v47 = vld [vmem:[%s4540_s3 + $0x78] sm:$0xff] }
  0x1f   : > { %v664_v0 = vpack.c.bf16 %v556_v56, %v556_v56  ;;  %v411_v2 = vmul.f32 %v3552_v4, %v3306_v51  ;;  %v724_v7 = vunpack.c.l.b16 %v639_v53  ;;  %v725_v8 = vunpack.c.l.b16 %v640_v54  ;;  %v3277_v51 = vld [vmem:[%s4540_s3 + $0x170] sm:$0xff] }
  0x20   : > { %1394 = vmatpush.bf16.msra.mxu0 %v3257_v52  ;;  %3453 = vmatpush.bf16.msra.mxu1 %v3257_v52  ;;  %v732_v9 = vunpack.c.l.b16 %v651_v55  ;;  %v3313_v10 = vunpack.c.l.bf16 %v3417_v58  ;;  %v468_v12 = vadd.f32 %v3562_v11, %v410_v1  ;;  %v3314_v14 = vunpack.c.h.bf16 %v3417_v58  ;;  %v291_v54 = vld [vmem:[%s3547_s9 + $0x54] sm:$0xff]  }
  0x21   : > { %3454 = vmatpush.bf16.msra.mxu2 %v3257_v52  ;;  %3455 = vmatpush.bf16.msra.mxu3 %v3257_v52  ;;  %v469_v13 = vadd.f32 %v3562_v11, %v411_v2  ;;  %v3321_v15 = vunpack.c.l.bf16 %v3419_v62  ;;  %v733_v16 = vunpack.c.l.b16 %v652_v61  ;;  %v3322_v18 = vunpack.c.h.bf16 %v3419_v62  ;;  %v3237_v52 = vld [vmem:[%s4540_s3 + $0x30] sm:$0xff]  ;;  %v303_v62 = vld [vmem:[%s3547_s9 + $0x84] sm:$0xff]  }
  0x22   : > { %v422_v17 = vmul.f32 %v3552_v4, %v3313_v10  ;;  %v3329_v19 = vunpack.c.l.bf16 %v3421_v3  ;;  %v740_v20 = vunpack.c.l.b16 %v663_v63  ;;  %v741_v21 = vunpack.c.l.b16 %v664_v0  ;;  %v3269_v0 = vld [vmem:[%s4540_s3 + $0x130] sm:$0xff] }
  0x23   : > { %v423_v22 = vmul.f32 %v3552_v4, %v3314_v14  ;;  %v434_v23 = vmul.f32 %v3552_v4, %v3321_v15  ;;  %v435_v26 = vmul.f32 %v3552_v4, %v3322_v18  ;;  %v3330_v27 = vunpack.c.h.bf16 %v3421_v3  ;;  %v3245_v1 = vld [vmem:[%s4540_s3 + $0x70] sm:$0xff] }
  0x24   : > { %1395 = vmatpush.bf16.msra.mxu0 %v3256_v5  ;;  %3456 = vmatpush.bf16.msra.mxu1 %v3256_v5  ;;  %v480_v25 = vadd.f32 %v3562_v11, %v422_v17  ;;  %v446_v28 = vmul.f32 %v3552_v4, %v3329_v19  ;;  %v522_v29 = vmax.f32 %v468_v12, 0.0  ;;  %v523_v30 = vmax.f32 %v469_v13, 0.0  ;;  %v3276_v12 = vld [vmem:[%s4540_s3 + $0x168] sm:$0xff] }
  0x25   : > { %3457 = vmatpush.bf16.msra.mxu2 %v3256_v5  ;;  %3458 = vmatpush.bf16.msra.mxu3 %v3256_v5  ;;  %v492_v31 = vadd.f32 %v3562_v11, %v434_v23  ;;  %v3620_v32 = vpack.c.b16 %v717_v60, %v716_v59  ;;  %v3622_v33 = vpack.c.b16 %v725_v8, %v724_v7  ;;  %v333_v58 = vunpack.c.l.bf16 %v279_v45  ;;  %v315_v7 = vld [vmem:[%s3547_s9 + $0xb4] sm:$0xff]   ;;  %v3236_v13 = vld [vmem:[%s4540_s3 + $0x28] sm:$0xff] }
  0x26   : > { %v481_v36 = vadd.f32 %v3562_v11, %v423_v22  ;;  %v447_v37 = vmul.f32 %v3552_v4, %v3330_v27  ;;  %v534_v38 = vmax.f32 %v480_v25, 0.0  ;;  %v493_v39 = vadd.f32 %v3562_v11, %v435_v26  ;;  %v3244_v25 = vld [vmem:[%s4540_s3 + $0x68] sm:$0xff] }
  0x27   : > { %4571 = vst [vmem:[#allocation2_spill] sm:$0xff] %v3622_v33  ;;  %v546_v40 = vmax.f32 %v492_v31, 0.0  ;;  %v504_v41 = vadd.f32 %v3562_v11, %v446_v28  ;;  %v3634_v42 = vpack.c.b16 %v733_v16, %v732_v9  ;;  %v3636_v43 = vpack.c.b16 %v741_v21, %v740_v20  ;;  %v3235_v31 = vld [vmem:[%s4540_s3 + $0x20] sm:$0xff] }
  0x28   : > { %1396 = vmatpush.bf16.msra.mxu0 %v3255_v24  ;;  %3459 = vmatpush.bf16.msra.mxu1 %v3255_v24  ;;  %v505_v44 = vadd.f32 %v3562_v11, %v447_v37  ;;  %v576_v48 = vsel %vm382_vm0, %v522_v29, 0.0  ;;  %v3648_v49 = vpack.c.bf16 %v523_v30, %v523_v30  ;;  %v535_v53 = vmax.f32 %v481_v36, 0.0  ;;  %v3275_v30 = vld [vmem:[%s4540_s3 + $0x160] sm:$0xff] }
  0x29   : > { %3460 = vmatpush.bf16.msra.mxu2 %v3255_v24  ;;  %3461 = vmatpush.bf16.msra.mxu3 %v3255_v24  ;;  %v558_v50 = vmax.f32 %v504_v41, 0.0  ;;  %v588_v55 = vsel %vm382_vm0, %v534_v38, 0.0  ;;  %v547_v56 = vmax.f32 %v493_v39, 0.0  ;;  %v600_v57 = vsel %vm382_vm0, %v546_v40, 0.0  ;;  %v3268_v24 = vld [vmem:[%s4540_s3 + $0x128] sm:$0xff] }
  0x2a   : > { %v630_v59 = vpack.c.bf16 %v576_v48, %v576_v48  ;;  %v559_v60 = vmax.f32 %v505_v44, 0.0  ;;  %v719_v63 = vunpack.c.l.b16 %v3648_v49  ;;  %v334_v2 = vunpack.c.h.bf16 %v279_v45 }
  0x2b   : > { %1397 = vmatmul.bf16.vlgmr.msra.gmra.mxu0 %v3620_v32  ;;  %1417 = vmatmul.bf16.vlgmr.msra.gmra.mxu1 %v3622_v33  ;;  %v612_v61 = vsel %vm382_vm0, %v558_v50, 0.0  ;;  %v413_v3 = vmul.f32 %v3552_v4, %v333_v58  ;;  %v345_v5 = vunpack.c.l.bf16 %v291_v54  ;;  %v642_v8 = vpack.c.bf16 %v588_v55, %v588_v55  ;;  %v3234_v55 = vld [vmem:[%s4540_s3 + $0x18] sm:$0xff] }
  0x2c   : > { %1437 = vmatmul.bf16.vlgmr.msra.gmra.mxu2 %v3634_v42  ;;  %1457 = vmatmul.bf16.vlgmr.msra.gmra.mxu3 %v3636_v43  ;;  %v643_v9 = vpack.c.bf16 %v535_v53, %v535_v53  ;;  %v654_v10 = vpack.c.bf16 %v600_v57, %v600_v57  ;;  %v346_v14 = vunpack.c.h.bf16 %v291_v54  ;;  %v655_v15 = vpack.c.bf16 %v547_v56, %v547_v56  ;;  %v3274_v54 = vld [vmem:[%s4540_s3 + $0x158] sm:$0xff] }
  0x2d   : > { %1567 = vmatpush.bf16.msrb.mxu2 %v3278_v34  ;;  %1800 = vmatpush.bf16.msrb.mxu3 %v3238_v35  ;;  %v666_v16 = vpack.c.bf16 %v612_v61, %v612_v61  ;;  %v425_v17 = vmul.f32 %v3552_v4, %v345_v5  ;;  %v357_v18 = vunpack.c.l.bf16 %v303_v62  ;;  %v667_v19 = vpack.c.bf16 %v559_v60, %v559_v60  ;;  %v3726_v60 = vld [vmem:[%s3547_s9 + $0x30] sm:$0xff]  }
  0x2e   : > { %1478 = vmatpush.bf16.msrb.mxu1 %v3270_v46  ;;  %1889 = vmatpush.bf16.msrb.mxu0 %v3246_v47  ;;  %v414_v20 = vmul.f32 %v3552_v4, %v334_v2  ;;  %v358_v21 = vunpack.c.h.bf16 %v303_v62  ;;  %v369_v22 = vunpack.c.l.bf16 %v315_v7  ;;  %v718_v23 = vunpack.c.l.b16 %v630_v59 }
  0x2f   : > { %v471_v26 = vadd.f32 %v3562_v11, %v413_v3  ;;  %v426_v27 = vmul.f32 %v3552_v4, %v346_v14  ;;  %v437_v28 = vmul.f32 %v3552_v4, %v357_v18  ;;  %v726_v29 = vunpack.c.l.b16 %v642_v8  ;;  %v3242_v8 = vld [vmem:[%s4540_s3 + $0x58] sm:$0xff]  ;;  %v3422_v18 = vld [vmem:[%s3547_s9 + $0xc0] sm:$0xff]  }
  0x30   : > { %v483_v34 = vadd.f32 %v3562_v11, %v425_v17  ;;  %v370_v35 = vunpack.c.h.bf16 %v315_v7  ;;  %v449_v36 = vmul.f32 %v3552_v4, %v369_v22  ;;  %v727_v37 = vunpack.c.l.b16 %v643_v9  ;;  %v3420_v9 = vld [vmem:[%s3547_s9 + $0x90] sm:$0xff]  }
  0x31   : > { %1568 = vmatpush.bf16.msrb.mxu2 %v3277_v51  ;;  %1801 = vmatpush.bf16.msrb.mxu3 %v3237_v52  ;;  %v734_v38 = vunpack.c.l.b16 %v654_v10  ;;  %v438_v39 = vmul.f32 %v3552_v4, %v358_v21  ;;  %v495_v40 = vadd.f32 %v3562_v11, %v437_v28  ;;  %v735_v41 = vunpack.c.l.b16 %v655_v15  ;;  %v3267_v51 = vld [vmem:[%s4540_s3 + $0x120] sm:$0xff] }
  0x32   : > { %1479 = vmatpush.bf16.msrb.mxu1 %v3269_v0  ;;  %1890 = vmatpush.bf16.msrb.mxu0 %v3245_v1  ;;  %v742_v44 = vunpack.c.l.b16 %v666_v16  ;;  %v743_v45 = vunpack.c.l.b16 %v667_v19  ;;  %v450_v46 = vmul.f32 %v3552_v4, %v370_v35  ;;  %v472_v47 = vadd.f32 %v3562_v11, %v414_v20  ;;  %v3243_v52 = vld [vmem:[%s4540_s3 + $0x60] sm:$0xff]  ;;  %v3266_v1 = vld [vmem:[%s4540_s3 + $0x118] sm:$0xff]  ;;  %v3232_v35 = vld [vmem:[%s4540_s3 + $0x8] sm:$0xff] }
  0x33   : > { %v525_v48 = vmax.f32 %v471_v26, 0.0  ;;  %v484_v49 = vadd.f32 %v3562_v11, %v426_v27  ;;  %v507_v50 = vadd.f32 %v3562_v11, %v449_v36  ;;  %v537_v53 = vmax.f32 %v483_v34, 0.0  ;;  %v3265_v26 = vld [vmem:[%s4540_s3 + $0x110] sm:$0xff]  ;;  %v3272_v34 = vld [vmem:[%s4540_s3 + $0x148] sm:$0xff] }
  0x34   : > { %v3720_v56 = vpack.c.b16 %v719_v63, %v718_v23  ;;  %v3722_v57 = vpack.c.b16 %v727_v37, %v726_v29  ;;  %v496_v58 = vadd.f32 %v3562_v11, %v438_v39  ;;  %v549_v59 = vmax.f32 %v495_v40, 0.0  ;;  %v3737_v63 = vld [vmem:[%s3547_s9 + $0x60] sm:$0xff]   ;;  %v3241_v27 = vld [vmem:[%s4540_s3 + $0x50] sm:$0xff] }
  0x35   : > { %1569 = vmatpush.bf16.msrb.mxu2 %v3276_v12  ;;  %1802 = vmatpush.bf16.msrb.mxu3 %v3236_v13  ;;  %v3728_v61 = vpack.c.b16 %v735_v41, %v734_v38  ;;  %v3730_v62 = vpack.c.b16 %v743_v45, %v742_v44  ;;  %v508_v0 = vadd.f32 %v3562_v11, %v450_v46  ;;  %v526_v2 = vmax.f32 %v472_v47, 0.0  ;;  %v3273_v12 = vld [vmem:[%s4540_s3 + $0x150] sm:$0xff] }
  0x36   : > { %1480 = vmatpush.bf16.msrb.mxu1 %v3268_v24  ;;  %1891 = vmatpush.bf16.msrb.mxu0 %v3244_v25  ;;  %4572 = vst [vmem:[#allocation3_spill] sm:$0xff] %v3722_v57  ;;  %v579_v3 = vsel %vm382_vm0, %v525_v48, 0.0  ;;  %v538_v5 = vmax.f32 %v484_v49, 0.0  ;;  %v561_v7 = vmax.f32 %v507_v50, 0.0  ;;  %v591_v10 = vsel %vm382_vm0, %v537_v53, 0.0  ;;  %v3233_v13 = vld [vmem:[%s4540_s3 + $0x10] sm:$0xff] }
  0x37   : > { %v3309_v14 = vunpack.c.l.bf16 %v3726_v60  ;;  %v550_v15 = vmax.f32 %v496_v58, 0.0  ;;  %v603_v16 = vsel %vm382_vm0, %v549_v59, 0.0  ;;  %v3317_v17 = vunpack.c.l.bf16 %v3737_v63  ;;  %v3264_v50 = vld [vmem:[%s4540_s3 + $0x108] sm:$0xff]  ;;  %v3271_v58 = vld [vmem:[%s4540_s3 + $0x140] sm:$0xff] }
  0x38   : > { %v633_v19 = vpack.c.bf16 %v579_v3, %v579_v3  ;;  %v562_v20 = vmax.f32 %v508_v0, 0.0  ;;  %v3325_v21 = vunpack.c.l.bf16 %v3420_v9  ;;  %v634_v22 = vpack.c.bf16 %v526_v2, %v526_v2  ;;  %v3231_v59 = vld [vmem:[%s4540_s3] sm:$0xff] }
  0x39   : > { %1570 = vmatpush.bf16.msrb.mxu2 %v3275_v30  ;;  %1803 = vmatpush.bf16.msrb.mxu3 %v3235_v31  ;;  %v645_v23 = vpack.c.bf16 %v591_v10, %v591_v10  ;;  %v646_v24 = vpack.c.bf16 %v538_v5, %v538_v5  ;;  %v615_v25 = vsel %vm382_vm0, %v561_v7, 0.0  ;;  %v657_v28 = vpack.c.bf16 %v603_v16, %v603_v16  ;;  %v3263_v10 = vld [vmem:[%s4540_s3 + $0x100] sm:$0xff] }
  0x3a   : > { %1481 = vmatpush.bf16.msrb.mxu1 %v3267_v51  ;;  %1892 = vmatpush.bf16.msrb.mxu0 %v3243_v52  ;;  %v3310_v29 = vunpack.c.h.bf16 %v3726_v60  ;;  %v416_v30 = vmul.f32 %v3552_v4, %v3309_v14  ;;  %v3333_v31 = vunpack.c.l.bf16 %v3422_v18  ;;  %v658_v36 = vpack.c.bf16 %v550_v15, %v550_v15  ;;  %v3240_v51 = vld [vmem:[%s4540_s3 + $0x48] sm:$0xff] }
  0x3b   : > { %1402 = vmatmul.bf16.gmra.mxu0 %v3720_v56  ;;  %1422 = vmatmul.bf16.gmra.mxu1 %v3722_v57  ;;  %v3318_v37 = vunpack.c.h.bf16 %v3737_v63  ;;  %v428_v38 = vmul.f32 %v3552_v4, %v3317_v17  ;;  %v3326_v39 = vunpack.c.h.bf16 %v3420_v9  ;;  %v669_v40 = vpack.c.bf16 %v615_v25, %v615_v25 }
  0x3c   : > { %1442 = vmatmul.bf16.gmra.mxu2 %v3728_v61  ;;  %1462 = vmatmul.bf16.gmra.mxu3 %v3730_v62  ;;  %v670_v41 = vpack.c.bf16 %v562_v20, %v562_v20  ;;  %v440_v44 = vmul.f32 %v3552_v4, %v3325_v21  ;;  %v3334_v45 = vunpack.c.h.bf16 %v3422_v18  ;;  %v720_v46 = vunpack.c.l.b16 %v633_v19 }
  0x3d   : > { %1571 = vmatpush.bf16.msrb.mxu2 %v3274_v54  ;;  %1804 = vmatpush.bf16.msrb.mxu3 %v3234_v55  ;;  %v721_v47 = vunpack.c.l.b16 %v634_v22  ;;  %v728_v48 = vunpack.c.l.b16 %v645_v23  ;;  %v452_v49 = vmul.f32 %v3552_v4, %v3333_v31  ;;  %v729_v52 = vunpack.c.l.b16 %v646_v24 }
  0x3e   : > { %1482 = vmatpush.bf16.msrb.mxu1 %v3266_v1  ;;  %1893 = vmatpush.bf16.msrb.mxu0 %v3242_v8  ;;  %v736_v53 = vunpack.c.l.b16 %v657_v28  ;;  %v417_v54 = vmul.f32 %v3552_v4, %v3310_v29  ;;  %v474_v55 = vadd.f32 %v3562_v11, %v416_v30  ;;  %v737_v60 = vunpack.c.l.b16 %v658_v36  ;;  %v275_v8 = vld [vmem:[%s3547_s9 + $0x14] sm:$0x1] }
  0x3f   : > { %v429_v0 = vmul.f32 %v3552_v4, %v3318_v37  ;;  %v486_v1 = vadd.f32 %v3562_v11, %v428_v38  ;;  %v441_v63 = vmul.f32 %v3552_v4, %v3326_v39  ;;  %v744_v2 = vunpack.c.l.b16 %v669_v40  ;;  %v3286_v38 = vld [vmem:[%s4540_s3 + $0x1b8] sm:$0xff] }
  0x40   : > { %v745_v3 = vunpack.c.l.b16 %v670_v41  ;;  %v498_v5 = vadd.f32 %v3562_v11, %v440_v44  ;;  %v453_v7 = vmul.f32 %v3552_v4, %v3334_v45  ;;  %v510_v9 = vadd.f32 %v3562_v11, %v452_v49  ;;  %v3294_v39 = vld [vmem:[%s4540_s3 + $0x1f8] sm:$0xff]  ;;  %v278_v49 = vld [vmem:[%s3547_s9 + $0x20] sm:$0x1] }
  0x41   : > { %1572 = vmatpush.bf16.msrb.mxu2 %v3273_v12  ;;  %1805 = vmatpush.bf16.msrb.mxu3 %v3233_v13  ;;  %v3239_v12 = vld [vmem:[%s4540_s3 + $0x40] sm:$0xff]  ;;  %v3809_v13 = vpack.c.b16 %v721_v47, %v720_v46  ;;  %v3811_v14 = vpack.c.b16 %v729_v52, %v728_v48  ;;  %v475_v15 = vadd.f32 %v3562_v11, %v417_v54  ;;  %v528_v16 = vmax.f32 %v474_v55, 0.0  ;;  %v3254_v40 = vld [vmem:[%s4540_s3 + $0xb8] sm:$0xff] }
  0x42   : > { %1483 = vmatpush.bf16.msrb.mxu1 %v3265_v26  ;;  %1894 = vmatpush.bf16.msrb.mxu0 %v3241_v27  ;;  %v487_v17 = vadd.f32 %v3562_v11, %v429_v0  ;;  %v540_v18 = vmax.f32 %v486_v1, 0.0  ;;  %v499_v19 = vadd.f32 %v3562_v11, %v441_v63  ;;  %v329_v20 = vunpack.c.l.bf16 %v275_v8  ;;  %v3302_v45 = vld [vmem:[%s4540_s3 + $0x238] sm:$0xff] }
  0x43   : > { %4573 = vst [vmem:[#allocation4_spill] sm:$0xff] %v3811_v14  ;;  %v3816_v21 = vpack.c.b16 %v737_v60, %v736_v53  ;;  %v3818_v22 = vpack.c.b16 %v745_v3, %v744_v2  ;;  %v552_v23 = vmax.f32 %v498_v5, 0.0  ;;  %v511_v24 = vadd.f32 %v3562_v11, %v453_v7 }
  0x44   : > { %v564_v25 = vmax.f32 %v510_v9, 0.0  ;;  %v409_v26 = vmul.f32 %v3552_v4, %v329_v20  ;;  %v529_v27 = vmax.f32 %v475_v15, 0.0  ;;  %v582_v28 = vsel %vm382_vm0, %v528_v16, 0.0 }
  0x45   : > { %1573 = vmatpush.bf16.msrb.mxu2 %v3272_v34  ;;  %1806 = vmatpush.bf16.msrb.mxu3 %v3232_v35  ;;  %v3825_v29 = vadd.s32 16, %v3555_v6  ;;  %v541_v30 = vmax.f32 %v487_v17, 0.0  ;;  %v594_v31 = vsel %vm382_vm0, %v540_v18, 0.0  ;;  %v553_v34 = vmax.f32 %v499_v19, 0.0 }
  0x46   : > { %1484 = vmatpush.bf16.msrb.mxu1 %v3264_v50  ;;  %1895 = vmatpush.bf16.msrb.mxu0 %v3240_v51  ;;  %v467_v35 = vadd.f32 %v3562_v11, %v409_v26  ;;  %v606_v36 = vsel %vm382_vm0, %v552_v23, 0.0  ;;  %v565_v37 = vmax.f32 %v511_v24, 0.0  ;;  %v618_v41 = vsel %vm382_vm0, %v564_v25, 0.0  ;;  %v281_v26 = vld [vmem:[%s3547_s9 + $0x2c] sm:$0x1] }
  0x47   : > { %v636_v46 = vpack.c.bf16 %v582_v28, %v582_v28  ;;  %v637_v47 = vpack.c.bf16 %v529_v27, %v529_v27  ;;  %v648_v48 = vpack.c.bf16 %v594_v31, %v594_v31  ;;  %vm393_vm1 = vcmp.le.s32.totalorder %v3825_v29, 16 }
  0x48   : > { %v521_v44 = vmax.f32 %v467_v35, 0.0  ;;  %v649_v50 = vpack.c.bf16 %v541_v30, %v541_v30  ;;  %v660_v51 = vpack.c.bf16 %v606_v36, %v606_v36  ;;  %v661_v52 = vpack.c.bf16 %v553_v34, %v553_v34 }
  0x49   : > { %1574 = vmatpush.bf16.msrb.mxu2 %v3271_v58  ;;  %1807 = vmatpush.bf16.msrb.mxu3 %v3231_v59  ;;  %v672_v6 = vpack.c.bf16 %v618_v41, %v618_v41  ;;  %v673_v53 = vpack.c.bf16 %v565_v37, %v565_v37  ;;  %v332_v55 = vunpack.c.l.bf16 %v278_v49  ;;  %v722_v58 = vunpack.c.l.b16 %v636_v46 }
  0x4a   : > { %1485 = vmatpush.bf16.msrb.mxu1 %v3263_v10  ;;  %1896 = vmatpush.bf16.msrb.mxu0 %v3239_v12  ;;  %v575_v54 = vsel %vm393_vm1, %v521_v44, 0.0  ;;  %v723_v59 = vunpack.c.l.b16 %v637_v47  ;;  %v730_v60 = vunpack.c.l.b16 %v648_v48  ;;  %v731_v0 = vunpack.c.l.b16 %v649_v50 }
  0x4b   : > { %1407 = vmatmul.bf16.gmra.mxu0 %v3809_v13  ;;  %1427 = vmatmul.bf16.gmra.mxu1 %v3811_v14  ;;  %v738_v1 = vunpack.c.l.b16 %v660_v51  ;;  %v739_v63 = vunpack.c.l.b16 %v661_v52  ;;  %v746_v2 = vunpack.c.l.b16 %v672_v6  ;;  %v747_v3 = vunpack.c.l.b16 %v673_v53  ;;  %v3285_v6 = vld [vmem:[%s4540_s3 + $0x1b0] sm:$0xff] }
  0x4c   : > { %1447 = vmatmul.bf16.gmra.mxu2 %v3816_v21  ;;  %1467 = vmatmul.bf16.gmra.mxu3 %v3818_v22  ;;  %v629_v5 = vpack.c.bf16 %v575_v54, %v575_v54  ;;  %v3484_v7 = vmov 0.0|0.0   ;;  %v412_v9 = vmul.f32 %v3552_v4, %v332_v55  ;;  %v3855_v10 = vpack.c.b16 %v723_v59, %v722_v58  ;;  %v3293_v53 = vld [vmem:[%s4540_s3 + $0x1f0] sm:$0xff]  ;;  %v284_v59 = vld [vmem:[%s3547_s9 + $0x38] sm:$0x1] }
  0x4d   : > { %2260 = vmatpush.bf16.msra.mxu2 %v3286_v38  ;;  %2349 = vmatpush.bf16.msra.mxu3 %v3294_v39  ;;  %v714_v8 = vunpack.c.l.b16 %v3484_v7  ;;  %v3857_v12 = vpack.c.b16 %v731_v0, %v730_v60  ;;  %v3859_v15 = vpack.c.b16 %v739_v63, %v738_v1  ;;  %v3861_v16 = vpack.c.b16 %v747_v3, %v746_v2  ;;  %v3253_v54 = vld [vmem:[%s4540_s3 + $0xb0] sm:$0xff] }
  0x4e   : > { %1978 = vmatpush.bf16.msra.mxu1 %v3254_v40  ;;  %2438 = vmatpush.bf16.msra.mxu0 %v3302_v45  ;;  %4574 = vst [vmem:[#allocation5_spill] sm:$0xff] %v3855_v10  ;;  %v805_v17 = vunpack.c.l.b16 %v629_v5  ;;  %v470_v19 = vadd.f32 %v3562_v11, %v412_v9  ;;  %v856_v23 = vshll.u32 %v3620_v32, 16  ;;  %v854_v27 = vshrl.u32 %v3620_v32, 16  ;;  %v3301_v58 = vld [vmem:[%s4540_s3 + $0x230] sm:$0xff] }
  0x4f   : > { %4575 = vst [vmem:[#allocation6_spill] sm:$0xff] %v3857_v12  ;;  %v3863_v18 = vpack.c.b16 %v714_v8, %v714_v8  ;;  %v335_v36 = vunpack.c.l.bf16 %v281_v26  ;;  %v1079_v41 = vrot.slane %v3620_v32, 1  ;;  %v868_v52 = vshll.u32 %v3720_v56, 16 }
  0x50   : > { %v823_v20 = vpack.c.b16 %v805_v17, %v805_v17  ;;  %v524_v25 = vmax.f32 %v470_v19, 0.0  ;;  %v858_v28 = vrot.slane %v856_v23, 1  ;;  %v866_v60 = vshrl.u32 %v3720_v56, 16 }
  0x51   : > { %v844_v24 = vshll.u32 %v3863_v18, 16  ;;  %v842_v31 = vshrl.u32 %v3863_v18, 16  ;;  %v415_v45 = vmul.f32 %v3552_v4, %v335_v36  ;;  %2261 = vmatpush.bf16.msra.mxu2 %v3285_v6  ;;  %2350 = vmatpush.bf16.msra.mxu3 %v3293_v53  ;;  %v870_v0 = vrot.slane %v868_v52, 1  ;;  %v3284_v52 = vld [vmem:[%s4540_s3 + $0x1a8] sm:$0xff] }
  0x52   : > { %v861_v30 = vshll.u32 %v823_v20, 16  ;;  %v578_v35 = vsel %vm393_vm1, %v524_v25, 0.0  ;;  %v859_v37 = vor.u32 %v858_v28, %v854_v27  ;;  %v1080_v44 = vrot.slane %v823_v20, 1  ;;  %1979 = vmatpush.bf16.msra.mxu1 %v3253_v54  ;;  %2439 = vmatpush.bf16.msra.mxu0 %v3301_v58  ;;  %v287_v28 = vld [vmem:[%s3547_s9 + $0x44] sm:$0x1]  ;;  %v3292_v6 = vld [vmem:[%s4540_s3 + $0x1e8] sm:$0xff] }
  0x53   : > { %v846_v34 = vrot.slane %v844_v24, 1  ;;  %v632_v40 = vpack.c.bf16 %v578_v35, %v578_v35  ;;  %v473_v50 = vadd.f32 %v3562_v11, %v415_v45  ;;  %v338_v2 = vunpack.c.l.bf16 %v284_v59  ;;  %v290_v54 = vld [vmem:[%s3547_s9 + $0x50] sm:$0x1] }
  0x54   : > { %v863_v38 = vrot.slane %v861_v30, 1  ;;  %v3884_v49 = vsel %vm1075_vm3, %v1079_v41, %v1080_v44  ;;  %v871_v3 = vor.u32 %v870_v0, %v866_v60  ;;  %v1082_v8 = vrot.slane %v3720_v56, 1  ;;  %v3252_v60 = vld [vmem:[%s4540_s3 + $0xa8] sm:$0xff] }
  0x55   : > { %v847_v39 = vor.u32 %v846_v34, %v842_v31  ;;  %v806_v48 = vunpack.c.l.b16 %v632_v40  ;;  %v527_v55 = vmax.f32 %v473_v50, 0.0  ;;  %v418_v17 = vmul.f32 %v3552_v4, %v338_v2  ;;  %2262 = vmatpush.bf16.msra.mxu2 %v3284_v52  ;;  %2351 = vmatpush.bf16.msra.mxu3 %v3292_v6  ;;  %v3300_v0 = vld [vmem:[%s4540_s3 + $0x228] sm:$0xff] }
  0x56   : > { %v864_v46 = vsel %vm840_vm2, %v859_v37, %v863_v38  ;;  %v880_v26 = vshll.u32 %v3809_v13, 16  ;;  %v878_v30 = vshrl.u32 %v3809_v13, 16  ;;  %v341_v36 = vunpack.c.l.bf16 %v287_v28  ;;  %1980 = vmatpush.bf16.msra.mxu1 %v3252_v60  ;;  %2440 = vmatpush.bf16.msra.mxu0 %v3300_v0 }
  0x57   : > { %v3881_v47 = vsel %vm840_vm2, %v847_v39, %v846_v34  ;;  %v824_v51 = vpack.c.b16 %v806_v48, %v806_v48  ;;  %v581_v63 = vsel %vm393_vm1, %v527_v55, 0.0  ;;  %v476_v24 = vadd.f32 %v3562_v11, %v418_v17 }
  0x58   : > { %4576 = vst [vmem:[#allocation7_spill] sm:$0xff] %v3881_v47  ;;  %v635_v7 = vpack.c.bf16 %v581_v63, %v581_v63  ;;  %v882_v31 = vrot.slane %v880_v26, 1  ;;  %v1085_v40 = vrot.slane %v3809_v13, 1  ;;  %v890_v55 = vshrl.u32 %v3855_v10, 16 }
  0x59   : > { %v873_v1 = vshll.u32 %v824_v51, 16  ;;  %v1083_v9 = vrot.slane %v824_v51, 1  ;;  %v530_v27 = vmax.f32 %v476_v24, 0.0  ;;  %v892_v51 = vshll.u32 %v3855_v10, 16 }
  0x5a   : > { %v807_v20 = vunpack.c.l.b16 %v635_v7  ;;  %v883_v37 = vor.u32 %v882_v31, %v878_v30  ;;  %v344_v63 = vunpack.c.l.bf16 %v290_v54  ;;  %v1088_v7 = vrot.slane %v3855_v10, 1  ;;  %v293_v30 = vld [vmem:[%s3547_s9 + $0x5c] sm:$0x1] }
  0x5b   : > { %1412 = vmatmul.bf16.gmra.mxu0 %v3855_v10  ;;  %1432 = vmatmul.bf16.gmra.mxu1 %v3857_v12  ;;  %v875_v5 = vrot.slane %v873_v1, 1  ;;  %v3913_v23 = vsel %vm1075_vm3, %v1082_v8, %v1083_v9  ;;  %v584_v35 = vsel %vm393_vm1, %v530_v27, 0.0  ;;  %v894_v58 = vrot.slane %v892_v51, 1 }
  0x5c   : > { %1452 = vmatmul.bf16.gmra.mxu2 %v3859_v15  ;;  %1472 = vmatmul.bf16.gmra.mxu3 %v3861_v16  ;;  %v825_v25 = vpack.c.b16 %v807_v20, %v807_v20  ;;  %v638_v39 = vpack.c.bf16 %v584_v35, %v584_v35  ;;  %v424_v9 = vmul.f32 %v3552_v4, %v344_v63  ;;  %v904_v27 = vshll.u32 %v3622_v33, 16 }
  0x5d   : > { %v3910_v19 = vsel %vm840_vm2, %v871_v3, %v875_v5  ;;  %v895_v2 = vor.u32 %v894_v58, %v890_v55  ;;  %v902_v31 = vshrl.u32 %v3622_v33, 16  ;;  %v916_v54 = vshll.u32 %v3722_v57, 16  ;;  %v3283_v55 = vld [vmem:[%s4540_s3 + $0x1a0] sm:$0xff] }
  0x5e   : > { %v885_v34 = vshll.u32 %v825_v25, 16  ;;  %v1086_v41 = vrot.slane %v825_v25, 1  ;;  %v808_v45 = vunpack.c.l.b16 %v638_v39  ;;  %v482_v25 = vadd.f32 %v3562_v11, %v424_v9  ;;  %v3291_v58 = vld [vmem:[%s4540_s3 + $0x1e0] sm:$0xff]  ;;  %2263 = vmatpush.bf16.msra.mxu2 %v3283_v55 }
  0x5f   : > { %2352 = vmatpush.bf16.msra.mxu3 %v3291_v58 }
  0x60   : > { %v887_v38 = vrot.slane %v885_v34, 1  ;;  %v826_v50 = vpack.c.b16 %v808_v45, %v808_v45  ;;  %v536_v28 = vmax.f32 %v482_v25, 0.0  ;;  %v906_v34 = vrot.slane %v904_v27, 1 }
  0x62   : > { %v3927_v44 = vsel %vm840_vm2, %v883_v37, %v887_v38  ;;  %v897_v59 = vshll.u32 %v826_v50, 16  ;;  %v1089_v8 = vrot.slane %v826_v50, 1  ;;  %v347_v37 = vunpack.c.l.bf16 %v293_v30 }
  0x63   : > { %v907_v38 = vor.u32 %v906_v34, %v902_v31  ;;  %v4018_v31 = vld [vmem:[%s4538_s1] ss:$0 sm:$0xff] }
  0x64   : > { %v899_v3 = vrot.slane %v897_v59, 1  ;;  %v3960_v24 = vsel %vm1075_vm3, %v1088_v7, %v1089_v8  ;;  %v427_v45 = vmul.f32 %v3552_v4, %v347_v37  ;;  %v296_v59 = vld [vmem:[%s3547_s9 + $0x68] sm:$0x1]  ;;  %v3251_v7 = vld [vmem:[%s4540_s3 + $0xa0] sm:$0xff] }
  0x65   : > { %v3299_v8 = vld [vmem:[%s4540_s3 + $0x220] sm:$0xff]  ;;  %1981 = vmatpush.bf16.msra.mxu1 %v3251_v7 }
  0x66   : > { %v3957_v17 = vsel %vm840_vm2, %v895_v2, %v899_v3  ;;  %v914_v2 = vshrl.u32 %v3722_v57, 16  ;;  %v918_v3 = vrot.slane %v916_v54, 1  ;;  %2441 = vmatpush.bf16.msra.mxu0 %v3299_v8  ;;  %v299_v54 = vld [vmem:[%s3547_s9 + $0x74] sm:$0x1] }
  0x67   : > { %4577 = vst [vmem:[#allocation8_spill] sm:$0xff] %v3957_v17  ;;  %v353_v8 = vunpack.c.l.bf16 %v299_v54 }
  0x68   : > { %v919_v25 = vor.u32 %v918_v3, %v914_v2  ;;  %v926_v2 = vshrl.u32 %v3811_v14, 16 }
  0x6b   : > { %1486 = vmatmul.bf16.vlgmr.msrb.gmra.mxu1 %v864_v46  ;;  %1897 = vmatmul.bf16.vlgmr.msrb.gmra.mxu0 %v3881_v47 }
  0x6c   : > { %1575 = vmatmul.bf16.vlgmr.msrb.gmra.mxu2 %v3884_v49  ;;  %1808 = vmatmul.bf16.vlgmr.msrb.gmra.mxu3 %v3863_v18 }
  0x7b   : > { %1491 = vmatmul.bf16.gmra.mxu1 %v3910_v19  ;;  %1902 = vmatmul.bf16.gmra.mxu0 %v864_v46  ;;  %v3930_v46 = vsel %vm1075_vm3, %v1085_v40, %v1086_v41  ;;  %v1091_v41 = vrot.slane %v3622_v33, 1 }
  0x7c   : > { %1580 = vmatmul.bf16.gmra.mxu2 %v3913_v23  ;;  %1813 = vmatmul.bf16.gmra.mxu3 %v3620_v32  ;;  %v421_v32 = vmul.f32 %v3552_v4, %v341_v36  ;;  %v590_v36 = vsel %vm393_vm1, %v536_v28, 0.0  ;;  %v1094_v28 = vrot.slane %v3722_v57, 1 }
  0x7d   : > { %v644_v40 = vpack.c.bf16 %v590_v36, %v590_v36 }
  0x7e   : > { %v479_v48 = vadd.f32 %v3562_v11, %v421_v32 }
  0x7f   : > { %v810_v52 = vunpack.c.l.b16 %v644_v40 }
  0x80   : > { %v533_v53 = vmax.f32 %v479_v48, 0.0 }
  0x81   : > { %v828_v4 = vpack.c.b16 %v810_v52, %v810_v52 }
  0x82   : > { %v587_v1 = vsel %vm393_vm1, %v533_v53, 0.0  ;;  %v485_v53 = vadd.f32 %v3562_v11, %v427_v45 }
  0x83   : > { %v641_v5 = vpack.c.bf16 %v587_v1, %v587_v1  ;;  %v1095_v30 = vrot.slane %v828_v4, 1 }
  0x84   : > { %v539_v11 = vmax.f32 %v485_v53, 0.0  ;;  %v928_v53 = vshll.u32 %v3811_v14, 16 }
  0x85   : > { %v809_v20 = vunpack.c.l.b16 %v641_v5  ;;  %v921_v5 = vshll.u32 %v828_v4, 16 }
  0x86   : > { %v593_v9 = vsel %vm393_vm1, %v539_v11, 0.0  ;;  %v930_v3 = vrot.slane %v928_v53, 1 }
  0x87   : > { %v827_v26 = vpack.c.b16 %v809_v20, %v809_v20  ;;  %v350_v20 = vunpack.c.l.bf16 %v296_v59  ;;  %v647_v27 = vpack.c.bf16 %v593_v9, %v593_v9 }
  0x88   : > { %v931_v9 = vor.u32 %v930_v3, %v926_v2  ;;  %v940_v3 = vshll.u32 %v3857_v12, 16 }
  0x89   : > { %v909_v35 = vshll.u32 %v827_v26, 16  ;;  %v1092_v32 = vrot.slane %v827_v26, 1  ;;  %v923_v26 = vrot.slane %v921_v5, 1  ;;  %v430_v34 = vmul.f32 %v4018_v31, %v350_v20 }
  0x8a   : > { %v811_v40 = vunpack.c.l.b16 %v647_v27 }
  0x8b   : > { %1496 = vmatmul.bf16.gmra.mxu1 %v3927_v44  ;;  %1907 = vmatmul.bf16.gmra.mxu0 %v3910_v19  ;;  %v911_v39 = vrot.slane %v909_v35, 1  ;;  %v3982_v6 = vsel %vm1075_vm3, %v1091_v41, %v1092_v32  ;;  %v4033_v41 = vsel %vm1075_vm3, %v1094_v28, %v1095_v30  ;;  %v4038_v32 = vld [vmem:[%s4539_s2] ss:$0 sm:$0xff]  ;;  %v433_v28 = vmul.f32 %v4018_v31, %v353_v8 }
  0x8c   : > { %1585 = vmatmul.bf16.gmra.mxu2 %v3930_v46  ;;  %1818 = vmatmul.bf16.gmra.mxu3 %v3720_v56  ;;  %4579 = vst [vmem:[#allocation10_spill] sm:$0xff] %v3982_v6  ;;  %v488_v45 = vadd.f32 %v4038_v32, %v430_v34  ;;  %v829_v52 = vpack.c.b16 %v811_v40, %v811_v40 }
  0x8d   : > { %v3979_v51 = vsel %vm840_vm2, %v907_v38, %v911_v39  ;;  %v4030_v39 = vsel %vm840_vm2, %v919_v25, %v923_v26  ;;  %4583 = vst [vmem:[#allocation14_spill] sm:$0xff] %v4033_v41  ;;  %v1097_v26 = vrot.slane %v3811_v14, 1 }
  0x8e   : > { %4578 = vst [vmem:[#allocation9_spill] sm:$0xff] %v3979_v51  ;;  %v542_v4 = vmax.f32 %v488_v45, 0.0  ;;  %v933_v5 = vshll.u32 %v829_v52, 16  ;;  %v1098_v27 = vrot.slane %v829_v52, 1  ;;  %v491_v52 = vadd.f32 %v4038_v32, %v433_v28 }
  0x8f   : > { %4582 = vst [vmem:[#allocation13_spill] sm:$0xff] %v4030_v39  ;;  %v938_v28 = vshrl.u32 %v3857_v12, 16 }
  0x90   : > { %v596_v7 = vsel %vm393_vm1, %v542_v4, 0.0  ;;  %v935_v20 = vrot.slane %v933_v5, 1  ;;  %v4072_v54 = vsel %vm1075_vm3, %v1097_v26, %v1098_v27  ;;  %v3282_v5 = vld [vmem:[%s4540_s3 + $0x198] sm:$0xff]  ;;  %v545_v8 = vmax.f32 %v491_v52, 0.0 }
  0x91   : > { %v650_v25 = vpack.c.bf16 %v596_v7, %v596_v7  ;;  %4587 = vst [vmem:[#allocation18_spill] sm:$0xff] %v4072_v54  ;;  %v3290_v7 = vld [vmem:[%s4540_s3 + $0x1d8] sm:$0xff]  ;;  %2264 = vmatpush.bf16.msra.mxu2 %v3282_v5 }
  0x92   : > { %v4069_v53 = vsel %vm840_vm2, %v931_v9, %v935_v20  ;;  %2353 = vmatpush.bf16.msra.mxu3 %v3290_v7  ;;  %v302_v9 = vld [vmem:[%s3547_s9 + $0x80] sm:$0x1]  ;;  %v3250_v52 = vld [vmem:[%s4540_s3 + $0x98] sm:$0xff] }
  0x93   : > { %4586 = vst [vmem:[#allocation17_spill] sm:$0xff] %v4069_v53  ;;  %v812_v4 = vunpack.c.l.b16 %v650_v25  ;;  %v3298_v5 = vld [vmem:[%s4540_s3 + $0x218] sm:$0xff]  ;;  %1982 = vmatpush.bf16.msra.mxu1 %v3250_v52 }
  0x94   : > { %2442 = vmatpush.bf16.msra.mxu0 %v3298_v5 }
  0x95   : > { %v830_v2 = vpack.c.b16 %v812_v4, %v812_v4  ;;  %v942_v4 = vrot.slane %v940_v3, 1  ;;  %v1100_v3 = vrot.slane %v3857_v12, 1 }
  0x97   : > { %v945_v47 = vshll.u32 %v830_v2, 16  ;;  %v943_v7 = vor.u32 %v942_v4, %v938_v28  ;;  %v952_v4 = vshll.u32 %v3634_v42, 16 }
  0x9b   : > { %1501 = vmatmul.bf16.gmra.mxu1 %v3957_v17  ;;  %1912 = vmatmul.bf16.gmra.mxu0 %v3927_v44 }
  0x9c   : > { %1590 = vmatmul.bf16.gmra.mxu2 %v3960_v24  ;;  %1823 = vmatmul.bf16.gmra.mxu3 %v3809_v13 }
  0xa8   : > { %v3974_v48 = vpop.f32.mrf.mxu0  ;;  %v3976_v50 = vpop.f32.mrf.mxu1 }
  0xab   : > { %1506 = vmatmul.bf16.gmra.mxu1 %v3979_v51  ;;  %1917 = vmatmul.bf16.gmra.mxu0 %v3957_v17 }
  0xac   : > { %1595 = vmatmul.bf16.gmra.mxu2 %v3982_v6  ;;  %1828 = vmatmul.bf16.gmra.mxu3 %v3855_v10 }
  0xaf   : > { %v3997_v60 = vpop.f32.mrf.mxu2  ;;  %v3999_v0 = vpop.f32.mrf.mxu3 }
  0xb0   : > { %4580 = vst [vmem:[#allocation11_spill] sm:$0xff] %v3999_v0  ;;  %v4001_v1 = vpop.f32.mrf.mxu0  ;;  %v4003_v63 = vpop.f32.mrf.mxu1 }
  0xb7   : > { %v4021_v35 = vpop.f32.mrf.mxu2  ;;  %v4023_v36 = vpop.f32.mrf.mxu3 }
  0xb8   : > { %4581 = vst [vmem:[#allocation12_spill] sm:$0xff] %v4023_v36  ;;  %v4025_v37 = vpop.f32.mrf.mxu0  ;;  %v4027_v38 = vpop.f32.mrf.mxu1  ;;  %v1101_v36 = vrot.slane %v830_v2, 1 }
  0xbb   : > { %1511 = vmatmul.bf16.gmra.mxu1 %v4030_v39  ;;  %1922 = vmatmul.bf16.gmra.mxu0 %v3979_v51 }
  0xbc   : > { %1600 = vmatmul.bf16.gmra.mxu2 %v4033_v41  ;;  %1833 = vmatmul.bf16.gmra.mxu3 %v3622_v33  ;;  %v1103_v41 = vrot.slane %v3634_v42, 1 }
  0xbf   : > { %v4047_v55 = vpop.f32.mrf.mxu2  ;;  %v4049_v58 = vpop.f32.mrf.mxu3 }
  0xc0   : > { %4584 = vst [vmem:[#allocation15_spill] sm:$0xff] %v4049_v58  ;;  %v4051_v11 = vpop.f32.mrf.mxu0  ;;  %v4053_v59 = vpop.f32.mrf.mxu1  ;;  %v356_v58 = vunpack.c.l.bf16 %v302_v9 }
  0xc2   : > { %v436_v0 = vmul.f32 %v4018_v31, %v356_v58 }
  0xc4   : > { %v494_v2 = vadd.f32 %v4038_v32, %v436_v0 }
  0xc6   : > { %v548_v52 = vmax.f32 %v494_v2, 0.0 }
  0xc7   : > { %v4060_v30 = vpop.f32.mrf.mxu2  ;;  %v4062_v34 = vpop.f32.mrf.mxu3 }
  0xc8   : > { %4585 = vst [vmem:[#allocation16_spill] sm:$0xff] %v4062_v34  ;;  %v4064_v40 = vpop.f32.mrf.mxu0  ;;  %v4066_v45 = vpop.f32.mrf.mxu1  ;;  %v599_v34 = vsel %vm393_vm1, %v545_v8, 0.0 }
  0xcb   : > { %1516 = vmatmul.bf16.gmra.mxu1 %v4069_v53  ;;  %1927 = vmatmul.bf16.gmra.mxu0 %v4030_v39 }
  0xcc   : > { %1605 = vmatmul.bf16.gmra.mxu2 %v4072_v54  ;;  %1838 = vmatmul.bf16.gmra.mxu3 %v3722_v57  ;;  %v653_v54 = vpack.c.bf16 %v599_v34, %v599_v34  ;;  %v4118_v34 = vsel %vm1075_vm3, %v1100_v3, %v1101_v36  ;;  %v954_v3 = vrot.slane %v952_v4, 1 }
  0xcd   : > { %4593 = vst [vmem:[#allocation24_spill] sm:$0xff] %v4118_v34 }
  0xcf   : > { %v4087_v20 = vpop.f32.mrf.mxu2  ;;  %v4089_v25 = vpop.f32.mrf.mxu3 }
  0xd0   : > { %4588 = vst [vmem:[#allocation19_spill] sm:$0xff] %v4087_v20  ;;  %v4091_v26 = vpop.f32.mrf.mxu0  ;;  %v4093_v27 = vpop.f32.mrf.mxu1 }
  0xd1   : > { %4589 = vst [vmem:[#allocation20_spill] sm:$0xff] %v4089_v25  ;;  %v947_v25 = vrot.slane %v945_v47, 1  ;;  %v813_v47 = vunpack.c.l.b16 %v653_v54 }
  0xd3   : > { %v4115_v28 = vsel %vm840_vm2, %v943_v7, %v947_v25  ;;  %v831_v58 = vpack.c.b16 %v813_v47, %v813_v47  ;;  %v305_v25 = vld [vmem:[%s3547_s9 + $0x8c] sm:$0x1]  ;;  %v950_v7 = vshrl.u32 %v3634_v42, 16 }
  0xd4   : > { %4592 = vst [vmem:[#allocation23_spill] sm:$0xff] %v4115_v28  ;;  %v359_v47 = vunpack.c.l.bf16 %v305_v25 }
  0xd7   : > { %v4106_v8 = vpop.f32.mrf.mxu2  ;;  %v4108_v9 = vpop.f32.mrf.mxu3 }
  0xd8   : > { %4590 = vst [vmem:[#allocation21_spill] sm:$0xff] %v4106_v8  ;;  %v4110_v39 = vpop.f32.mrf.mxu0  ;;  %v4112_v57 = vpop.f32.mrf.mxu1 }
  0xd9   : > { %4591 = vst [vmem:[#allocation22_spill] sm:$0xff] %v4108_v9  ;;  %v957_v9 = vshll.u32 %v831_v58, 16 }
  0xdb   : > { %1521 = vmatmul.bf16.gmra.mxu1 %v4115_v28  ;;  %1932 = vmatmul.bf16.gmra.mxu0 %v4069_v53  ;;  %v955_v53 = vor.u32 %v954_v3, %v950_v7 }
  0xdc   : > { %1610 = vmatmul.bf16.gmra.mxu2 %v4118_v34  ;;  %1843 = vmatmul.bf16.gmra.mxu3 %v3811_v14  ;;  %v602_v34 = vsel %vm393_vm1, %v548_v52, 0.0  ;;  %v959_v14 = vrot.slane %v957_v9, 1 }
  0xdd   : > { %v656_v2 = vpack.c.bf16 %v602_v34, %v602_v34 }
  0xde   : > { %v4145_v4 = vsel %vm840_vm2, %v955_v53, %v959_v14  ;;  %v964_v14 = vshll.u32 %v3728_v61, 16  ;;  %v308_v53 = vld [vmem:[%s3547_s9 + $0x98] sm:$0x1] }
  0xdf   : > { %v4127_v5 = vpop.f32.mrf.mxu2  ;;  %v4129_v54 = vpop.f32.mrf.mxu3  ;;  %4598 = vst [vmem:[#allocation29_spill] sm:$0xff] %v4145_v4  ;;  %v814_v52 = vunpack.c.l.b16 %v656_v2  ;;  %v962_v2 = vshrl.u32 %v3728_v61, 16 }
  0xe0   : > { %4594 = vst [vmem:[#allocation25_spill] sm:$0xff] %v4127_v5  ;;  %v4131_v36 = vpop.f32.mrf.mxu0  ;;  %v4133_v0 = vpop.f32.mrf.mxu1  ;;  %v1104_v5 = vrot.slane %v831_v58, 1 }
  0xe1   : > { %4595 = vst [vmem:[#allocation26_spill] sm:$0xff] %v4129_v54  ;;  %v439_v54 = vmul.f32 %v4018_v31, %v359_v47  ;;  %v832_v58 = vpack.c.b16 %v814_v52, %v814_v52  ;;  %v966_v52 = vrot.slane %v964_v14, 1 }
  0xe2   : > { %v4149_v9 = vsel %vm1075_vm3, %v1103_v41, %v1104_v5 }
  0xe3   : > { %4599 = vst [vmem:[#allocation30_spill] sm:$0xff] %v4149_v9  ;;  %v497_v34 = vadd.f32 %v4038_v32, %v439_v54 }
  0xe5   : > { %v551_v41 = vmax.f32 %v497_v34, 0.0  ;;  %v3249_v34 = vld [vmem:[%s4540_s3 + $0x90] sm:$0xff] }
  0xe6   : > { %1983 = vmatpush.bf16.msra.mxu1 %v3249_v34 }
  0xe7   : > { %v4140_v51 = vpop.f32.mrf.mxu2  ;;  %v4142_v33 = vpop.f32.mrf.mxu3 }
  0xe8   : > { %4596 = vst [vmem:[#allocation27_spill] sm:$0xff] %v4140_v51  ;;  %v1487_v6 = vpop.f32.mrf.mxu1  ;;  %v1898_v8 = vpop.f32.mrf.mxu0 }
  0xe9   : > { %4597 = vst [vmem:[#allocation28_spill] sm:$0xff] %v4142_v33  ;;  %v1488_v25 = vadd.f32 %v1487_v6, %v3974_v48  ;;  %v3281_v48 = vld [vmem:[%s4540_s3 + $0x190] sm:$0xff]  ;;  %v969_v33 = vshll.u32 %v832_v58, 16 }
  0xea   : > { %v3289_v6 = vld [vmem:[%s4540_s3 + $0x1d0] sm:$0xff]  ;;  %2265 = vmatpush.bf16.msra.mxu2 %v3281_v48  ;;  %v967_v48 = vor.u32 %v966_v52, %v962_v2 }
  0xeb   : > { %1526 = vmatmul.bf16.gmra.mxu1 %v4145_v4  ;;  %1937 = vmatmul.bf16.gmra.mxu0 %v4115_v28  ;;  %v605_v28 = vsel %vm393_vm1, %v551_v41, 0.0  ;;  %v1107_v41 = vrot.slane %v832_v58, 1 }
  0xec   : > { %1615 = vmatmul.bf16.gmra.mxu2 %v4149_v9  ;;  %1848 = vmatmul.bf16.gmra.mxu3 %v3857_v12  ;;  %v362_v12 = vunpack.c.l.bf16 %v308_v53 }
  0xed   : > { %2354 = vmatpush.bf16.msra.mxu3 %v3289_v6  ;;  %v971_v6 = vrot.slane %v969_v33, 1 }
  0xee   : > { %v442_v53 = vmul.f32 %v4018_v31, %v362_v12 }
  0xef   : > { %v1576_v5 = vpop.f32.mrf.mxu2  ;;  %v1809_v54 = vpop.f32.mrf.mxu3  ;;  %v4179_v10 = vsel %vm840_vm2, %v967_v48, %v971_v6 }
  0xf0   : > { %v1577_v7 = vadd.f32 %v1576_v5, %v1488_v25  ;;  %v1489_v3 = vpop.f32.mrf.mxu1  ;;  %v1900_v47 = vpop.f32.mrf.mxu0  ;;  %v3297_v25 = vld [vmem:[%s4540_s3 + $0x210] sm:$0xff]  ;;  %v659_v5 = vpack.c.bf16 %v605_v28, %v605_v28 }
  0xf1   : > { %v1490_v9 = vadd.f32 %v1489_v3, %v4001_v1  ;;  %2443 = vmatpush.bf16.msra.mxu0 %v3297_v25  ;;  %v1106_v1 = vrot.slane %v3728_v61, 1 }
  0xf2   : > { %v1810_v51 = vadd.f32 %v1809_v54, %v1577_v7  ;;  %v815_v33 = vunpack.c.l.b16 %v659_v5  ;;  %v974_v5 = vshrl.u32 %v3816_v21, 16 }
  0xf4   : > { %v4174_v14 = vadd.f32 %v1898_v8, %v1810_v51  ;;  %v4183_v51 = vsel %vm1075_vm3, %v1106_v1, %v1107_v41  ;;  %v500_v8 = vadd.f32 %v4038_v32, %v442_v53  ;;  %v833_v12 = vpack.c.b16 %v815_v33, %v815_v33 }
  0xf5   : > { %4601 = vst [vmem:[#allocation32_spill] sm:$0xff] %v4183_v51 }
  0xf6   : > { %4600 = vst [vmem:[#allocation31_spill] sm:$0xff] %v4174_v14  ;;  %v981_v41 = vshll.u32 %v833_v12, 16 }
  0xf7   : > { %v1578_v54 = vpop.f32.mrf.mxu2  ;;  %v1811_v7 = vpop.f32.mrf.mxu3 }
  0xf8   : > { %v1579_v3 = vadd.f32 %v1578_v54, %v1490_v9  ;;  %v1492_v20 = vpop.f32.mrf.mxu1  ;;  %v1903_v17 = vpop.f32.mrf.mxu0  ;;  %v976_v9 = vshll.u32 %v3816_v21, 16  ;;  %v983_v33 = vrot.slane %v981_v41, 1 }
  0xf9   : > { %v1493_v28 = vadd.f32 %v1492_v20, %v4025_v37  ;;  %v554_v37 = vmax.f32 %v500_v8, 0.0  ;;  %v311_v20 = vld [vmem:[%s3547_s9 + $0xa4] sm:$0x1] }
  0xfa   : > { %v1812_v58 = vadd.f32 %v1811_v7, %v1579_v3  ;;  %v978_v1 = vrot.slane %v976_v9, 1  ;;  %v365_v7 = vunpack.c.l.bf16 %v311_v20 }
  0xfb   : > { %1531 = vmatmul.bf16.gmra.mxu1 %v4179_v10  ;;  %1942 = vmatmul.bf16.gmra.mxu0 %v4145_v4  ;;  %v608_v54 = vsel %vm393_vm1, %v554_v37, 0.0 }
  0xfc   : > { %1620 = vmatmul.bf16.gmra.mxu2 %v4183_v51  ;;  %1853 = vmatmul.bf16.gmra.mxu3 %v3634_v42  ;;  %v4191_v2 = vadd.f32 %v1900_v47, %v1812_v58  ;;  %v979_v47 = vor.u32 %v978_v1, %v974_v5  ;;  %v662_v8 = vpack.c.bf16 %v608_v54, %v608_v54  ;;  %v314_v5 = vld [vmem:[%s3547_s9 + $0xb0] sm:$0x1] }
  0xfe   : > { %4602 = vst [vmem:[#allocation33_spill] sm:$0xff] %v4191_v2  ;;  %v445_v2 = vmul.f32 %v4018_v31, %v365_v7  ;;  %v816_v37 = vunpack.c.l.b16 %v662_v8 }
  0xff   : > { %v1581_v52 = vpop.f32.mrf.mxu2  ;;  %v1814_v34 = vpop.f32.mrf.mxu3 }
 0x100   : > { %v1582_v25 = vadd.f32 %v1581_v52, %v1493_v28  ;;  %v1494_v48 = vpop.f32.mrf.mxu1  ;;  %v1905_v6 = vpop.f32.mrf.mxu0  ;;  %v1109_v28 = vrot.slane %v3816_v21, 1  ;;  %v1110_v52 = vrot.slane %v833_v12, 1 }
 0x101   : > { %v1495_v53 = vadd.f32 %v1494_v48, %v4051_v11  ;;  %v4203_v48 = vsel %vm840_vm2, %v979_v47, %v983_v33 }
 0x102   : > { %v1815_v3 = vadd.f32 %v1814_v34, %v1582_v25  ;;  %v503_v34 = vadd.f32 %v4038_v32, %v445_v2  ;;  %v988_v25 = vshll.u32 %v3859_v15, 16 }
 0x104   : > { %v4198_v58 = vadd.f32 %v1903_v17, %v1815_v3  ;;  %v4207_v17 = vsel %vm1075_vm3, %v1109_v28, %v1110_v52  ;;  %v557_v2 = vmax.f32 %v503_v34, 0.0  ;;  %v986_v3 = vshrl.u32 %v3859_v15, 16 }
 0x105   : > { %v990_v47 = vrot.slane %v988_v25, 1 }
 0x106   : > { %v611_v28 = vsel %vm393_vm1, %v557_v2, 0.0 }
 0x107   : > { %v1583_v14 = vpop.f32.mrf.mxu2  ;;  %v1816_v9 = vpop.f32.mrf.mxu3 }
 0x108   : > { %v1584_v51 = vadd.f32 %v1583_v14, %v1495_v53  ;;  %v1497_v4 = vpop.f32.mrf.mxu1  ;;  %v1908_v11 = vpop.f32.mrf.mxu0  ;;  %v834_v14 = vpack.c.b16 %v816_v37, %v816_v37  ;;  %v3296_v37 = vld [vmem:[%s4540_s3 + $0x208] sm:$0xff] }
 0x109   : > { %v1498_v20 = vadd.f32 %v1497_v4, %v4064_v40  ;;  %v3280_v40 = vld [vmem:[%s4540_s3 + $0x188] sm:$0xff]  ;;  %2444 = vmatpush.bf16.msra.mxu0 %v3296_v37 }
 0x10a   : > { %v1817_v12 = vadd.f32 %v1816_v9, %v1584_v51  ;;  %v3288_v4 = vld [vmem:[%s4540_s3 + $0x1c8] sm:$0xff]  ;;  %2266 = vmatpush.bf16.msra.mxu2 %v3280_v40  ;;  %v993_v33 = vshll.u32 %v834_v14, 16  ;;  %v1113_v40 = vrot.slane %v834_v14, 1 }
 0x10b   : > { %1536 = vmatmul.bf16.gmra.mxu1 %v4203_v48  ;;  %1947 = vmatmul.bf16.gmra.mxu0 %v4179_v10  ;;  %v3248_v9 = vld [vmem:[%s4540_s3 + $0x88] sm:$0xff] }
 0x10c   : > { %1625 = vmatmul.bf16.gmra.mxu2 %v4207_v17  ;;  %1858 = vmatmul.bf16.gmra.mxu3 %v3728_v61  ;;  %v4221_v51 = vadd.f32 %v1905_v6, %v1817_v12  ;;  %v368_v6 = vunpack.c.l.bf16 %v314_v5  ;;  %v995_v34 = vrot.slane %v993_v33, 1  ;;  %v665_v12 = vpack.c.bf16 %v611_v28, %v611_v28 }
 0x10d   : > { %2355 = vmatpush.bf16.msra.mxu3 %v3288_v4  ;;  %1984 = vmatpush.bf16.msra.mxu1 %v3248_v9  ;;  %v1000_v28 = vshll.u32 %v3636_v43, 16 }
 0x10e   : > { %4603 = vst [vmem:[#allocation34_spill] sm:$0xff] %v4221_v51  ;;  %v448_v4 = vmul.f32 %v4018_v31, %v368_v6 }
 0x10f   : > { %v1586_v1 = vpop.f32.mrf.mxu2  ;;  %v1819_v41 = vpop.f32.mrf.mxu3 }
 0x110   : > { %v1587_v53 = vadd.f32 %v1586_v1, %v1498_v20  ;;  %v1499_v54 = vpop.f32.mrf.mxu1  ;;  %v1910_v7 = vpop.f32.mrf.mxu0  ;;  %v991_v20 = vor.u32 %v990_v47, %v986_v3  ;;  %v817_v3 = vunpack.c.l.b16 %v665_v12  ;;  %v506_v33 = vadd.f32 %v4038_v32, %v448_v4 }
 0x111   : > { %v1500_v8 = vadd.f32 %v1499_v54, %v4091_v26  ;;  %v1112_v26 = vrot.slane %v3859_v15, 1 }
 0x112   : > { %v1820_v52 = vadd.f32 %v1819_v41, %v1587_v53  ;;  %v4239_v54 = vsel %vm840_vm2, %v991_v20, %v995_v34 }
 0x114   : > { %v4234_v25 = vadd.f32 %v1908_v11, %v1820_v52  ;;  %v4243_v11 = vsel %vm1075_vm3, %v1112_v26, %v1113_v40  ;;  %v317_v52 = vld [vmem:[%s3547_s9 + $0xbc] sm:$0x1]  ;;  %v998_v26 = vshrl.u32 %v3636_v43, 16  ;;  %v1002_v40 = vrot.slane %v1000_v28, 1 }
 0x115   : > { %4605 = vst [vmem:[#allocation36_spill] sm:$0xff] %v4243_v11 }
 0x116   : > { %4604 = vst [vmem:[#allocation35_spill] sm:$0xff] %v4234_v25 }
 0x117   : > { %v1588_v2 = vpop.f32.mrf.mxu2  ;;  %v1821_v5 = vpop.f32.mrf.mxu3 }
 0x118   : > { %v1589_v1 = vadd.f32 %v1588_v2, %v1500_v8  ;;  %v1502_v41 = vpop.f32.mrf.mxu1  ;;  %v1913_v53 = vpop.f32.mrf.mxu0  ;;  %v835_v8 = vpack.c.b16 %v817_v3, %v817_v3 }
 0x119   : > { %v1503_v47 = vadd.f32 %v1502_v41, %v4110_v39  ;;  %v560_v39 = vmax.f32 %v506_v33, 0.0 }
 0x11a   : > { %v1822_v14 = vadd.f32 %v1821_v5, %v1589_v1  ;;  %v1005_v4 = vshll.u32 %v835_v8, 16  ;;  %v371_v1 = vunpack.c.l.bf16 %v317_v52 }
 0x11b   : > { %1541 = vmatmul.bf16.gmra.mxu1 %v4239_v54  ;;  %1952 = vmatmul.bf16.gmra.mxu0 %v4203_v48  ;;  %v614_v5 = vsel %vm393_vm1, %v560_v39, 0.0 }
 0x11c   : > { %1630 = vmatmul.bf16.gmra.mxu2 %v4243_v11  ;;  %1863 = vmatmul.bf16.gmra.mxu3 %v3816_v21  ;;  %v4251_v6 = vadd.f32 %v1910_v7, %v1822_v14  ;;  %v1003_v7 = vor.u32 %v1002_v40, %v998_v26  ;;  %v1007_v3 = vrot.slane %v1005_v4, 1  ;;  %v668_v33 = vpack.c.bf16 %v614_v5, %v614_v5  ;;  %v320_v4 = vld [vmem:[%s3547_s9 + $0xc8] sm:$0x1] }
 0x11e   : > { %4606 = vst [vmem:[#allocation37_spill] sm:$0xff] %v4251_v6  ;;  %v451_v6 = vmul.f32 %v4018_v31, %v371_v1  ;;  %v818_v39 = vunpack.c.l.b16 %v668_v33 }
 0x11f   : > { %v1591_v9 = vpop.f32.mrf.mxu2  ;;  %v1824_v37 = vpop.f32.mrf.mxu3 }
 0x120   : > { %v1592_v20 = vadd.f32 %v1591_v9, %v1503_v47  ;;  %v1504_v34 = vpop.f32.mrf.mxu1  ;;  %v1915_v12 = vpop.f32.mrf.mxu0  ;;  %v1115_v47 = vrot.slane %v3636_v43, 1  ;;  %v1116_v9 = vrot.slane %v835_v8, 1  ;;  %v1012_v8 = vshll.u32 %v3730_v62, 16 }
 0x121   : > { %v1505_v2 = vadd.f32 %v1504_v34, %v4131_v36  ;;  %v4263_v34 = vsel %vm840_vm2, %v1003_v7, %v1007_v3  ;;  %v1010_v3 = vshrl.u32 %v3730_v62, 16 }
 0x122   : > { %v1825_v41 = vadd.f32 %v1824_v37, %v1592_v20  ;;  %v4266_v52 = vsel %vm1075_vm3, %v1115_v47, %v1116_v9  ;;  %v3279_v20 = vld [vmem:[%s4540_s3 + $0x180] sm:$0xff]  ;;  %v1014_v33 = vrot.slane %v1012_v8, 1 }
 0x123   : > { %2267 = vmatpush.bf16.msra.mxu2 %v3279_v20  ;;  %v1118_v20 = vrot.slane %v3730_v62, 1 }
 0x124   : > { %v4258_v14 = vadd.f32 %v1913_v53, %v1825_v41  ;;  %v509_v53 = vadd.f32 %v4038_v32, %v451_v6  ;;  %v3287_v6 = vld [vmem:[%s4540_s3 + $0x1c0] sm:$0xff] }
 0x125   : > { %2356 = vmatpush.bf16.msra.mxu3 %v3287_v6 }
 0x126   : > { %v563_v26 = vmax.f32 %v509_v53, 0.0 }
 0x127   : > { %v1593_v25 = vpop.f32.mrf.mxu2  ;;  %v1826_v28 = vpop.f32.mrf.mxu3 }
 0x128   : > { %v1594_v11 = vadd.f32 %v1593_v25, %v1505_v2  ;;  %v1507_v51 = vpop.f32.mrf.mxu1  ;;  %v1918_v36 = vpop.f32.mrf.mxu0  ;;  %v836_v25 = vpack.c.b16 %v818_v39, %v818_v39  ;;  %v617_v9 = vsel %vm393_vm1, %v563_v26, 0.0  ;;  %v1015_v39 = vor.u32 %v1014_v33, %v1010_v3 }
 0x129   : > { %v1508_v40 = vadd.f32 %v1507_v51, %v3976_v50  ;;  %v3247_v50 = vld [vmem:[%s4540_s3 + $0x80] sm:$0xff] }
 0x12a   : > { %v1827_v37 = vadd.f32 %v1826_v28, %v1594_v11  ;;  %v1017_v47 = vshll.u32 %v836_v25, 16  ;;  %v3295_v51 = vld [vmem:[%s4540_s3 + $0x200] sm:$0xff]  ;;  %1985 = vmatpush.bf16.msra.mxu1 %v3247_v50  ;;  %v1119_v6 = vrot.slane %v836_v25, 1 }
 0x12b   : > { %1546 = vmatmul.bf16.gmra.mxu1 %v4263_v34  ;;  %1957 = vmatmul.bf16.gmra.mxu0 %v4239_v54 }
 0x12c   : > { %1635 = vmatmul.bf16.gmra.mxu2 %v4266_v52  ;;  %1868 = vmatmul.bf16.gmra.mxu3 %v3859_v15  ;;  %v4280_v11 = vadd.f32 %v1915_v12, %v1827_v37  ;;  %v374_v12 = vunpack.c.l.bf16 %v320_v4  ;;  %v1019_v53 = vrot.slane %v1017_v47, 1  ;;  %v671_v37 = vpack.c.bf16 %v617_v9, %v617_v9 }
 0x12d   : > { %2445 = vmatpush.bf16.msra.mxu0 %v3295_v51  ;;  %v4302_v47 = vsel %vm1075_vm3, %v1118_v20, %v1119_v6 }
 0x12e   : > { %4607 = vst [vmem:[#allocation38_spill] sm:$0xff] %v4280_v11  ;;  %v454_v26 = vmul.f32 %v4018_v31, %v374_v12  ;;  %v4299_v3 = vsel %vm840_vm2, %v1015_v39, %v1019_v53  ;;  %v819_v33 = vunpack.c.l.b16 %v671_v37  ;;  %v1024_v31 = vshll.u32 %v3818_v22, 16 }
 0x12f   : > { %v1596_v2 = vpop.f32.mrf.mxu2  ;;  %v1829_v5 = vpop.f32.mrf.mxu3  ;;  %v1022_v53 = vshrl.u32 %v3818_v22, 16 }
 0x130   : > { %v1597_v1 = vadd.f32 %v1596_v2, %v1508_v40  ;;  %v1509_v41 = vpop.f32.mrf.mxu1  ;;  %v1920_v7 = vpop.f32.mrf.mxu0  ;;  %v1026_v37 = vrot.slane %v1024_v31, 1 }
 0x131   : > { %v1510_v40 = vadd.f32 %v1509_v41, %v4003_v63  ;;  %v837_v63 = vpack.c.b16 %v819_v33, %v819_v33 }
 0x132   : > { %v1830_v28 = vadd.f32 %v1829_v5, %v1597_v1 }
 0x133   : > { %v1029_v20 = vshll.u32 %v837_v63, 16 }
 0x134   : > { %v4293_v8 = vadd.f32 %v1918_v36, %v1830_v28  ;;  %v512_v36 = vadd.f32 %v4038_v32, %v454_v26 }
 0x136   : > { %v566_v41 = vmax.f32 %v512_v36, 0.0 }
 0x137   : > { %v1598_v4 = vpop.f32.mrf.mxu2  ;;  %v1831_v2 = vpop.f32.mrf.mxu3 }
 0x138   : > { %v1599_v5 = vadd.f32 %v1598_v4, %v1510_v40  ;;  %v1512_v1 = vpop.f32.mrf.mxu1  ;;  %v1923_v11 = vpop.f32.mrf.mxu0  ;;  %v620_v6 = vsel %vm393_vm1, %v566_v41, 0.0  ;;  %v1027_v40 = vor.u32 %v1026_v37, %v1022_v53  ;;  %v1031_v4 = vrot.slane %v1029_v20, 1 }
 0x139   : > { %v1513_v12 = vadd.f32 %v1512_v1, %v4027_v38  ;;  %v1121_v38 = vrot.slane %v3818_v22, 1 }
 0x13a   : > { %v1832_v9 = vadd.f32 %v1831_v2, %v1599_v5  ;;  %v1122_v5 = vrot.slane %v837_v63, 1 }
 0x13b   : > { %1551 = vmatmul.bf16.gmra.mxu1 %v4299_v3  ;;  %1962 = vmatmul.bf16.gmra.mxu0 %v4263_v34 }
 0x13c   : > { %1640 = vmatmul.bf16.gmra.mxu2 %v4302_v47  ;;  %1873 = vmatmul.bf16.gmra.mxu3 %v3636_v43  ;;  %v4310_v25 = vadd.f32 %v1920_v7, %v1832_v9  ;;  %v674_v7 = vpack.c.bf16 %v620_v6, %v620_v6  ;;  %v4324_v41 = vsel %vm1075_vm3, %v1121_v38, %v1122_v5 }
 0x13e   : > { %v820_v29 = vunpack.c.l.b16 %v674_v7 }
 0x13f   : > { %v1601_v28 = vpop.f32.mrf.mxu2  ;;  %v1834_v50 = vpop.f32.mrf.mxu3 }
 0x140   : > { %v1602_v32 = vadd.f32 %v1601_v28, %v1513_v12  ;;  %v1514_v51 = vpop.f32.mrf.mxu1  ;;  %v1925_v39 = vpop.f32.mrf.mxu0  ;;  %v4321_v28 = vsel %vm840_vm2, %v1027_v40, %v1031_v4 }
 0x141   : > { %v1515_v1 = vadd.f32 %v1514_v51, %v4053_v59  ;;  %v838_v59 = vpack.c.b16 %v820_v29, %v820_v29 }
 0x142   : > { %v1835_v26 = vadd.f32 %v1834_v50, %v1602_v32 }
 0x143   : > { %v1041_v4 = vshll.u32 %v838_v59, 16 }
 0x144   : > { %v4316_v2 = vadd.f32 %v1923_v11, %v1835_v26  ;;  %v1036_v11 = vshll.u32 %v3861_v16, 16  ;;  %v1034_v26 = vshrl.u32 %v3861_v16, 16 }
 0x145   : > { %v1043_v5 = vrot.slane %v1041_v4, 1 }
 0x146   : > { %v1038_v40 = vrot.slane %v1036_v11, 1 }
 0x147   : > { %v1603_v33 = vpop.f32.mrf.mxu2  ;;  %v1836_v36 = vpop.f32.mrf.mxu3 }
 0x148   : > { %v1604_v9 = vadd.f32 %v1603_v33, %v1515_v1  ;;  %v1517_v12 = vpop.f32.mrf.mxu1  ;;  %v1928_v31 = vpop.f32.mrf.mxu0  ;;  %v1039_v38 = vor.u32 %v1038_v40, %v1034_v26  ;;  %v1124_v33 = vrot.slane %v3861_v16, 1 }
 0x149   : > { %v1518_v32 = vadd.f32 %v1517_v12, %v4066_v45 }
 0x14a   : > { %v1837_v50 = vadd.f32 %v1836_v36, %v1604_v9 }
 0x14b   : > { %1556 = vmatmul.bf16.gmra.mxu1 %v4321_v28  ;;  %1967 = vmatmul.bf16.gmra.mxu0 %v4299_v3 }
 0x14c   : > { %1645 = vmatmul.bf16.gmra.mxu2 %v4324_v41  ;;  %1878 = vmatmul.bf16.gmra.mxu3 %v3730_v62  ;;  %v4331_v63 = vadd.f32 %v1925_v39, %v1837_v50  ;;  %v1125_v39 = vrot.slane %v838_v59, 1 }
 0x14e   : > { %v4343_v11 = vsel %vm1075_vm3, %v1124_v33, %v1125_v39  ;;  %v4570_v33 = vrot.slane %v3863_v18, 1 }
 0x14f   : > { %v1606_v51 = vpop.f32.mrf.mxu2  ;;  %v1839_v53 = vpop.f32.mrf.mxu3 }
 0x150   : > { %v1607_v37 = vadd.f32 %v1606_v51, %v1518_v32  ;;  %v1519_v20 = vpop.f32.mrf.mxu1  ;;  %v1930_v6 = vpop.f32.mrf.mxu0  ;;  %v4340_v32 = vsel %vm840_vm2, %v1039_v38, %v1043_v5 }
 0x151   : > { %v1520_v36 = vadd.f32 %v1519_v20, %v4093_v27 }
 0x152   : > { %v1840_v7 = vadd.f32 %v1839_v53, %v1607_v37 }
 0x154   : > { %v4335_v1 = vadd.f32 %v1928_v31, %v1840_v7 }
 0x157   : > { %v1608_v45 = vpop.f32.mrf.mxu2  ;;  %v1841_v9 = vpop.f32.mrf.mxu3 }
 0x158   : > { %v1609_v12 = vadd.f32 %v1608_v45, %v1520_v36  ;;  %v1522_v29 = vpop.f32.mrf.mxu1  ;;  %v1933_v50 = vpop.f32.mrf.mxu0 }
 0x159   : > { %v1523_v31 = vadd.f32 %v1522_v29, %v4112_v57 }
 0x15a   : > { %v1842_v51 = vadd.f32 %v1841_v9, %v1609_v12 }
 0x15b   : > { %1561 = vmatmul.bf16.gmra.mxu1 %v4340_v32  ;;  %1972 = vmatmul.bf16.gmra.mxu0 %v4321_v28 }
 0x15c   : > { %1650 = vmatmul.bf16.gmra.mxu2 %v4343_v11  ;;  %1883 = vmatmul.bf16.gmra.mxu3 %v3818_v22  ;;  %v4349_v27 = vadd.f32 %v1930_v6, %v1842_v51 }
 0x15f   : > { %v1611_v59 = vpop.f32.mrf.mxu2  ;;  %v1844_v53 = vpop.f32.mrf.mxu3 }
 0x160   : > { %v1612_v37 = vadd.f32 %v1611_v59, %v1523_v31  ;;  %v1524_v20 = vpop.f32.mrf.mxu1  ;;  %v1935_v26 = vpop.f32.mrf.mxu0 }
 0x161   : > { %v1525_v7 = vadd.f32 %v1524_v20, %v4133_v0 }
 0x162   : > { %v1845_v40 = vadd.f32 %v1844_v53, %v1612_v37 }
 0x164   : > { %v4352_v4 = vadd.f32 %v1933_v50, %v1845_v40 }
 0x167   : > { %v1613_v38 = vpop.f32.mrf.mxu2  ;;  %v1846_v5 = vpop.f32.mrf.mxu3 }
 0x168   : > { %v1614_v39 = vadd.f32 %v1613_v38, %v1525_v7  ;;  %v1527_v36 = vpop.f32.mrf.mxu1  ;;  %v1938_v6 = vpop.f32.mrf.mxu0 }
 0x169   : > { %v1528_v0 = vadd.f32 %v1527_v36, %v3997_v60 }
 0x16a   : > { %v1847_v45 = vadd.f32 %v1846_v5, %v1614_v39 }
 0x16b   : > { %1986 = vmatmul.bf16.vlgmr.msra.gmra.mxu1 %v4570_v33  ;;  %2446 = vmatmul.bf16.vlgmr.msra.gmra.mxu0 %v3913_v23 }
 0x16c   : > { %2268 = vmatmul.bf16.vlgmr.msra.gmra.mxu2 %v3720_v56  ;;  %2357 = vmatmul.bf16.vlgmr.msra.gmra.mxu3 %v3910_v19  ;;  %v4361_v57 = vadd.f32 %v1935_v26, %v1847_v45 }
 0x16f   : > { %v1616_v9 = vpop.f32.mrf.mxu2  ;;  %v1849_v12 = vpop.f32.mrf.mxu3 }
 0x170   : > { %v1617_v29 = vadd.f32 %v1616_v9, %v1528_v0  ;;  %v1529_v50 = vpop.f32.mrf.mxu1  ;;  %v1940_v51 = vpop.f32.mrf.mxu0 }
 0x171   : > { %v1530_v53 = vadd.f32 %v1529_v50, %v4021_v35  ;;  %v4609_v50 = vld [vmem:[#allocation8_spill] sm:$0xff] }
 0x172   : > { %v1850_v31 = vadd.f32 %v1849_v12, %v1617_v29 }
 0x174   : > { %v4364_v59 = vadd.f32 %v1938_v6, %v1850_v31  ;;  %v4610_v31 = vld [vmem:[#allocation19_spill] sm:$0xff] }
 0x177   : > { %v1618_v37 = vpop.f32.mrf.mxu2  ;;  %v1851_v20 = vpop.f32.mrf.mxu3 }
 0x178   : > { %v1619_v40 = vadd.f32 %v1618_v37, %v1530_v53  ;;  %v1532_v56 = vpop.f32.mrf.mxu1  ;;  %v1943_v7 = vpop.f32.mrf.mxu0 }
 0x179   : > { %v1533_v26 = vadd.f32 %v1532_v56, %v4047_v55  ;;  %v4608_v55 = vld [vmem:[#allocation5_spill] sm:$0xff] }
 0x17a   : > { %v1852_v19 = vadd.f32 %v1851_v20, %v1619_v40 }
 0x17b   : > { %1991 = vmatmul.bf16.gmra.mxu1 %v3884_v49  ;;  %2451 = vmatmul.bf16.gmra.mxu0 %v3930_v46 }
 0x17c   : > { %2273 = vmatmul.bf16.gmra.mxu2 %v3809_v13  ;;  %2362 = vmatmul.bf16.gmra.mxu3 %v3927_v44  ;;  %v4371_v60 = vadd.f32 %v1940_v51, %v1852_v19 }
 0x17f   : > { %v1621_v38 = vpop.f32.mrf.mxu2  ;;  %v1854_v35 = vpop.f32.mrf.mxu3 }
 0x180   : > { %v1622_v5 = vadd.f32 %v1621_v38, %v1533_v26  ;;  %v1534_v39 = vpop.f32.mrf.mxu1  ;;  %v1945_v36 = vpop.f32.mrf.mxu0  ;;  %v4611_v26 = vld [vmem:[#allocation21_spill] sm:$0xff] }
 0x181   : > { %v1535_v49 = vadd.f32 %v1534_v39, %v4060_v30 }
 0x182   : > { %v1855_v6 = vadd.f32 %v1854_v35, %v1622_v5 }
 0x184   : > { %v4374_v45 = vadd.f32 %v1943_v7, %v1855_v6 }
 0x187   : > { %v1623_v0 = vpop.f32.mrf.mxu2  ;;  %v1856_v9 = vpop.f32.mrf.mxu3 }
 0x188   : > { %v1624_v12 = vadd.f32 %v1623_v0, %v1535_v49  ;;  %v1537_v13 = vpop.f32.mrf.mxu1  ;;  %v1948_v29 = vpop.f32.mrf.mxu0  ;;  %v4613_v0 = vld [vmem:[#allocation2_spill] sm:$0xff] }
 0x189   : > { %v1538_v53 = vadd.f32 %v1537_v13, %v4610_v31  ;;  %v4615_v13 = vld [vmem:[#allocation25_spill] sm:$0xff] }
 0x18a   : > { %v1857_v44 = vadd.f32 %v1856_v9, %v1624_v12  ;;  %v4614_v9 = vld [vmem:[#allocation9_spill] sm:$0xff] }
 0x18b   : > { %1996 = vmatmul.bf16.gmra.mxu1 %v3913_v23  ;;  %2456 = vmatmul.bf16.gmra.mxu0 %v3960_v24 }
 0x18c   : > { %2278 = vmatmul.bf16.gmra.mxu2 %v4608_v55  ;;  %2367 = vmatmul.bf16.gmra.mxu3 %v4609_v50  ;;  %v4381_v51 = vadd.f32 %v1945_v36, %v1857_v44  ;;  %v4612_v36 = vld [vmem:[#allocation10_spill] sm:$0xff] }
 0x18f   : > { %v1626_v37 = vpop.f32.mrf.mxu2  ;;  %v1859_v30 = vpop.f32.mrf.mxu3 }
 0x190   : > { %v1627_v20 = vadd.f32 %v1626_v37, %v1538_v53  ;;  %v1539_v40 = vpop.f32.mrf.mxu1  ;;  %v1950_v56 = vpop.f32.mrf.mxu0 }
 0x191   : > { %v1540_v23 = vadd.f32 %v1539_v40, %v4611_v26 }
 0x192   : > { %v1860_v7 = vadd.f32 %v1859_v30, %v1627_v20  ;;  %v4616_v20 = vld [vmem:[#allocation27_spill] sm:$0xff] }
 0x194   : > { %v4384_v19 = vadd.f32 %v1948_v29, %v1860_v7 }
 0x197   : > { %v1628_v38 = vpop.f32.mrf.mxu2  ;;  %v1861_v35 = vpop.f32.mrf.mxu3 }
 0x198   : > { %v1629_v5 = vadd.f32 %v1628_v38, %v1540_v23  ;;  %v1542_v39 = vpop.f32.mrf.mxu1  ;;  %v1953_v6 = vpop.f32.mrf.mxu0 }
 0x199   : > { %v1543_v29 = vadd.f32 %v1542_v39, %v4615_v13  ;;  %v4619_v39 = vld [vmem:[#allocation13_spill] sm:$0xff] }
 0x19a   : > { %v1862_v49 = vadd.f32 %v1861_v35, %v1629_v5  ;;  %v4618_v5 = vld [vmem:[#allocation3_spill] sm:$0xff] }
 0x19b   : > { %2001 = vmatmul.bf16.gmra.mxu1 %v3930_v46  ;;  %2461 = vmatmul.bf16.gmra.mxu0 %v4612_v36 }
 0x19c   : > { %2283 = vmatmul.bf16.gmra.mxu2 %v4613_v0  ;;  %2372 = vmatmul.bf16.gmra.mxu3 %v4614_v9  ;;  %v4391_v12 = vadd.f32 %v1950_v56, %v1862_v49  ;;  %v4617_v56 = vld [vmem:[#allocation14_spill] sm:$0xff] }
 0x19f   : > { %v1631_v44 = vpop.f32.mrf.mxu2  ;;  %v1864_v55 = vpop.f32.mrf.mxu3 }
 0x1a0   : > { %v1632_v50 = vadd.f32 %v1631_v44, %v1543_v29  ;;  %v1544_v31 = vpop.f32.mrf.mxu1  ;;  %v1955_v53 = vpop.f32.mrf.mxu0 }
 0x1a1   : > { %v1545_v46 = vadd.f32 %v1544_v31, %v4616_v20 }
 0x1a2   : > { %v1865_v37 = vadd.f32 %v1864_v55, %v1632_v50 }
 0x1a4   : > { %v4394_v30 = vadd.f32 %v1953_v6, %v1865_v37  ;;  %v4620_v6 = vld [vmem:[#allocation11_spill] sm:$0xff]  ;;  %v4621_v37 = vld [vmem:[#allocation12_spill] sm:$0xff] }
 0x1a7   : > { %v1633_v40 = vpop.f32.mrf.mxu2  ;;  %v1866_v7 = vpop.f32.mrf.mxu3 }
 0x1a8   : > { %v1634_v26 = vadd.f32 %v1633_v40, %v1545_v46  ;;  %v1547_v23 = vpop.f32.mrf.mxu1  ;;  %v1958_v38 = vpop.f32.mrf.mxu0 }
 0x1a9   : > { %v1548_v0 = vadd.f32 %v1547_v23, %v4620_v6  ;;  %v4623_v23 = vld [vmem:[#allocation4_spill] sm:$0xff] }
 0x1aa   : > { %v1867_v35 = vadd.f32 %v1866_v7, %v1634_v26 }
 0x1ab   : > { %2006 = vmatmul.bf16.gmra.mxu1 %v3960_v24  ;;  %2466 = vmatmul.bf16.gmra.mxu0 %v4617_v56 }
 0x1ac   : > { %2288 = vmatmul.bf16.gmra.mxu2 %v4618_v5  ;;  %2377 = vmatmul.bf16.gmra.mxu3 %v4619_v39  ;;  %v4401_v49 = vadd.f32 %v1955_v53, %v1867_v35  ;;  %v4622_v53 = vld [vmem:[#allocation18_spill] sm:$0xff]  ;;  %v4624_v35 = vld [vmem:[#allocation17_spill] sm:$0xff] }
 0x1af   : > { %v1636_v9 = vpop.f32.mrf.mxu2  ;;  %v1869_v13 = vpop.f32.mrf.mxu3 }
 0x1b0   : > { %v1637_v29 = vadd.f32 %v1636_v9, %v1548_v0  ;;  %v1549_v44 = vpop.f32.mrf.mxu1  ;;  %v1960_v55 = vpop.f32.mrf.mxu0 }
 0x1b1   : > { %v1550_v24 = vadd.f32 %v1549_v44, %v4621_v37 }
 0x1b2   : > { %v1870_v50 = vadd.f32 %v1869_v13, %v1637_v29 }
 0x1b4   : > { %v4404_v31 = vadd.f32 %v1958_v38, %v1870_v50  ;;  %v4626_v38 = vld [vmem:[#allocation15_spill] sm:$0xff] }
 0x1b7   : > { %v1638_v20 = vpop.f32.mrf.mxu2  ;;  %v1871_v46 = vpop.f32.mrf.mxu3 }
 0x1b8   : > { %v1639_v40 = vadd.f32 %v1638_v20, %v1550_v24  ;;  %v1552_v7 = vpop.f32.mrf.mxu1  ;;  %v1963_v26 = vpop.f32.mrf.mxu0  ;;  %v4628_v24 = vld [vmem:[#allocation16_spill] sm:$0xff] }
 0x1b9   : > { %v1553_v6 = vadd.f32 %v1552_v7, %v4626_v38  ;;  %v4630_v7 = vld [vmem:[#allocation6_spill] sm:$0xff] }
 0x1ba   : > { %v1872_v5 = vadd.f32 %v1871_v46, %v1639_v40 }
 0x1bb   : > { %2011 = vmatmul.bf16.gmra.mxu1 %v4612_v36  ;;  %2471 = vmatmul.bf16.gmra.mxu0 %v4622_v53 }
 0x1bc   : > { %2293 = vmatmul.bf16.gmra.mxu2 %v4623_v23  ;;  %2382 = vmatmul.bf16.gmra.mxu3 %v4624_v35  ;;  %v4411_v39 = vadd.f32 %v1960_v55, %v1872_v5  ;;  %v4629_v55 = vld [vmem:[#allocation24_spill] sm:$0xff]  ;;  %v4631_v5 = vld [vmem:[#allocation23_spill] sm:$0xff] }
 0x1be   : > { %4625 = vst [vmem:[#allocation5_spill] sm:$0xff] %v4411_v39 }
 0x1bf   : > { %v1641_v0 = vpop.f32.mrf.mxu2  ;;  %v1874_v9 = vpop.f32.mrf.mxu3 }
 0x1c0   : > { %v1642_v13 = vadd.f32 %v1641_v0, %v1553_v6  ;;  %v1554_v29 = vpop.f32.mrf.mxu1  ;;  %v1965_v44 = vpop.f32.mrf.mxu0 }
 0x1c1   : > { %v1555_v36 = vadd.f32 %v1554_v29, %v4628_v24 }
 0x1c2   : > { %v1875_v50 = vadd.f32 %v1874_v9, %v1642_v13 }
 0x1c4   : > { %v4414_v37 = vadd.f32 %v1963_v26, %v1875_v50  ;;  %v4632_v26 = vld [vmem:[#allocation20_spill] sm:$0xff] }
 0x1c6   : > { %4627 = vst [vmem:[#allocation8_spill] sm:$0xff] %v4414_v37 }
 0x1c7   : > { %v1643_v20 = vpop.f32.mrf.mxu2  ;;  %v1876_v46 = vpop.f32.mrf.mxu3 }
 0x1c8   : > { %v1644_v40 = vadd.f32 %v1643_v20, %v1555_v36  ;;  %v1557_v23 = vpop.f32.mrf.mxu1  ;;  %v1968_v33 = vpop.f32.mrf.mxu0  ;;  %v4633_v20 = vld [vmem:[#allocation22_spill] sm:$0xff] }
 0x1c9   : > { %v1558_v6 = vadd.f32 %v1557_v23, %v4632_v26  ;;  %v4635_v23 = vld [vmem:[#allocation29_spill] sm:$0xff] }
 0x1ca   : > { %v1877_v35 = vadd.f32 %v1876_v46, %v1644_v40 }
 0x1cb   : > { %2016 = vmatmul.bf16.gmra.mxu1 %v4617_v56  ;;  %2476 = vmatmul.bf16.gmra.mxu0 %v4629_v55 }
 0x1cc   : > { %2298 = vmatmul.bf16.gmra.mxu2 %v4630_v7  ;;  %2387 = vmatmul.bf16.gmra.mxu3 %v4631_v5  ;;  %v4421_v38 = vadd.f32 %v1965_v44, %v1877_v35  ;;  %v4634_v44 = vld [vmem:[#allocation30_spill] sm:$0xff] }
 0x1cf   : > { %v1646_v0 = vpop.f32.mrf.mxu2  ;;  %v1879_v9 = vpop.f32.mrf.mxu3 }
 0x1d0   : > { %v1647_v13 = vadd.f32 %v1646_v0, %v1558_v6  ;;  %v1559_v29 = vpop.f32.mrf.mxu1  ;;  %v1970_v50 = vpop.f32.mrf.mxu0 }
 0x1d1   : > { %v1560_v56 = vadd.f32 %v1559_v29, %v4633_v20 }
 0x1d2   : > { %v1880_v24 = vadd.f32 %v1879_v9, %v1647_v13 }
 0x1d4   : > { %v4424_v36 = vadd.f32 %v1968_v33, %v1880_v24  ;;  %v4636_v33 = vld [vmem:[#allocation26_spill] sm:$0xff] }
 0x1d7   : > { %v1648_v46 = vpop.f32.mrf.mxu2  ;;  %v1881_v40 = vpop.f32.mrf.mxu3 }
 0x1d8   : > { %v1649_v37 = vadd.f32 %v1648_v46, %v1560_v56  ;;  %v1562_v7 = vpop.f32.mrf.mxu1  ;;  %v1973_v39 = vpop.f32.mrf.mxu0 }
 0x1d9   : > { %v1563_v26 = vadd.f32 %v1562_v7, %v4636_v33  ;;  %v4639_v7 = vld [vmem:[#allocation32_spill] sm:$0xff] }
 0x1da   : > { %v1882_v5 = vadd.f32 %v1881_v40, %v1649_v37 }
 0x1db   : > { %2021 = vmatmul.bf16.gmra.mxu1 %v4622_v53  ;;  %2481 = vmatmul.bf16.gmra.mxu0 %v4634_v44  ;;  %v4638_v53 = vld [vmem:[#allocation28_spill] sm:$0xff] }
 0x1dc   : > { %2303 = vmatmul.bf16.gmra.mxu2 %v3634_v42  ;;  %2392 = vmatmul.bf16.gmra.mxu3 %v4635_v23  ;;  %v4431_v35 = vadd.f32 %v1970_v50, %v1882_v5 }
 0x1df   : > { %v1651_v6 = vpop.f32.mrf.mxu2  ;;  %v1884_v0 = vpop.f32.mrf.mxu3 }
 0x1e0   : > { %v1652_v9 = vadd.f32 %v1651_v6, %v1563_v26  ;;  %v1564_v13 = vpop.f32.mrf.mxu1  ;;  %v1975_v29 = vpop.f32.mrf.mxu0 }
 0x1e1   : > { %v1565_v20 = vadd.f32 %v1564_v13, %v4638_v53 }
 0x1e2   : > { %v1885_v24 = vadd.f32 %v1884_v0, %v1652_v9 }
 0x1e4   : > { %v4434_v37 = vadd.f32 %v1973_v39, %v1885_v24 }
 0x1e6   : > { %4637 = vst [vmem:[#allocation19_spill] sm:$0xff] %v4434_v37 }
 0x1e7   : > { %v1653_v56 = vpop.f32.mrf.mxu2  ;;  %v1886_v46 = vpop.f32.mrf.mxu3 }
 0x1e8   : > { %v1654_v42 = vadd.f32 %v1653_v56, %v1565_v20  ;;  %v1987_v40 = vpop.f32.mrf.mxu1  ;;  %v2447_v23 = vpop.f32.mrf.mxu0 }
 0x1ea   : > { %v1887_v50 = vadd.f32 %v1886_v46, %v1654_v42 }
 0x1eb   : > { %2026 = vmatmul.bf16.gmra.mxu1 %v4629_v55  ;;  %2486 = vmatmul.bf16.gmra.mxu0 %v4639_v7  ;;  %v4641_v55 = vld [vmem:[#allocation31_spill] sm:$0xff] }
 0x1ec   : > { %2308 = vmatmul.bf16.gmra.mxu2 %v3728_v61  ;;  %2397 = vmatmul.bf16.gmra.mxu3 %v4179_v10  ;;  %v4441_v5 = vadd.f32 %v1975_v29, %v1887_v50  ;;  %v1988_v53 = vadd.f32 %v1987_v40, %v4641_v55  ;;  %v4642_v10 = vld [vmem:[#allocation33_spill] sm:$0xff] }
 0x1ee   : > { %4640 = vst [vmem:[#allocation21_spill] sm:$0xff] %v4441_v5  ;;  %v4643_v5 = vld [vmem:[#allocation34_spill] sm:$0xff] }
 0x1ef   : > { %v2269_v39 = vpop.f32.mrf.mxu2  ;;  %v2358_v33 = vpop.f32.mrf.mxu3 }
 0x1f0   : > { %v1989_v26 = vpop.f32.mrf.mxu1  ;;  %v2449_v6 = vpop.f32.mrf.mxu0  ;;  %v2359_v0 = vadd.f32 %v2358_v33, %v2269_v39 }
 0x1f1   : > { %v1990_v29 = vadd.f32 %v1989_v26, %v4642_v10 }
 0x1f2   : > { %v2448_v9 = vadd.f32 %v2447_v23, %v2359_v0 }
 0x1f4   : > { %v2527_v46 = vadd.f32 %v2448_v9, %v1988_v53 }
 0x1f6   : > { %v2661_v40 = vmul.f32 %v2527_v46, %v2527_v46 }
 0x1f7   : > { %v2271_v13 = vpop.f32.mrf.mxu2  ;;  %v2360_v24 = vpop.f32.mrf.mxu3 }
 0x1f8   : > { %v2361_v20 = vadd.f32 %v2360_v24, %v2271_v13  ;;  %v1992_v56 = vpop.f32.mrf.mxu1  ;;  %v2452_v61 = vpop.f32.mrf.mxu0 }
 0x1fa   : > { %v2450_v42 = vadd.f32 %v2449_v6, %v2361_v20 }
 0x1fb   : > { %2031 = vmatmul.bf16.gmra.mxu1 %v4634_v44  ;;  %2491 = vmatmul.bf16.gmra.mxu0 %v4207_v17 }
 0x1fc   : > { %v2528_v50 = vadd.f32 %v2450_v42, %v1990_v29  ;;  %2313 = vmatmul.bf16.gmra.mxu2 %v3816_v21  ;;  %2402 = vmatmul.bf16.gmra.mxu3 %v4203_v48  ;;  %v1993_v21 = vadd.f32 %v1992_v56, %v4198_v58 }
 0x1fe   : > { %v3338_v23 = vpack.c.bf16 %v2528_v50, %v2527_v46  ;;  %v2623_v39 = vadd.f32 %v2528_v50, %v2527_v46  ;;  %v2662_v33 = vmul.f32 %v2528_v50, %v2528_v50 }
 0x1ff   : > { %v2274_v26 = vpop.f32.mrf.mxu2  ;;  %v2363_v6 = vpop.f32.mrf.mxu3 }
 0x200   : > { %3339 = vst [vmem:[%s4453_s18] sm:$0xff] %v3338_v23   ;;  %v2693_v44 = vadd.f32 %v2662_v33, %v2661_v40  ;;  %v2364_v0 = vadd.f32 %v2363_v6, %v2274_v26  ;;  %v1994_v9 = vpop.f32.mrf.mxu1  ;;  %v2454_v13 = vpop.f32.mrf.mxu0  ;;  %v4644_v40 = vld [vmem:[#allocation36_spill] sm:$0xff] }
 0x201   : > { %v1995_v37 = vadd.f32 %v1994_v9, %v4643_v5  ;;  %v4645_v9 = vld [vmem:[#allocation35_spill] sm:$0xff] }
 0x202   : > { %v2453_v48 = vadd.f32 %v2452_v61, %v2364_v0 }
 0x204   : > { %v2529_v24 = vadd.f32 %v2453_v48, %v1993_v21 }
 0x206   : > { %v2624_v55 = vadd.f32 %v2623_v39, %v2529_v24  ;;  %v2663_v53 = vmul.f32 %v2529_v24, %v2529_v24 }
 0x207   : > { %v2276_v20 = vpop.f32.mrf.mxu2  ;;  %v2365_v10 = vpop.f32.mrf.mxu3 }
 0x208   : > { %v2694_v29 = vadd.f32 %v2693_v44, %v2663_v53  ;;  %v2366_v42 = vadd.f32 %v2365_v10, %v2276_v20  ;;  %v1997_v46 = vpop.f32.mrf.mxu1  ;;  %v2457_v50 = vpop.f32.mrf.mxu0  ;;  %v4646_v10 = vld [vmem:[#allocation37_spill] sm:$0xff] }
 0x20a   : > { %v2455_v23 = vadd.f32 %v2454_v13, %v2366_v42  ;;  %v1998_v13 = vadd.f32 %v1997_v46, %v4645_v9 }
 0x20b   : > { %2036 = vmatmul.bf16.gmra.mxu1 %v4639_v7  ;;  %2496 = vmatmul.bf16.gmra.mxu0 %v4644_v40 }
 0x20c   : > { %v2530_v33 = vadd.f32 %v2455_v23, %v1995_v37  ;;  %2318 = vmatmul.bf16.gmra.mxu2 %v3859_v15  ;;  %2407 = vmatmul.bf16.gmra.mxu3 %v4239_v54 }
 0x20e   : > { %v3343_v58 = vpack.c.bf16 %v2530_v33, %v2529_v24  ;;  %v2625_v56 = vadd.f32 %v2624_v55, %v2530_v33  ;;  %v2664_v61 = vmul.f32 %v2530_v33, %v2530_v33 }
 0x20f   : > { %v2279_v39 = vpop.f32.mrf.mxu2  ;;  %v2368_v26 = vpop.f32.mrf.mxu3 }
 0x210   : > { %3423 = vst [vmem:[%s4453_s18 + $0x8] sm:$0xff] %v3343_v58   ;;  %v2695_v6 = vadd.f32 %v2694_v29, %v2664_v61  ;;  %v2369_v44 = vadd.f32 %v2368_v26, %v2279_v39  ;;  %v1999_v0 = vpop.f32.mrf.mxu1  ;;  %v2459_v5 = vpop.f32.mrf.mxu0 }
 0x211   : > { %v2000_v42 = vadd.f32 %v1999_v0, %v4646_v10 }
 0x212   : > { %v2458_v7 = vadd.f32 %v2457_v50, %v2369_v44 }
 0x214   : > { %v2531_v21 = vadd.f32 %v2458_v7, %v1998_v13 }
 0x216   : > { %v2626_v48 = vadd.f32 %v2625_v56, %v2531_v21  ;;  %v2665_v37 = vmul.f32 %v2531_v21, %v2531_v21 }
 0x217   : > { %v2281_v53 = vpop.f32.mrf.mxu2  ;;  %v2370_v15 = vpop.f32.mrf.mxu3 }
 0x218   : > { %v2696_v20 = vadd.f32 %v2695_v6, %v2665_v37  ;;  %v2371_v54 = vadd.f32 %v2370_v15, %v2281_v53  ;;  %v2002_v24 = vpop.f32.mrf.mxu1  ;;  %v2462_v55 = vpop.f32.mrf.mxu0  ;;  %v4647_v37 = vld [vmem:[#allocation38_spill] sm:$0xff] }
 0x219   : > { %v2003_v44 = vadd.f32 %v2002_v24, %v4258_v14 }
 0x21a   : > { %v2460_v23 = vadd.f32 %v2459_v5, %v2371_v54 }
 0x21b   : > { %2041 = vmatmul.bf16.gmra.mxu1 %v4207_v17  ;;  %2501 = vmatmul.bf16.gmra.mxu0 %v4266_v52 }
 0x21c   : > { %v2532_v29 = vadd.f32 %v2460_v23, %v2000_v42  ;;  %2323 = vmatmul.bf16.gmra.mxu2 %v3636_v43  ;;  %2412 = vmatmul.bf16.gmra.mxu3 %v4263_v34 }
 0x21e   : > { %v3348_v46 = vpack.c.bf16 %v2532_v29, %v2531_v21  ;;  %v2627_v50 = vadd.f32 %v2626_v48, %v2532_v29  ;;  %v2666_v33 = vmul.f32 %v2532_v29, %v2532_v29 }
 0x21f   : > { %v2284_v58 = vpop.f32.mrf.mxu2  ;;  %v2373_v56 = vpop.f32.mrf.mxu3 }
 0x220   : > { %3424 = vst [vmem:[%s4453_s18 + $0x10] sm:$0xff] %v3348_v46   ;;  %v2697_v61 = vadd.f32 %v2696_v20, %v2666_v33  ;;  %v2374_v39 = vadd.f32 %v2373_v56, %v2284_v58  ;;  %v2004_v26 = vpop.f32.mrf.mxu1  ;;  %v2464_v6 = vpop.f32.mrf.mxu0 }
 0x221   : > { %v2005_v53 = vadd.f32 %v2004_v26, %v4647_v37 }
 0x222   : > { %v2463_v17 = vadd.f32 %v2462_v55, %v2374_v39 }
 0x224   : > { %v2533_v0 = vadd.f32 %v2463_v17, %v2003_v44 }
 0x226   : > { %v2628_v5 = vadd.f32 %v2627_v50, %v2533_v0  ;;  %v2667_v9 = vmul.f32 %v2533_v0, %v2533_v0 }
 0x227   : > { %v2286_v13 = vpop.f32.mrf.mxu2  ;;  %v2375_v43 = vpop.f32.mrf.mxu3 }
 0x228   : > { %v2698_v7 = vadd.f32 %v2697_v61, %v2667_v9  ;;  %v2376_v34 = vadd.f32 %v2375_v43, %v2286_v13  ;;  %v2007_v21 = vpop.f32.mrf.mxu1  ;;  %v2467_v48 = vpop.f32.mrf.mxu0 }
 0x229   : > { %v2008_v50 = vadd.f32 %v2007_v21, %v4293_v8 }
 0x22a   : > { %v2465_v15 = vadd.f32 %v2464_v6, %v2376_v34 }
 0x22b   : > { %2046 = vmatmul.bf16.gmra.mxu1 %v4644_v40  ;;  %2506 = vmatmul.bf16.gmra.mxu0 %v4302_v47 }
 0x22c   : > { %v2534_v20 = vadd.f32 %v2465_v15, %v2005_v53  ;;  %2328 = vmatmul.bf16.gmra.mxu2 %v3730_v62  ;;  %2417 = vmatmul.bf16.gmra.mxu3 %v4299_v3 }
 0x22e   : > { %v3353_v14 = vpack.c.bf16 %v2534_v20, %v2533_v0  ;;  %v2629_v54 = vadd.f32 %v2628_v5, %v2534_v20  ;;  %v2668_v24 = vmul.f32 %v2534_v20, %v2534_v20 }
 0x22f   : > { %v2289_v55 = vpop.f32.mrf.mxu2  ;;  %v2378_v10 = vpop.f32.mrf.mxu3 }
 0x230   : > { %3425 = vst [vmem:[%s4453_s18 + $0x18] sm:$0xff] %v3353_v14   ;;  %v2699_v42 = vadd.f32 %v2698_v7, %v2668_v24  ;;  %v2379_v23 = vadd.f32 %v2378_v10, %v2289_v55  ;;  %v2009_v29 = vpop.f32.mrf.mxu1  ;;  %v2469_v46 = vpop.f32.mrf.mxu0 }
 0x231   : > { %v2010_v44 = vadd.f32 %v2009_v29, %v4310_v25 }
 0x232   : > { %v2468_v40 = vadd.f32 %v2467_v48, %v2379_v23 }
 0x234   : > { %v2535_v33 = vadd.f32 %v2468_v40, %v2008_v50 }
 0x236   : > { %v2630_v58 = vadd.f32 %v2629_v54, %v2535_v33  ;;  %v2669_v56 = vmul.f32 %v2535_v33, %v2535_v33 }
 0x237   : > { %v2291_v61 = vpop.f32.mrf.mxu2  ;;  %v2380_v62 = vpop.f32.mrf.mxu3 }
 0x238   : > { %v2700_v39 = vadd.f32 %v2699_v42, %v2669_v56  ;;  %v2381_v3 = vadd.f32 %v2380_v62, %v2291_v61  ;;  %v2012_v26 = vpop.f32.mrf.mxu1  ;;  %v2472_v6 = vpop.f32.mrf.mxu0 }
 0x239   : > { %v2013_v48 = vadd.f32 %v2012_v26, %v4316_v2 }
 0x23a   : > { %v2470_v17 = vadd.f32 %v2469_v46, %v2381_v3 }
 0x23b   : > { %2051 = vmatmul.bf16.gmra.mxu1 %v4266_v52  ;;  %2511 = vmatmul.bf16.gmra.mxu0 %v4324_v41 }
 0x23c   : > { %v2536_v0 = vadd.f32 %v2470_v17, %v2010_v44  ;;  %2333 = vmatmul.bf16.gmra.mxu2 %v3818_v22  ;;  %2422 = vmatmul.bf16.gmra.mxu3 %v4321_v28 }
 0x23e   : > { %v3358_v8 = vpack.c.bf16 %v2536_v0, %v2535_v33  ;;  %v2631_v5 = vadd.f32 %v2630_v58, %v2536_v0  ;;  %v2670_v9 = vmul.f32 %v2536_v0, %v2536_v0  ;;  %v4648_v0 = vrot.slane %v3863_v18, 1 }
 0x23f   : > { %v2294_v13 = vpop.f32.mrf.mxu2  ;;  %v2383_v43 = vpop.f32.mrf.mxu3 }
 0x240   : > { %3426 = vst [vmem:[%s4453_s18 + $0x20] sm:$0xff] %v3358_v8   ;;  %v2701_v7 = vadd.f32 %v2700_v39, %v2670_v9  ;;  %v2384_v34 = vadd.f32 %v2383_v43, %v2294_v13  ;;  %v2014_v21 = vpop.f32.mrf.mxu1  ;;  %v2474_v25 = vpop.f32.mrf.mxu0  ;;  %v4649_v8 = vld [vmem:[#allocation7_spill] sm:$0xff] }
 0x241   : > { %v2015_v55 = vadd.f32 %v2014_v21, %v4331_v63 }
 0x242   : > { %v2473_v52 = vadd.f32 %v2472_v6, %v2384_v34 }
 0x244   : > { %v2537_v37 = vadd.f32 %v2473_v52, %v2013_v48 }
 0x246   : > { %v2632_v53 = vadd.f32 %v2631_v5, %v2537_v37  ;;  %v2671_v15 = vmul.f32 %v2537_v37, %v2537_v37 }
 0x247   : > { %v2296_v20 = vpop.f32.mrf.mxu2  ;;  %v2385_v22 = vpop.f32.mrf.mxu3 }
 0x248   : > { %v2702_v14 = vadd.f32 %v2701_v7, %v2671_v15  ;;  %v2386_v28 = vadd.f32 %v2385_v22, %v2296_v20  ;;  %v2017_v54 = vpop.f32.mrf.mxu1  ;;  %v2477_v24 = vpop.f32.mrf.mxu0 }
 0x249   : > { %v2018_v56 = vadd.f32 %v2017_v54, %v4335_v1 }
 0x24a   : > { %v2475_v10 = vadd.f32 %v2474_v25, %v2386_v28 }
 0x24b   : > { %2056 = vmatmul.bf16.gmra.mxu1 %v4302_v47  ;;  %2516 = vmatmul.bf16.gmra.mxu0 %v4343_v11 }
 0x24c   : > { %v2538_v42 = vadd.f32 %v2475_v10, %v2015_v55  ;;  %2338 = vmatmul.bf16.gmra.mxu2 %v3861_v16  ;;  %2427 = vmatmul.bf16.gmra.mxu3 %v4340_v32 }
 0x24e   : > { %v3363_v2 = vpack.c.bf16 %v2538_v42, %v2537_v37  ;;  %v2633_v23 = vadd.f32 %v2632_v53, %v2538_v42  ;;  %v2672_v29 = vmul.f32 %v2538_v42, %v2538_v42 }
 0x24f   : > { %v2299_v46 = vpop.f32.mrf.mxu2  ;;  %v2388_v50 = vpop.f32.mrf.mxu3 }
 0x250   : > { %3427 = vst [vmem:[%s4453_s18 + $0x28] sm:$0xff] %v3363_v2   ;;  %v2703_v40 = vadd.f32 %v2702_v14, %v2672_v29  ;;  %v2389_v33 = vadd.f32 %v2388_v50, %v2299_v46  ;;  %v2019_v58 = vpop.f32.mrf.mxu1  ;;  %v2479_v63 = vpop.f32.mrf.mxu0 }
 0x251   : > { %v2020_v44 = vadd.f32 %v2019_v58, %v4349_v27 }
 0x252   : > { %v2478_v47 = vadd.f32 %v2477_v24, %v2389_v33 }
 0x254   : > { %v2539_v61 = vadd.f32 %v2478_v47, %v2018_v56 }
 0x256   : > { %v2634_v11 = vadd.f32 %v2633_v23, %v2539_v61  ;;  %v2673_v62 = vmul.f32 %v2539_v61, %v2539_v61 }
 0x257   : > { %v2301_v39 = vpop.f32.mrf.mxu2  ;;  %v2390_v16 = vpop.f32.mrf.mxu3 }
 0x258   : > { %v2704_v3 = vadd.f32 %v2703_v40, %v2673_v62  ;;  %v2391_v32 = vadd.f32 %v2390_v16, %v2301_v39  ;;  %v2022_v26 = vpop.f32.mrf.mxu1  ;;  %v2482_v6 = vpop.f32.mrf.mxu0 }
 0x25a   : > { %v2480_v17 = vadd.f32 %v2479_v63, %v2391_v32 }
 0x25b   : > { %2061 = vmatmul.bf16.gmra.mxu1 %v4324_v41  ;;  %2521 = vmatmul.bf16.gmra.mxu0 %v4648_v0  ;;  %v2023_v41 = vadd.f32 %v2022_v26, %v4352_v4 }
 0x25c   : > { %v2540_v1 = vadd.f32 %v2480_v17, %v2020_v44  ;;  %2343 = vmatmul.bf16.gmra.mxu2 %v3863_v18  ;;  %2432 = vmatmul.bf16.gmra.mxu3 %v4649_v8 }
 0x25e   : > { %v3368_v5 = vpack.c.bf16 %v2540_v1, %v2539_v61  ;;  %v2635_v9 = vadd.f32 %v2634_v11, %v2540_v1  ;;  %v2674_v13 = vmul.f32 %v2540_v1, %v2540_v1 }
 0x25f   : > { %v2304_v43 = vpop.f32.mrf.mxu2  ;;  %v2393_v7 = vpop.f32.mrf.mxu3 }
 0x260   : > { %3428 = vst [vmem:[%s4453_s18 + $0x30] sm:$0xff] %v3368_v5   ;;  %v2705_v34 = vadd.f32 %v2704_v3, %v2674_v13  ;;  %v2394_v21 = vadd.f32 %v2393_v7, %v2304_v43  ;;  %v2024_v27 = vpop.f32.mrf.mxu1  ;;  %v2484_v25 = vpop.f32.mrf.mxu0 }
 0x261   : > { %v2025_v54 = vadd.f32 %v2024_v27, %v4361_v57 }
 0x262   : > { %v2483_v48 = vadd.f32 %v2482_v6, %v2394_v21 }
 0x264   : > { %v2541_v52 = vadd.f32 %v2483_v48, %v2023_v41 }
 0x266   : > { %v2636_v37 = vadd.f32 %v2635_v9, %v2541_v52  ;;  %v2675_v53 = vmul.f32 %v2541_v52, %v2541_v52 }
 0x267   : > { %v2306_v18 = vpop.f32.mrf.mxu2  ;;  %v2395_v15 = vpop.f32.mrf.mxu3 }
 0x268   : > { %v2706_v20 = vadd.f32 %v2705_v34, %v2675_v53  ;;  %v2396_v22 = vadd.f32 %v2395_v15, %v2306_v18  ;;  %v2027_v14 = vpop.f32.mrf.mxu1  ;;  %v2487_v28 = vpop.f32.mrf.mxu0 }
 0x269   : > { %v2028_v33 = vadd.f32 %v2027_v14, %v4364_v59 }
 0x26a   : > { %v2485_v24 = vadd.f32 %v2484_v25, %v2396_v22 }
 0x26c   : > { %v2542_v55 = vadd.f32 %v2485_v24, %v2025_v54 }
 0x26e   : > { %v3373_v10 = vpack.c.bf16 %v2542_v55, %v2541_v52  ;;  %v2637_v42 = vadd.f32 %v2636_v37, %v2542_v55  ;;  %v2676_v2 = vmul.f32 %v2542_v55, %v2542_v55 }
 0x26f   : > { %v2309_v23 = vpop.f32.mrf.mxu2  ;;  %v2398_v4 = vpop.f32.mrf.mxu3 }
 0x270   : > { %3429 = vst [vmem:[%s4453_s18 + $0x38] sm:$0xff] %v3373_v10   ;;  %v2707_v29 = vadd.f32 %v2706_v20, %v2676_v2  ;;  %v2399_v46 = vadd.f32 %v2398_v4, %v2309_v23  ;;  %v2029_v50 = vpop.f32.mrf.mxu1  ;;  %v2489_v40 = vpop.f32.mrf.mxu0 }
 0x271   : > { %v2030_v3 = vadd.f32 %v2029_v50, %v4371_v60 }
 0x272   : > { %v2488_v58 = vadd.f32 %v2487_v28, %v2399_v46 }
 0x274   : > { %v2543_v63 = vadd.f32 %v2488_v58, %v2028_v33 }
 0x276   : > { %v2638_v56 = vadd.f32 %v2637_v42, %v2543_v63  ;;  %v2677_v47 = vmul.f32 %v2543_v63, %v2543_v63 }
 0x277   : > { %v2311_v57 = vpop.f32.mrf.mxu2  ;;  %v2400_v61 = vpop.f32.mrf.mxu3 }
 0x278   : > { %v2708_v11 = vadd.f32 %v2707_v29, %v2677_v47  ;;  %v2401_v62 = vadd.f32 %v2400_v61, %v2311_v57  ;;  %v2032_v39 = vpop.f32.mrf.mxu1  ;;  %v2492_v16 = vpop.f32.mrf.mxu0 }
 0x279   : > { %v2033_v13 = vadd.f32 %v2032_v39, %v4374_v45 }
 0x27a   : > { %v2490_v32 = vadd.f32 %v2489_v40, %v2401_v62 }
 0x27c   : > { %v2544_v26 = vadd.f32 %v2490_v32, %v2030_v3 }
 0x27e   : > { %v3378_v6 = vpack.c.bf16 %v2544_v26, %v2543_v63  ;;  %v2639_v44 = vadd.f32 %v2638_v56, %v2544_v26  ;;  %v2678_v17 = vmul.f32 %v2544_v26, %v2544_v26 }
 0x27f   : > { %v2314_v0 = vpop.f32.mrf.mxu2  ;;  %v2403_v59 = vpop.f32.mrf.mxu3 }
 0x280   : > { %3430 = vst [vmem:[%s4453_s18 + $0x40] sm:$0xff] %v3378_v6   ;;  %v2709_v1 = vadd.f32 %v2708_v11, %v2678_v17  ;;  %v2404_v8 = vadd.f32 %v2403_v59, %v2314_v0  ;;  %v2034_v5 = vpop.f32.mrf.mxu1  ;;  %v2494_v9 = vpop.f32.mrf.mxu0 }
 0x281   : > { %v2035_v37 = vadd.f32 %v2034_v5, %v4381_v51 }
 0x282   : > { %v2493_v43 = vadd.f32 %v2492_v16, %v2404_v8 }
 0x284   : > { %v2545_v7 = vadd.f32 %v2493_v43, %v2033_v13 }
 0x286   : > { %v2640_v34 = vadd.f32 %v2639_v44, %v2545_v7  ;;  %v2679_v21 = vmul.f32 %v2545_v7, %v2545_v7 }
 0x287   : > { %v2316_v60 = vpop.f32.mrf.mxu2  ;;  %v2405_v27 = vpop.f32.mrf.mxu3 }
 0x288   : > { %v2710_v25 = vadd.f32 %v2709_v1, %v2679_v21  ;;  %v2406_v41 = vadd.f32 %v2405_v27, %v2316_v60  ;;  %v2037_v48 = vpop.f32.mrf.mxu1  ;;  %v2497_v52 = vpop.f32.mrf.mxu0 }
 0x289   : > { %v2038_v10 = vadd.f32 %v2037_v48, %v4384_v19 }
 0x28a   : > { %v2495_v53 = vadd.f32 %v2494_v9, %v2406_v41 }
 0x28c   : > { %v2546_v18 = vadd.f32 %v2495_v53, %v2035_v37 }
 0x28e   : > { %v3383_v15 = vpack.c.bf16 %v2546_v18, %v2545_v7  ;;  %v2641_v20 = vadd.f32 %v2640_v34, %v2546_v18  ;;  %v2680_v22 = vmul.f32 %v2546_v18, %v2546_v18 }
 0x28f   : > { %v2319_v14 = vpop.f32.mrf.mxu2  ;;  %v2408_v45 = vpop.f32.mrf.mxu3 }
 0x290   : > { %3431 = vst [vmem:[%s4453_s18 + $0x48] sm:$0xff] %v3383_v15   ;;  %v2711_v28 = vadd.f32 %v2710_v25, %v2680_v22  ;;  %v2409_v54 = vadd.f32 %v2408_v45, %v2319_v14  ;;  %v2039_v24 = vpop.f32.mrf.mxu1  ;;  %v2499_v55 = vpop.f32.mrf.mxu0 }
 0x291   : > { %v2040_v58 = vadd.f32 %v2039_v24, %v4391_v12 }
 0x292   : > { %v2498_v42 = vadd.f32 %v2497_v52, %v2409_v54  ;;  %v4650_v54 = vld [vmem:[#allocation5_spill] sm:$0xff] }
 0x294   : > { %v2547_v2 = vadd.f32 %v2498_v42, %v2038_v10 }
 0x296   : > { %v2642_v23 = vadd.f32 %v2641_v20, %v2547_v2  ;;  %v2681_v4 = vmul.f32 %v2547_v2, %v2547_v2 }
 0x297   : > { %v2321_v51 = vpop.f32.mrf.mxu2  ;;  %v2410_v29 = vpop.f32.mrf.mxu3 }
 0x298   : > { %v2712_v46 = vadd.f32 %v2711_v28, %v2681_v4  ;;  %v2411_v50 = vadd.f32 %v2410_v29, %v2321_v51  ;;  %v2042_v40 = vpop.f32.mrf.mxu1  ;;  %v2502_v33 = vpop.f32.mrf.mxu0 }
 0x299   : > { %v2043_v32 = vadd.f32 %v2042_v40, %v4394_v30  ;;  %v4651_v40 = vld [vmem:[#allocation8_spill] sm:$0xff] }
 0x29a   : > { %v2500_v63 = vadd.f32 %v2499_v55, %v2411_v50 }
 0x29c   : > { %v2548_v56 = vadd.f32 %v2500_v63, %v2040_v58 }
 0x29e   : > { %v3388_v47 = vpack.c.bf16 %v2548_v56, %v2547_v2  ;;  %v2643_v57 = vadd.f32 %v2642_v23, %v2548_v56  ;;  %v2682_v61 = vmul.f32 %v2548_v56, %v2548_v56 }
 0x29f   : > { %v2324_v11 = vpop.f32.mrf.mxu2  ;;  %v2413_v19 = vpop.f32.mrf.mxu3 }
 0x2a0   : > { %3432 = vst [vmem:[%s4453_s18 + $0x50] sm:$0xff] %v3388_v47   ;;  %v2713_v62 = vadd.f32 %v2712_v46, %v2682_v61  ;;  %v2414_v39 = vadd.f32 %v2413_v19, %v2324_v11  ;;  %v2044_v16 = vpop.f32.mrf.mxu1  ;;  %v2504_v3 = vpop.f32.mrf.mxu0 }
 0x2a1   : > { %v2045_v9 = vadd.f32 %v2044_v16, %v4401_v49 }
 0x2a2   : > { %v2503_v26 = vadd.f32 %v2502_v33, %v2414_v39 }
 0x2a4   : > { %v2549_v6 = vadd.f32 %v2503_v26, %v2043_v32 }
 0x2a6   : > { %v2644_v44 = vadd.f32 %v2643_v57, %v2549_v6  ;;  %v2683_v17 = vmul.f32 %v2549_v6, %v2549_v6 }
 0x2a7   : > { %v2326_v12 = vpop.f32.mrf.mxu2  ;;  %v2415_v0 = vpop.f32.mrf.mxu3 }
 0x2a8   : > { %v2714_v59 = vadd.f32 %v2713_v62, %v2683_v17  ;;  %v2416_v1 = vadd.f32 %v2415_v0, %v2326_v12  ;;  %v2047_v8 = vpop.f32.mrf.mxu1  ;;  %v2507_v5 = vpop.f32.mrf.mxu0 }
 0x2a9   : > { %v2048_v52 = vadd.f32 %v2047_v8, %v4404_v31 }
 0x2aa   : > { %v2505_v13 = vadd.f32 %v2504_v3, %v2416_v1 }
 0x2ac   : > { %v2550_v43 = vadd.f32 %v2505_v13, %v2045_v9 }
 0x2ae   : > { %v3393_v7 = vpack.c.bf16 %v2550_v43, %v2549_v6  ;;  %v2645_v34 = vadd.f32 %v2644_v44, %v2550_v43  ;;  %v2684_v21 = vmul.f32 %v2550_v43, %v2550_v43 }
 0x2af   : > { %v2329_v60 = vpop.f32.mrf.mxu2  ;;  %v2418_v30 = vpop.f32.mrf.mxu3 }
 0x2b0   : > { %3433 = vst [vmem:[%s4453_s18 + $0x58] sm:$0xff] %v3393_v7   ;;  %v2715_v27 = vadd.f32 %v2714_v59, %v2684_v21  ;;  %v2419_v25 = vadd.f32 %v2418_v30, %v2329_v60  ;;  %v2049_v41 = vpop.f32.mrf.mxu1  ;;  %v2509_v48 = vpop.f32.mrf.mxu0 }
 0x2b1   : > { %v2050_v24 = vadd.f32 %v2049_v41, %v4650_v54 }
 0x2b2   : > { %v2508_v37 = vadd.f32 %v2507_v5, %v2419_v25 }
 0x2b4   : > { %v2551_v53 = vadd.f32 %v2508_v37, %v2048_v52 }
 0x2b6   : > { %v2646_v18 = vadd.f32 %v2645_v34, %v2551_v53  ;;  %v2685_v15 = vmul.f32 %v2551_v53, %v2551_v53 }
 0x2b7   : > { %v2331_v49 = vpop.f32.mrf.mxu2  ;;  %v2420_v20 = vpop.f32.mrf.mxu3 }
 0x2b8   : > { %v2716_v22 = vadd.f32 %v2715_v27, %v2685_v15  ;;  %v2421_v14 = vadd.f32 %v2420_v20, %v2331_v49  ;;  %v2052_v45 = vpop.f32.mrf.mxu1  ;;  %v2512_v28 = vpop.f32.mrf.mxu0  ;;  %v4652_v20 = vld [vmem:[#allocation19_spill] sm:$0xff] }
 0x2b9   : > { %v2053_v33 = vadd.f32 %v2052_v45, %v4651_v40 }
 0x2ba   : > { %v2510_v55 = vadd.f32 %v2509_v48, %v2421_v14 }
 0x2bc   : > { %v2552_v10 = vadd.f32 %v2510_v55, %v2050_v24 }
 0x2be   : > { %v3398_v42 = vpack.c.bf16 %v2552_v10, %v2551_v53  ;;  %v2647_v2 = vadd.f32 %v2646_v18, %v2552_v10  ;;  %v2686_v23 = vmul.f32 %v2552_v10, %v2552_v10 }
 0x2bf   : > { %v2334_v4 = vpop.f32.mrf.mxu2  ;;  %v2423_v31 = vpop.f32.mrf.mxu3 }
 0x2c0   : > { %3434 = vst [vmem:[%s4453_s18 + $0x60] sm:$0xff] %v3398_v42   ;;  %v2717_v51 = vadd.f32 %v2716_v22, %v2686_v23  ;;  %v2424_v29 = vadd.f32 %v2423_v31, %v2334_v4  ;;  %v2054_v46 = vpop.f32.mrf.mxu1  ;;  %v2514_v50 = vpop.f32.mrf.mxu0  ;;  %v4653_v23 = vld [vmem:[#allocation21_spill] sm:$0xff] }
 0x2c1   : > { %v2055_v39 = vadd.f32 %v2054_v46, %v4421_v38 }
 0x2c2   : > { %v2513_v58 = vadd.f32 %v2512_v28, %v2424_v29 }
 0x2c4   : > { %v2553_v63 = vadd.f32 %v2513_v58, %v2053_v33 }
 0x2c6   : > { %v2648_v56 = vadd.f32 %v2647_v2, %v2553_v63  ;;  %v2687_v47 = vmul.f32 %v2553_v63, %v2553_v63 }
 0x2c7   : > { %v2336_v57 = vpop.f32.mrf.mxu2  ;;  %v2425_v61 = vpop.f32.mrf.mxu3 }
 0x2c8   : > { %v2718_v11 = vadd.f32 %v2717_v51, %v2687_v47  ;;  %v2426_v19 = vadd.f32 %v2425_v61, %v2336_v57  ;;  %v2057_v62 = vpop.f32.mrf.mxu1  ;;  %v2517_v3 = vpop.f32.mrf.mxu0 }
 0x2c9   : > { %v2058_v1 = vadd.f32 %v2057_v62, %v4424_v36 }
 0x2ca   : > { %v2515_v16 = vadd.f32 %v2514_v50, %v2426_v19 }
 0x2cc   : > { %v2554_v32 = vadd.f32 %v2515_v16, %v2055_v39 }
 0x2ce   : > { %v3403_v26 = vpack.c.bf16 %v2554_v32, %v2553_v63  ;;  %v2649_v6 = vadd.f32 %v2648_v56, %v2554_v32  ;;  %v2688_v44 = vmul.f32 %v2554_v32, %v2554_v32 }
 0x2cf   : > { %v2339_v17 = vpop.f32.mrf.mxu2  ;;  %v2428_v12 = vpop.f32.mrf.mxu3 }
 0x2d0   : > { %3435 = vst [vmem:[%s4453_s18 + $0x68] sm:$0xff] %v3403_v26   ;;  %v2719_v0 = vadd.f32 %v2718_v11, %v2688_v44  ;;  %v2429_v59 = vadd.f32 %v2428_v12, %v2339_v17  ;;  %v2059_v5 = vpop.f32.mrf.mxu1  ;;  %v2519_v13 = vpop.f32.mrf.mxu0 }
 0x2d1   : > { %v2060_v30 = vadd.f32 %v2059_v5, %v4431_v35 }
 0x2d2   : > { %v2518_v8 = vadd.f32 %v2517_v3, %v2429_v59 }
 0x2d4   : > { %v2555_v9 = vadd.f32 %v2518_v8, %v2058_v1 }
 0x2d6   : > { %v2650_v43 = vadd.f32 %v2649_v6, %v2555_v9  ;;  %v2689_v38 = vmul.f32 %v2555_v9, %v2555_v9 }
 0x2d7   : > { %v2341_v7 = vpop.f32.mrf.mxu2  ;;  %v2430_v34 = vpop.f32.mrf.mxu3 }
 0x2d8   : > { %v2720_v21 = vadd.f32 %v2719_v0, %v2689_v38  ;;  %v2431_v60 = vadd.f32 %v2430_v34, %v2341_v7  ;;  %v2062_v41 = vpop.f32.mrf.mxu1  ;;  %v2522_v36 = vpop.f32.mrf.mxu0 }
 0x2d9   : > { %v2063_v22 = vadd.f32 %v2062_v41, %v4652_v20 }
 0x2da   : > { %v2520_v27 = vadd.f32 %v2519_v13, %v2431_v60 }
 0x2dc   : > { %v2556_v25 = vadd.f32 %v2520_v27, %v2060_v30 }
 0x2de   : > { %v3408_v48 = vpack.c.bf16 %v2556_v25, %v2555_v9  ;;  %v2651_v52 = vadd.f32 %v2650_v43, %v2556_v25  ;;  %v2690_v37 = vmul.f32 %v2556_v25, %v2556_v25 }
 0x2df   : > { %v2344_v53 = vpop.f32.mrf.mxu2  ;;  %v2433_v18 = vpop.f32.mrf.mxu3 }
 0x2e0   : > { %3436 = vst [vmem:[%s4453_s18 + $0x70] sm:$0xff] %v3408_v48   ;;  %v2721_v15 = vadd.f32 %v2720_v21, %v2690_v37  ;;  %v2434_v49 = vadd.f32 %v2433_v18, %v2344_v53  ;;  %v2064_v35 = vpop.f32.mrf.mxu1  ;;  %v2524_v2 = vpop.f32.mrf.mxu0 }
 0x2e1   : > { %v2065_v4 = vadd.f32 %v2064_v35, %v4653_v23 }
 0x2e2   : > { %v2523_v14 = vadd.f32 %v2522_v36, %v2434_v49 }
 0x2e4   : > { %v2557_v45 = vadd.f32 %v2523_v14, %v2063_v22 }
 0x2e6   : > { %v2652_v28 = vadd.f32 %v2651_v52, %v2557_v45  ;;  %v2691_v54 = vmul.f32 %v2557_v45, %v2557_v45 }
 0x2e7   : > { %v2346_v24 = vpop.f32.mrf.mxu2  ;;  %v2435_v55 = vpop.f32.mrf.mxu3 }
 0x2e8   : > { %v2722_v10 = vadd.f32 %v2721_v15, %v2691_v54  ;;  %v2436_v42 = vadd.f32 %v2435_v55, %v2346_v24 }
 0x2ea   : > { %v2525_v31 = vadd.f32 %v2524_v2, %v2436_v42 }
 0x2ec   : > { %v2558_v51 = vadd.f32 %v2525_v31, %v2065_v4 }
 0x2ee   : > { %v3413_v29 = vpack.c.bf16 %v2558_v51, %v2557_v45  ;;  %v2653_v46 = vadd.f32 %v2652_v28, %v2558_v51  ;;  %v2692_v50 = vmul.f32 %v2558_v51, %v2558_v51 }
 0x2f0   : > { %3437 = vst [vmem:[%s4453_s18 + $0x78] sm:$0xff] %v3413_v29   ;;  %v2654_v40 = vrot.slane %v2653_v46, 4  ;;  %v2723_v33 = vadd.f32 %v2722_v10, %v2692_v50 }
 0x2f2   : > { %v2655_v58 = vadd.f32 %v2654_v40, %v2653_v46  ;;  %v2724_v63 = vrot.slane %v2723_v33, 4 }
 0x2f4   : > { %v2656_v56 = vrot.slane %v2655_v58, 2  ;;  %v2725_v47 = vadd.f32 %v2724_v63, %v2723_v33 }
 0x2f6   : > { %v2657_v57 = vadd.f32 %v2656_v56, %v2655_v58  ;;  %v2726_v61 = vrot.slane %v2725_v47, 2 }
 0x2f8   : > { %v2658_v11 = vrot.slane %v2657_v57, 1  ;;  %v2727_v19 = vadd.f32 %v2726_v61, %v2725_v47 }
 0x2fa   : > { %v2659_v62 = vadd.f32 %v2658_v11, %v2657_v57  ;;  %v2728_v39 = vrot.slane %v2727_v19, 1 }
 0x2fc   : > { %2660 = vst [vmem:[%s266_s23] sm:$0x1] %v2659_v62  ;;  %v2729_v16 = vadd.f32 %v2728_v39, %v2727_v19 }
 0x2fe   : > { %2730 = vst [vmem:[%s269_s26] sm:$0x1] %v2729_v16 }
 0x2ff PF: > { %s17_s21 = sadd.s32 1, %s3482_s21  }
 0x300   : > { %p14_p5 = scmp.ge.s32.totalorder %s17_s21, 4  }
 0x302   :  { %16 = sbr.rel (!%p14_p5) target bundleno = 1 (0x1), region = 92 }

</bundles_post_ra>
